<compile_context>
chip_gen: v6e
topology: v6e:2x2x1
jax: 0.10.0
libtpu: 0.0.40
codegen_flags: <defaults>
</compile_context>

<pallas_src>
import functools

import jax
import jax.numpy as jnp
from jax.experimental import pallas as pl
from jax.experimental.pallas import tpu as pltpu


# ------------------------------ Pallas kernel ------------------------------ #

def _make_corblock_kernel(times, h, w, hs, ws, cs):
    """Builds the fused CORblock_S kernel for fixed static shapes.

    Ref order: x, sel, w_skip, b_skip, [w1_t, b1_t, w2_t, b2_t, w3_t, b3_t] * times,
               out, scratch.
    """
    f32 = jnp.float32
    bf16 = jnp.bfloat16

    def conv2_3x3(scr, h1, w2_ref, hh, ww):
        """Stride-1 3x3 conv, pad=1, of h1 (hh*ww, cs) against w2 (9*cs, cs).

        h1 is written into a row-padded VMEM scratch; the 9 taps are shifted
        contiguous slab reads with per-dx column masks.  Returns the pre-bias
        (hh*ww, cs) f32 output.
        """
        m = hh * ww
        pad = ww + 1                                   # zero rows around the image
        scr[...] = jnp.zeros(scr.shape, scr.dtype)     # clear pads (and stale data)
        scr[pl.ds(pad, m), :] = h1                     # interior = conv1 output

        col = jax.lax.broadcasted_iota(jnp.int32, (m, 1), 0) % ww
        acc = jnp.zeros((m, cs), f32)
        for dy in (-1, 0, 1):
            for dx in (-1, 0, 1):
                tap = (dy + 1) * 3 + (dx + 1)
                slab = scr[pl.ds(pad + dy * ww + dx, m), :]
                if dx != 0:
                    valid = (col + dx >= 0) & (col + dx < ww)
                    slab = slab * valid.astype(slab.dtype)
                acc = acc + jnp.dot(
                    slab.astype(bf16),
                    w2_ref[pl.ds(tap * cs, cs), :],
                    preferred_element_type=f32)
        return acc

    def kernel(*refs):
        scr = refs[-1]
        o_ref = refs[-2]
        x_ref, sel_ref, wskip_ref, bskip_ref = refs[:4]
        wt = refs[4:-2]

        x0 = x_ref[0]                                  # (h*w, cin) bf16
        sel = sel_ref[...]                             # (hs*ws, h*w) f32, 0/1

        # ----------------------- t = 0 (stride-2 step) -----------------------
        w1, b1, w2, b2, w3, b3 = wt[0:6]

        # skip = norm_skip(skip(conv_input(inp))): subsample + folded 1x1 + bias
        xs = jnp.dot(sel, x0.astype(f32), preferred_element_type=f32)
        skip = (jnp.dot(xs.astype(bf16), wskip_ref[...],
                        preferred_element_type=f32) + bskip_ref[...])

        # conv1 (conv_input folded in) + bn1 + relu, at full resolution
        h1 = jnp.maximum(
            jnp.dot(x0, w1[...], preferred_element_type=f32) + b1[...], 0.0)

        # conv2 (3x3) at stride 1, then stride-2 subsample via selection matmul
        h2f = conv2_3x3(scr, h1, w2, h, w)                       # (h*w, cs)
        h2 = jnp.maximum(
            jnp.dot(sel, h2f, preferred_element_type=f32) + b2[...], 0.0)

        # conv3 + bn3 + residual + relu
        xc = jnp.maximum(
            jnp.dot(h2.astype(bf16), w3[...], preferred_element_type=f32)
            + b3[...] + skip, 0.0)                               # (hs*ws, cout)

        # ---------------------- t >= 1 (stride-1 steps) ----------------------
        for t in range(1, times):
            w1, b1, w2, b2, w3, b3 = wt[6 * t:6 * t + 6]
            skip = xc
            h1 = jnp.maximum(
                jnp.dot(xc.astype(bf16), w1[...], preferred_element_type=f32)
                + b1[...], 0.0)                                  # (hs*ws, cs)
            h2f = conv2_3x3(scr, h1, w2, hs, ws)
            h2 = jnp.maximum(h2f + b2[...], 0.0)
            xc = jnp.maximum(
                jnp.dot(h2.astype(bf16), w3[...], preferred_element_type=f32)
                + b3[...] + skip, 0.0)

        o_ref[0] = xc.astype(o_ref.dtype)

    return kernel


# ------------------------------ JAX wrapper --------------------------------- #

def _bn_fold(gamma, beta, mean, var, eps=1e-5):
    scale = gamma / jnp.sqrt(var + eps)
    bias = beta - mean * scale
    return scale, bias


def _make_selection_matrix(h, w, hs, ws):
    """0/1 matrix S with S[oy*ws+ox, (2*oy)*w + 2*ox] = 1 (stride-2 row gather)."""
    oy = jnp.arange(hs)
    ox = jnp.arange(ws)
    rows = (oy[:, None] * ws + ox[None, :]).reshape(-1)
    cols = (2 * oy[:, None] * w + 2 * ox[None, :]).reshape(-1)
    return jnp.zeros((hs * ws, h * w), jnp.float32).at[rows, cols].set(1.0)


def corblock_s_forward(params, inp_nchw, *, times, scale):
    """Forward pass of CORblock_S (eval-mode BN).  Input / output are NCHW."""
    f32, bf16 = jnp.float32, jnp.bfloat16

    x = jnp.transpose(inp_nchw, (0, 2, 3, 1))              # -> NHWC
    n, h, w, cin = x.shape
    cout = params["conv_input_w"].shape[1]
    cs = cout * scale
    hs, ws = (h - 1) // 2 + 1, (w - 1) // 2 + 1            # stride-2 output dims

    # ---- fold conv_input and BN scales into the conv weights (host prep) ----
    wi = params["conv_input_w"]                            # (cin, cout)
    s_sk, b_sk = _bn_fold(*params["norm_skip"])
    w_skip = ((wi @ params["skip_w"]) * s_sk[None, :]).astype(bf16)
    b_skip = b_sk.reshape(1, cout).astype(f32)

    flat_w = []
    for t in range(times):
        s1, b1 = _bn_fold(*params[f"norm1_{t}"])
        s2, b2 = _bn_fold(*params[f"norm2_{t}"])
        s3, b3 = _bn_fold(*params[f"norm3_{t}"])
        w1_base = (wi @ params["conv1_w"]) if t == 0 else params["conv1_w"]
        flat_w += [
            (w1_base * s1[None, :]).astype(bf16), b1.reshape(1, cs).astype(f32),
            (params["conv2_w"].reshape(9 * cs, cs) * s2[None, :]).astype(bf16),
            b2.reshape(1, cs).astype(f32),
            (params["conv3_w"] * s3[None, :]).astype(bf16),
            b3.reshape(1, cout).astype(f32),
        ]

    sel = _make_selection_matrix(h, w, hs, ws)
    x_flat = x.reshape(n, h * w, cin).astype(bf16)

    scr_rows = ((h * w + 2 * w + 2 + 7) // 8) * 8          # row-padded conv2 scratch

    def full(a):
        return pl.BlockSpec(a.shape, lambda i: (0,) * a.ndim)

    in_specs = ([pl.BlockSpec((1, h * w, cin), lambda i: (i, 0, 0)),
                 full(sel), full(w_skip), full(b_skip)]
                + [full(a) for a in flat_w])

    out = pl.pallas_call(
        _make_corblock_kernel(times, h, w, hs, ws, cs),
        grid=(n,),
        in_specs=in_specs,
        out_specs=pl.BlockSpec((1, hs * ws, cout), lambda i: (i, 0, 0)),
        out_shape=jax.ShapeDtypeStruct((n, hs * ws, cout), f32),
        scratch_shapes=[pltpu.VMEM((scr_rows, cs), f32)],
        compiler_params=pltpu.CompilerParams(
            dimension_semantics=("parallel",)),
    )(x_flat, sel, w_skip, b_skip, *flat_w)

    # tiny (n, hs*ws, cout) slab back to NCHW
    return jnp.transpose(out.reshape(n, hs, ws, cout), (0, 3, 1, 2))


# ---------------------------------- params ---------------------------------- #

def init_params(key, in_channels, out_channels, times, scale):
    cs = out_channels * scale
    keys = iter(jax.random.split(key, 64))

    def w(shape, fan_in):
        return jax.random.normal(next(keys), shape, jnp.float32) * (2.0 / fan_in) ** 0.5

    def bn(c):
        g = 1.0 + 0.1 * jax.random.normal(next(keys), (c,), jnp.float32)
        b = 0.1 * jax.random.normal(next(keys), (c,), jnp.float32)
        mean = jnp.zeros((c,), jnp.float32)
        var = jnp.ones((c,), jnp.float32)
        return (g, b, mean, var)

    p = {
        "conv_input_w": w((in_channels, out_channels), in_channels),   # 1x1
        "skip_w": w((out_channels, out_channels), out_channels),       # 1x1 stride-2
        "norm_skip": bn(out_channels),
        "conv1_w": w((out_channels, cs), out_channels),                # 1x1
        "conv2_w": w((3, 3, cs, cs), 9 * cs),                          # 3x3 (kh,kw,cin,cout)
        "conv3_w": w((cs, out_channels), cs),                          # 1x1
    }
    for t in range(times):
        p[f"norm1_{t}"] = bn(cs)
        p[f"norm2_{t}"] = bn(cs)
        p[f"norm3_{t}"] = bn(out_channels)
    return p


# ----------------------------------- main ------------------------------------ #

if __name__ == "__main__":
    in_channels, out_channels, times, scale = 4, 16, 2, 4

    key = jax.random.PRNGKey(0)
    k_inp, k_par = jax.random.split(key)
    x = jax.random.normal(k_inp, (2, in_channels, 16, 16), dtype=jnp.float32)
    params = init_params(k_par, in_channels, out_channels, times, scale)

    fwd = jax.jit(functools.partial(corblock_s_forward, times=times, scale=scale))
    out = fwd(params, x)
    out = jax.block_until_ready(out)

    assert out.shape == (2, out_channels, 8, 8), out.shape
    assert bool(jnp.all(jnp.isfinite(out)))
    print("KERNEL_OK")
</pallas_src>

<mosaic_0001>
module attributes {stable_mosaic.version = 11 : i64} {
  func.func @kernel(%arg0: i32, %arg1: memref<1x256x4xbf16, #tpu.memory_space<vmem>>, %arg2: memref<64x256xf32, #tpu.memory_space<vmem>>, %arg3: memref<4x16xbf16, #tpu.memory_space<vmem>>, %arg4: memref<1x16xf32, #tpu.memory_space<vmem>>, %arg5: memref<4x64xbf16, #tpu.memory_space<vmem>>, %arg6: memref<1x64xf32, #tpu.memory_space<vmem>>, %arg7: memref<576x64xbf16, #tpu.memory_space<vmem>>, %arg8: memref<1x64xf32, #tpu.memory_space<vmem>>, %arg9: memref<64x16xbf16, #tpu.memory_space<vmem>>, %arg10: memref<1x16xf32, #tpu.memory_space<vmem>>, %arg11: memref<16x64xbf16, #tpu.memory_space<vmem>>, %arg12: memref<1x64xf32, #tpu.memory_space<vmem>>, %arg13: memref<576x64xbf16, #tpu.memory_space<vmem>>, %arg14: memref<1x64xf32, #tpu.memory_space<vmem>>, %arg15: memref<64x16xbf16, #tpu.memory_space<vmem>>, %arg16: memref<1x16xf32, #tpu.memory_space<vmem>>, %arg17: memref<1x64x16xf32, #tpu.memory_space<vmem>>, %arg18: memref<296x64xf32, #tpu.memory_space<vmem>>) attributes {dimension_semantics = [#tpu.dimension_semantics<parallel>], iteration_bounds = array<i64: 2>, scalar_prefetch = 0 : i64, scratch_operands = 1 : i64, tpu.core_type = #tpu.core_type<tc>, window_params = [{transform_indices = @transform_0, window_bounds = array<i64: 1, 256, 4>}, {pipeline_mode = #tpu.pipeline_mode<synchronous>, transform_indices = @transform_1, window_bounds = array<i64: 64, 256>}, {pipeline_mode = #tpu.pipeline_mode<synchronous>, transform_indices = @transform_2, window_bounds = array<i64: 4, 16>}, {pipeline_mode = #tpu.pipeline_mode<synchronous>, transform_indices = @transform_3, window_bounds = array<i64: 1, 16>}, {pipeline_mode = #tpu.pipeline_mode<synchronous>, transform_indices = @transform_4, window_bounds = array<i64: 4, 64>}, {pipeline_mode = #tpu.pipeline_mode<synchronous>, transform_indices = @transform_5, window_bounds = array<i64: 1, 64>}, {pipeline_mode = #tpu.pipeline_mode<synchronous>, transform_indices = @transform_6, window_bounds = array<i64: 576, 64>}, {pipeline_mode = #tpu.pipeline_mode<synchronous>, transform_indices = @transform_7, window_bounds = array<i64: 1, 64>}, {pipeline_mode = #tpu.pipeline_mode<synchronous>, transform_indices = @transform_8, window_bounds = array<i64: 64, 16>}, {pipeline_mode = #tpu.pipeline_mode<synchronous>, transform_indices = @transform_9, window_bounds = array<i64: 1, 16>}, {pipeline_mode = #tpu.pipeline_mode<synchronous>, transform_indices = @transform_10, window_bounds = array<i64: 16, 64>}, {pipeline_mode = #tpu.pipeline_mode<synchronous>, transform_indices = @transform_11, window_bounds = array<i64: 1, 64>}, {pipeline_mode = #tpu.pipeline_mode<synchronous>, transform_indices = @transform_12, window_bounds = array<i64: 576, 64>}, {pipeline_mode = #tpu.pipeline_mode<synchronous>, transform_indices = @transform_13, window_bounds = array<i64: 1, 64>}, {pipeline_mode = #tpu.pipeline_mode<synchronous>, transform_indices = @transform_14, window_bounds = array<i64: 64, 16>}, {pipeline_mode = #tpu.pipeline_mode<synchronous>, transform_indices = @transform_15, window_bounds = array<i64: 1, 16>}, {transform_indices = @transform_16, window_bounds = array<i64: 1, 64, 16>}]} {
    %c0 = arith.constant 0 : index
    %c0_0 = arith.constant 0 : index
    %c0_1 = arith.constant 0 : index
    %0 = vector.load %arg1[%c0, %c0_0, %c0_1] : memref<1x256x4xbf16, #tpu.memory_space<vmem>>, vector<1x256x4xbf16>
    %1 = vector.shape_cast %0 : vector<1x256x4xbf16> to vector<256x4xbf16>
    %c0_2 = arith.constant 0 : index
    %c0_3 = arith.constant 0 : index
    %2 = vector.load %arg2[%c0_2, %c0_3] : memref<64x256xf32, #tpu.memory_space<vmem>>, vector<64x256xf32>
    %3 = arith.extf %1 : vector<256x4xbf16> to vector<256x4xf32>
    %cst = arith.constant dense<0.000000e+00> : vector<64x4xf32>
    %4 = tpu.matmul %2, %3, %cst {dimension_numbers = #tpu.dot_dimension_numbers<[1], [0], [0], [1], [0, 0, 1, 1], [], []>} : vector<64x256xf32>, vector<256x4xf32>, vector<64x4xf32> -> vector<64x4xf32>
    %5 = arith.truncf %4 : vector<64x4xf32> to vector<64x4xbf16>
    %c0_4 = arith.constant 0 : index
    %c0_5 = arith.constant 0 : index
    %6 = vector.load %arg3[%c0_4, %c0_5] : memref<4x16xbf16, #tpu.memory_space<vmem>>, vector<4x16xbf16>
    %cst_6 = arith.constant dense<0.000000e+00> : vector<64x16xf32>
    %7 = tpu.matmul %5, %6, %cst_6 {dimension_numbers = #tpu.dot_dimension_numbers<[1], [0], [0], [1], [0, 0, 1, 1], [], []>} : vector<64x4xbf16>, vector<4x16xbf16>, vector<64x16xf32> -> vector<64x16xf32>
    %c0_7 = arith.constant 0 : index
    %c0_8 = arith.constant 0 : index
    %8 = vector.load %arg4[%c0_7, %c0_8] : memref<1x16xf32, #tpu.memory_space<vmem>>, vector<1x16xf32>
    %9 = vector.broadcast %8 : vector<1x16xf32> to vector<64x16xf32>
    %10 = arith.addf %7, %9 : vector<64x16xf32>
    %c0_9 = arith.constant 0 : index
    %c0_10 = arith.constant 0 : index
    %11 = vector.load %arg5[%c0_9, %c0_10] : memref<4x64xbf16, #tpu.memory_space<vmem>>, vector<4x64xbf16>
    %cst_11 = arith.constant dense<0.000000e+00> : vector<256x64xf32>
    %12 = tpu.matmul %1, %11, %cst_11 {dimension_numbers = #tpu.dot_dimension_numbers<[1], [0], [0], [1], [0, 0, 1, 1], [], []>} : vector<256x4xbf16>, vector<4x64xbf16>, vector<256x64xf32> -> vector<256x64xf32>
    %c0_12 = arith.constant 0 : index
    %c0_13 = arith.constant 0 : index
    %13 = vector.load %arg6[%c0_12, %c0_13] : memref<1x64xf32, #tpu.memory_space<vmem>>, vector<1x64xf32>
    %14 = vector.broadcast %13 : vector<1x64xf32> to vector<256x64xf32>
    %15 = arith.addf %12, %14 : vector<256x64xf32>
    %cst_14 = arith.constant 0.000000e+00 : f32
    %16 = vector.broadcast %cst_14 : f32 to vector<256x64xf32>
    %17 = arith.maximumf %15, %16 : vector<256x64xf32>
    %cst_15 = arith.constant 0.000000e+00 : f32
    %18 = vector.broadcast %cst_15 : f32 to vector<296x64xf32>
    %c0_16 = arith.constant 0 : index
    %c0_17 = arith.constant 0 : index
    %19 = vector.load %arg18[%c0_16, %c0_17] : memref<296x64xf32, #tpu.memory_space<vmem>>, vector<296x64xf32>
    tpu.vector_store %arg18[%c0_16, %c0_17], %18 {strides = array<i32>} : memref<296x64xf32, #tpu.memory_space<vmem>>, vector<296x64xf32>,
    %c17 = arith.constant 17 : index
    %c0_18 = arith.constant 0 : index
    %20 = vector.load %arg18[%c17, %c0_18] : memref<296x64xf32, #tpu.memory_space<vmem>>, vector<256x64xf32>
    tpu.vector_store %arg18[%c17, %c0_18], %17 {strides = array<i32>} : memref<296x64xf32, #tpu.memory_space<vmem>>, vector<256x64xf32>,
    %21 = tpu.iota {dimensions = array<i32: 0>} : vector<256x1xi32>
    %c16_i32 = arith.constant 16 : i32
    %c0_i32 = arith.constant 0 : i32
    %22 = arith.cmpi eq, %c16_i32, %c0_i32 : i32
    %c1_i32 = arith.constant 1 : i32
    %23 = arith.select %22, %c1_i32, %c16_i32 : i32
    %24 = vector.broadcast %23 : i32 to vector<256x1xi32>
    %25 = arith.remsi %21, %24 : vector<256x1xi32>
    %c0_i32_19 = arith.constant 0 : i32
    %26 = vector.broadcast %c0_i32_19 : i32 to vector<256x1xi32>
    %27 = arith.cmpi ne, %25, %26 : vector<256x1xi32>
    %c0_i32_20 = arith.constant 0 : i32
    %28 = vector.broadcast %c0_i32_20 : i32 to vector<256x1xi32>
    %29 = arith.cmpi slt, %25, %28 : vector<256x1xi32>
    %c0_i32_21 = arith.constant 0 : i32
    %30 = arith.cmpi slt, %23, %c0_i32_21 : i32
    %31 = vector.broadcast %30 : i1 to vector<256x1xi1>
    %32 = vector.broadcast %31 : vector<256x1xi1> to vector<256x1xi1>
    %33 = arith.xori %29, %32 : vector<256x1xi1>
    %34 = arith.andi %33, %27 : vector<256x1xi1>
    %35 = vector.broadcast %23 : i32 to vector<256x1xi32>
    %36 = arith.addi %25, %35 : vector<256x1xi32>
    %37 = arith.select %34, %36, %25 : vector<256x1xi1>, vector<256x1xi32>
    %cst_22 = arith.constant 0.000000e+00 : f32
    %38 = vector.broadcast %cst_22 : f32 to vector<256x64xf32>
    %c0_23 = arith.constant 0 : index
    %c0_24 = arith.constant 0 : index
    %39 = vector.load %arg18[%c0_23, %c0_24] : memref<296x64xf32, #tpu.memory_space<vmem>>, vector<256x64xf32>
    %c-1_i32 = arith.constant -1 : i32
    %40 = vector.broadcast %c-1_i32 : i32 to vector<256x1xi32>
    %41 = arith.addi %37, %40 : vector<256x1xi32>
    %c0_i32_25 = arith.constant 0 : i32
    %42 = vector.broadcast %c0_i32_25 : i32 to vector<256x1xi32>
    %43 = arith.cmpi sge, %41, %42 : vector<256x1xi32>
    %c-1_i32_26 = arith.constant -1 : i32
    %44 = vector.broadcast %c-1_i32_26 : i32 to vector<256x1xi32>
    %45 = arith.addi %37, %44 : vector<256x1xi32>
    %c16_i32_27 = arith.constant 16 : i32
    %46 = vector.broadcast %c16_i32_27 : i32 to vector<256x1xi32>
    %47 = arith.cmpi slt, %45, %46 : vector<256x1xi32>
    %48 = arith.andi %43, %47 : vector<256x1xi1>
    %49 = arith.extui %48 : vector<256x1xi1> to vector<256x1xi32>
    %50 = arith.sitofp %49 : vector<256x1xi32> to vector<256x1xf32>
    %51 = vector.broadcast %50 : vector<256x1xf32> to vector<256x64xf32>
    %52 = arith.mulf %39, %51 : vector<256x64xf32>
    %53 = arith.truncf %52 : vector<256x64xf32> to vector<256x64xbf16>
    %c0_28 = arith.constant 0 : index
    %c0_29 = arith.constant 0 : index
    %54 = vector.load %arg7[%c0_28, %c0_29] : memref<576x64xbf16, #tpu.memory_space<vmem>>, vector<64x64xbf16>
    %cst_30 = arith.constant dense<0.000000e+00> : vector<256x64xf32>
    %55 = tpu.matmul %53, %54, %cst_30 {dimension_numbers = #tpu.dot_dimension_numbers<[1], [0], [0], [1], [0, 0, 1, 1], [], []>} : vector<256x64xbf16>, vector<64x64xbf16>, vector<256x64xf32> -> vector<256x64xf32>
    %56 = arith.addf %38, %55 : vector<256x64xf32>
    %c1 = arith.constant 1 : index
    %c0_31 = arith.constant 0 : index
    %57 = vector.load %arg18[%c1, %c0_31] : memref<296x64xf32, #tpu.memory_space<vmem>>, vector<256x64xf32>
    %58 = arith.truncf %57 : vector<256x64xf32> to vector<256x64xbf16>
    %c64 = arith.constant 64 : index
    %c0_32 = arith.constant 0 : index
    %59 = vector.load %arg7[%c64, %c0_32] : memref<576x64xbf16, #tpu.memory_space<vmem>>, vector<64x64xbf16>
    %cst_33 = arith.constant dense<0.000000e+00> : vector<256x64xf32>
    %60 = tpu.matmul %58, %59, %cst_33 {dimension_numbers = #tpu.dot_dimension_numbers<[1], [0], [0], [1], [0, 0, 1, 1], [], []>} : vector<256x64xbf16>, vector<64x64xbf16>, vector<256x64xf32> -> vector<256x64xf32>
    %61 = arith.addf %56, %60 : vector<256x64xf32>
    %c2 = arith.constant 2 : index
    %c0_34 = arith.constant 0 : index
    %62 = vector.load %arg18[%c2, %c0_34] : memref<296x64xf32, #tpu.memory_space<vmem>>, vector<256x64xf32>
    %c1_i32_35 = arith.constant 1 : i32
    %63 = vector.broadcast %c1_i32_35 : i32 to vector<256x1xi32>
    %64 = arith.addi %37, %63 : vector<256x1xi32>
    %c0_i32_36 = arith.constant 0 : i32
    %65 = vector.broadcast %c0_i32_36 : i32 to vector<256x1xi32>
    %66 = arith.cmpi sge, %64, %65 : vector<256x1xi32>
    %c1_i32_37 = arith.constant 1 : i32
    %67 = vector.broadcast %c1_i32_37 : i32 to vector<256x1xi32>
    %68 = arith.addi %37, %67 : vector<256x1xi32>
    %c16_i32_38 = arith.constant 16 : i32
    %69 = vector.broadcast %c16_i32_38 : i32 to vector<256x1xi32>
    %70 = arith.cmpi slt, %68, %69 : vector<256x1xi32>
    %71 = arith.andi %66, %70 : vector<256x1xi1>
    %72 = arith.extui %71 : vector<256x1xi1> to vector<256x1xi32>
    %73 = arith.sitofp %72 : vector<256x1xi32> to vector<256x1xf32>
    %74 = vector.broadcast %73 : vector<256x1xf32> to vector<256x64xf32>
    %75 = arith.mulf %62, %74 : vector<256x64xf32>
    %76 = arith.truncf %75 : vector<256x64xf32> to vector<256x64xbf16>
    %c128 = arith.constant 128 : index
    %c0_39 = arith.constant 0 : index
    %77 = vector.load %arg7[%c128, %c0_39] : memref<576x64xbf16, #tpu.memory_space<vmem>>, vector<64x64xbf16>
    %cst_40 = arith.constant dense<0.000000e+00> : vector<256x64xf32>
    %78 = tpu.matmul %76, %77, %cst_40 {dimension_numbers = #tpu.dot_dimension_numbers<[1], [0], [0], [1], [0, 0, 1, 1], [], []>} : vector<256x64xbf16>, vector<64x64xbf16>, vector<256x64xf32> -> vector<256x64xf32>
    %79 = arith.addf %61, %78 : vector<256x64xf32>
    %c16 = arith.constant 16 : index
    %c0_41 = arith.constant 0 : index
    %80 = vector.load %arg18[%c16, %c0_41] : memref<296x64xf32, #tpu.memory_space<vmem>>, vector<256x64xf32>
    %c-1_i32_42 = arith.constant -1 : i32
    %81 = vector.broadcast %c-1_i32_42 : i32 to vector<256x1xi32>
    %82 = arith.addi %37, %81 : vector<256x1xi32>
    %c0_i32_43 = arith.constant 0 : i32
    %83 = vector.broadcast %c0_i32_43 : i32 to vector<256x1xi32>
    %84 = arith.cmpi sge, %82, %83 : vector<256x1xi32>
    %c-1_i32_44 = arith.constant -1 : i32
    %85 = vector.broadcast %c-1_i32_44 : i32 to vector<256x1xi32>
    %86 = arith.addi %37, %85 : vector<256x1xi32>
    %c16_i32_45 = arith.constant 16 : i32
    %87 = vector.broadcast %c16_i32_45 : i32 to vector<256x1xi32>
    %88 = arith.cmpi slt, %86, %87 : vector<256x1xi32>
    %89 = arith.andi %84, %88 : vector<256x1xi1>
    %90 = arith.extui %89 : vector<256x1xi1> to vector<256x1xi32>
    %91 = arith.sitofp %90 : vector<256x1xi32> to vector<256x1xf32>
    %92 = vector.broadcast %91 : vector<256x1xf32> to vector<256x64xf32>
    %93 = arith.mulf %80, %92 : vector<256x64xf32>
    %94 = arith.truncf %93 : vector<256x64xf32> to vector<256x64xbf16>
    %c192 = arith.constant 192 : index
    %c0_46 = arith.constant 0 : index
    %95 = vector.load %arg7[%c192, %c0_46] : memref<576x64xbf16, #tpu.memory_space<vmem>>, vector<64x64xbf16>
    %cst_47 = arith.constant dense<0.000000e+00> : vector<256x64xf32>
    %96 = tpu.matmul %94, %95, %cst_47 {dimension_numbers = #tpu.dot_dimension_numbers<[1], [0], [0], [1], [0, 0, 1, 1], [], []>} : vector<256x64xbf16>, vector<64x64xbf16>, vector<256x64xf32> -> vector<256x64xf32>
    %97 = arith.addf %79, %96 : vector<256x64xf32>
    %c17_48 = arith.constant 17 : index
    %c0_49 = arith.constant 0 : index
    %98 = vector.load %arg18[%c17_48, %c0_49] : memref<296x64xf32, #tpu.memory_space<vmem>>, vector<256x64xf32>
    %99 = arith.truncf %98 : vector<256x64xf32> to vector<256x64xbf16>
    %c256 = arith.constant 256 : index
    %c0_50 = arith.constant 0 : index
    %100 = vector.load %arg7[%c256, %c0_50] : memref<576x64xbf16, #tpu.memory_space<vmem>>, vector<64x64xbf16>
    %cst_51 = arith.constant dense<0.000000e+00> : vector<256x64xf32>
    %101 = tpu.matmul %99, %100, %cst_51 {dimension_numbers = #tpu.dot_dimension_numbers<[1], [0], [0], [1], [0, 0, 1, 1], [], []>} : vector<256x64xbf16>, vector<64x64xbf16>, vector<256x64xf32> -> vector<256x64xf32>
    %102 = arith.addf %97, %101 : vector<256x64xf32>
    %c18 = arith.constant 18 : index
    %c0_52 = arith.constant 0 : index
    %103 = vector.load %arg18[%c18, %c0_52] : memref<296x64xf32, #tpu.memory_space<vmem>>, vector<256x64xf32>
    %c1_i32_53 = arith.constant 1 : i32
    %104 = vector.broadcast %c1_i32_53 : i32 to vector<256x1xi32>
    %105 = arith.addi %37, %104 : vector<256x1xi32>
    %c0_i32_54 = arith.constant 0 : i32
    %106 = vector.broadcast %c0_i32_54 : i32 to vector<256x1xi32>
    %107 = arith.cmpi sge, %105, %106 : vector<256x1xi32>
    %c1_i32_55 = arith.constant 1 : i32
    %108 = vector.broadcast %c1_i32_55 : i32 to vector<256x1xi32>
    %109 = arith.addi %37, %108 : vector<256x1xi32>
    %c16_i32_56 = arith.constant 16 : i32
    %110 = vector.broadcast %c16_i32_56 : i32 to vector<256x1xi32>
    %111 = arith.cmpi slt, %109, %110 : vector<256x1xi32>
    %112 = arith.andi %107, %111 : vector<256x1xi1>
    %113 = arith.extui %112 : vector<256x1xi1> to vector<256x1xi32>
    %114 = arith.sitofp %113 : vector<256x1xi32> to vector<256x1xf32>
    %115 = vector.broadcast %114 : vector<256x1xf32> to vector<256x64xf32>
    %116 = arith.mulf %103, %115 : vector<256x64xf32>
    %117 = arith.truncf %116 : vector<256x64xf32> to vector<256x64xbf16>
    %c320 = arith.constant 320 : index
    %c0_57 = arith.constant 0 : index
    %118 = vector.load %arg7[%c320, %c0_57] : memref<576x64xbf16, #tpu.memory_space<vmem>>, vector<64x64xbf16>
    %cst_58 = arith.constant dense<0.000000e+00> : vector<256x64xf32>
    %119 = tpu.matmul %117, %118, %cst_58 {dimension_numbers = #tpu.dot_dimension_numbers<[1], [0], [0], [1], [0, 0, 1, 1], [], []>} : vector<256x64xbf16>, vector<64x64xbf16>, vector<256x64xf32> -> vector<256x64xf32>
    %120 = arith.addf %102, %119 : vector<256x64xf32>
    %c32 = arith.constant 32 : index
    %c0_59 = arith.constant 0 : index
    %121 = vector.load %arg18[%c32, %c0_59] : memref<296x64xf32, #tpu.memory_space<vmem>>, vector<256x64xf32>
    %c-1_i32_60 = arith.constant -1 : i32
    %122 = vector.broadcast %c-1_i32_60 : i32 to vector<256x1xi32>
    %123 = arith.addi %37, %122 : vector<256x1xi32>
    %c0_i32_61 = arith.constant 0 : i32
    %124 = vector.broadcast %c0_i32_61 : i32 to vector<256x1xi32>
    %125 = arith.cmpi sge, %123, %124 : vector<256x1xi32>
    %c-1_i32_62 = arith.constant -1 : i32
    %126 = vector.broadcast %c-1_i32_62 : i32 to vector<256x1xi32>
    %127 = arith.addi %37, %126 : vector<256x1xi32>
    %c16_i32_63 = arith.constant 16 : i32
    %128 = vector.broadcast %c16_i32_63 : i32 to vector<256x1xi32>
    %129 = arith.cmpi slt, %127, %128 : vector<256x1xi32>
    %130 = arith.andi %125, %129 : vector<256x1xi1>
    %131 = arith.extui %130 : vector<256x1xi1> to vector<256x1xi32>
    %132 = arith.sitofp %131 : vector<256x1xi32> to vector<256x1xf32>
    %133 = vector.broadcast %132 : vector<256x1xf32> to vector<256x64xf32>
    %134 = arith.mulf %121, %133 : vector<256x64xf32>
    %135 = arith.truncf %134 : vector<256x64xf32> to vector<256x64xbf16>
    %c384 = arith.constant 384 : index
    %c0_64 = arith.constant 0 : index
    %136 = vector.load %arg7[%c384, %c0_64] : memref<576x64xbf16, #tpu.memory_space<vmem>>, vector<64x64xbf16>
    %cst_65 = arith.constant dense<0.000000e+00> : vector<256x64xf32>
    %137 = tpu.matmul %135, %136, %cst_65 {dimension_numbers = #tpu.dot_dimension_numbers<[1], [0], [0], [1], [0, 0, 1, 1], [], []>} : vector<256x64xbf16>, vector<64x64xbf16>, vector<256x64xf32> -> vector<256x64xf32>
    %138 = arith.addf %120, %137 : vector<256x64xf32>
    %c33 = arith.constant 33 : index
    %c0_66 = arith.constant 0 : index
    %139 = vector.load %arg18[%c33, %c0_66] : memref<296x64xf32, #tpu.memory_space<vmem>>, vector<256x64xf32>
    %140 = arith.truncf %139 : vector<256x64xf32> to vector<256x64xbf16>
    %c448 = arith.constant 448 : index
    %c0_67 = arith.constant 0 : index
    %141 = vector.load %arg7[%c448, %c0_67] : memref<576x64xbf16, #tpu.memory_space<vmem>>, vector<64x64xbf16>
    %cst_68 = arith.constant dense<0.000000e+00> : vector<256x64xf32>
    %142 = tpu.matmul %140, %141, %cst_68 {dimension_numbers = #tpu.dot_dimension_numbers<[1], [0], [0], [1], [0, 0, 1, 1], [], []>} : vector<256x64xbf16>, vector<64x64xbf16>, vector<256x64xf32> -> vector<256x64xf32>
    %143 = arith.addf %138, %142 : vector<256x64xf32>
    %c34 = arith.constant 34 : index
    %c0_69 = arith.constant 0 : index
    %144 = vector.load %arg18[%c34, %c0_69] : memref<296x64xf32, #tpu.memory_space<vmem>>, vector<256x64xf32>
    %c1_i32_70 = arith.constant 1 : i32
    %145 = vector.broadcast %c1_i32_70 : i32 to vector<256x1xi32>
    %146 = arith.addi %37, %145 : vector<256x1xi32>
    %c0_i32_71 = arith.constant 0 : i32
    %147 = vector.broadcast %c0_i32_71 : i32 to vector<256x1xi32>
    %148 = arith.cmpi sge, %146, %147 : vector<256x1xi32>
    %c1_i32_72 = arith.constant 1 : i32
    %149 = vector.broadcast %c1_i32_72 : i32 to vector<256x1xi32>
    %150 = arith.addi %37, %149 : vector<256x1xi32>
    %c16_i32_73 = arith.constant 16 : i32
    %151 = vector.broadcast %c16_i32_73 : i32 to vector<256x1xi32>
    %152 = arith.cmpi slt, %150, %151 : vector<256x1xi32>
    %153 = arith.andi %148, %152 : vector<256x1xi1>
    %154 = arith.extui %153 : vector<256x1xi1> to vector<256x1xi32>
    %155 = arith.sitofp %154 : vector<256x1xi32> to vector<256x1xf32>
    %156 = vector.broadcast %155 : vector<256x1xf32> to vector<256x64xf32>
    %157 = arith.mulf %144, %156 : vector<256x64xf32>
    %158 = arith.truncf %157 : vector<256x64xf32> to vector<256x64xbf16>
    %c512 = arith.constant 512 : index
    %c0_74 = arith.constant 0 : index
    %159 = vector.load %arg7[%c512, %c0_74] : memref<576x64xbf16, #tpu.memory_space<vmem>>, vector<64x64xbf16>
    %cst_75 = arith.constant dense<0.000000e+00> : vector<256x64xf32>
    %160 = tpu.matmul %158, %159, %cst_75 {dimension_numbers = #tpu.dot_dimension_numbers<[1], [0], [0], [1], [0, 0, 1, 1], [], []>} : vector<256x64xbf16>, vector<64x64xbf16>, vector<256x64xf32> -> vector<256x64xf32>
    %161 = arith.addf %143, %160 : vector<256x64xf32>
    %cst_76 = arith.constant dense<0.000000e+00> : vector<64x64xf32>
    %162 = tpu.matmul %2, %161, %cst_76 {dimension_numbers = #tpu.dot_dimension_numbers<[1], [0], [0], [1], [0, 0, 1, 1], [], []>} : vector<64x256xf32>, vector<256x64xf32>, vector<64x64xf32> -> vector<64x64xf32>
    %c0_77 = arith.constant 0 : index
    %c0_78 = arith.constant 0 : index
    %163 = vector.load %arg8[%c0_77, %c0_78] : memref<1x64xf32, #tpu.memory_space<vmem>>, vector<1x64xf32>
    %164 = vector.broadcast %163 : vector<1x64xf32> to vector<64x64xf32>
    %165 = arith.addf %162, %164 : vector<64x64xf32>
    %cst_79 = arith.constant 0.000000e+00 : f32
    %166 = vector.broadcast %cst_79 : f32 to vector<64x64xf32>
    %167 = arith.maximumf %165, %166 : vector<64x64xf32>
    %168 = arith.truncf %167 : vector<64x64xf32> to vector<64x64xbf16>
    %c0_80 = arith.constant 0 : index
    %c0_81 = arith.constant 0 : index
    %169 = vector.load %arg9[%c0_80, %c0_81] : memref<64x16xbf16, #tpu.memory_space<vmem>>, vector<64x16xbf16>
    %cst_82 = arith.constant dense<0.000000e+00> : vector<64x16xf32>
    %170 = tpu.matmul %168, %169, %cst_82 {dimension_numbers = #tpu.dot_dimension_numbers<[1], [0], [0], [1], [0, 0, 1, 1], [], []>} : vector<64x64xbf16>, vector<64x16xbf16>, vector<64x16xf32> -> vector<64x16xf32>
    %c0_83 = arith.constant 0 : index
    %c0_84 = arith.constant 0 : index
    %171 = vector.load %arg10[%c0_83, %c0_84] : memref<1x16xf32, #tpu.memory_space<vmem>>, vector<1x16xf32>
    %172 = vector.broadcast %171 : vector<1x16xf32> to vector<64x16xf32>
    %173 = arith.addf %170, %172 : vector<64x16xf32>
    %174 = arith.addf %173, %10 : vector<64x16xf32>
    %cst_85 = arith.constant 0.000000e+00 : f32
    %175 = vector.broadcast %cst_85 : f32 to vector<64x16xf32>
    %176 = arith.maximumf %174, %175 : vector<64x16xf32>
    %177 = arith.truncf %176 : vector<64x16xf32> to vector<64x16xbf16>
    %c0_86 = arith.constant 0 : index
    %c0_87 = arith.constant 0 : index
    %178 = vector.load %arg11[%c0_86, %c0_87] : memref<16x64xbf16, #tpu.memory_space<vmem>>, vector<16x64xbf16>
    %cst_88 = arith.constant dense<0.000000e+00> : vector<64x64xf32>
    %179 = tpu.matmul %177, %178, %cst_88 {dimension_numbers = #tpu.dot_dimension_numbers<[1], [0], [0], [1], [0, 0, 1, 1], [], []>} : vector<64x16xbf16>, vector<16x64xbf16>, vector<64x64xf32> -> vector<64x64xf32>
    %c0_89 = arith.constant 0 : index
    %c0_90 = arith.constant 0 : index
    %180 = vector.load %arg12[%c0_89, %c0_90] : memref<1x64xf32, #tpu.memory_space<vmem>>, vector<1x64xf32>
    %181 = vector.broadcast %180 : vector<1x64xf32> to vector<64x64xf32>
    %182 = arith.addf %179, %181 : vector<64x64xf32>
    %cst_91 = arith.constant 0.000000e+00 : f32
    %183 = vector.broadcast %cst_91 : f32 to vector<64x64xf32>
    %184 = arith.maximumf %182, %183 : vector<64x64xf32>
    %cst_92 = arith.constant 0.000000e+00 : f32
    %185 = vector.broadcast %cst_92 : f32 to vector<296x64xf32>
    %c0_93 = arith.constant 0 : index
    %c0_94 = arith.constant 0 : index
    %186 = vector.load %arg18[%c0_93, %c0_94] : memref<296x64xf32, #tpu.memory_space<vmem>>, vector<296x64xf32>
    tpu.vector_store %arg18[%c0_93, %c0_94], %185 {strides = array<i32>} : memref<296x64xf32, #tpu.memory_space<vmem>>, vector<296x64xf32>,
    %c9 = arith.constant 9 : index
    %c0_95 = arith.constant 0 : index
    %187 = vector.load %arg18[%c9, %c0_95] : memref<296x64xf32, #tpu.memory_space<vmem>>, vector<64x64xf32>
    tpu.vector_store %arg18[%c9, %c0_95], %184 {strides = array<i32>} : memref<296x64xf32, #tpu.memory_space<vmem>>, vector<64x64xf32>,
    %188 = tpu.iota {dimensions = array<i32: 0>} : vector<64x1xi32>
    %c8_i32 = arith.constant 8 : i32
    %c0_i32_96 = arith.constant 0 : i32
    %189 = arith.cmpi eq, %c8_i32, %c0_i32_96 : i32
    %c1_i32_97 = arith.constant 1 : i32
    %190 = arith.select %189, %c1_i32_97, %c8_i32 : i32
    %191 = vector.broadcast %190 : i32 to vector<64x1xi32>
    %192 = arith.remsi %188, %191 : vector<64x1xi32>
    %c0_i32_98 = arith.constant 0 : i32
    %193 = vector.broadcast %c0_i32_98 : i32 to vector<64x1xi32>
    %194 = arith.cmpi ne, %192, %193 : vector<64x1xi32>
    %c0_i32_99 = arith.constant 0 : i32
    %195 = vector.broadcast %c0_i32_99 : i32 to vector<64x1xi32>
    %196 = arith.cmpi slt, %192, %195 : vector<64x1xi32>
    %c0_i32_100 = arith.constant 0 : i32
    %197 = arith.cmpi slt, %190, %c0_i32_100 : i32
    %198 = vector.broadcast %197 : i1 to vector<64x1xi1>
    %199 = vector.broadcast %198 : vector<64x1xi1> to vector<64x1xi1>
    %200 = arith.xori %196, %199 : vector<64x1xi1>
    %201 = arith.andi %200, %194 : vector<64x1xi1>
    %202 = vector.broadcast %190 : i32 to vector<64x1xi32>
    %203 = arith.addi %192, %202 : vector<64x1xi32>
    %204 = arith.select %201, %203, %192 : vector<64x1xi1>, vector<64x1xi32>
    %cst_101 = arith.constant 0.000000e+00 : f32
    %205 = vector.broadcast %cst_101 : f32 to vector<64x64xf32>
    %c0_102 = arith.constant 0 : index
    %c0_103 = arith.constant 0 : index
    %206 = vector.load %arg18[%c0_102, %c0_103] : memref<296x64xf32, #tpu.memory_space<vmem>>, vector<64x64xf32>
    %c-1_i32_104 = arith.constant -1 : i32
    %207 = vector.broadcast %c-1_i32_104 : i32 to vector<64x1xi32>
    %208 = arith.addi %204, %207 : vector<64x1xi32>
    %c0_i32_105 = arith.constant 0 : i32
    %209 = vector.broadcast %c0_i32_105 : i32 to vector<64x1xi32>
    %210 = arith.cmpi sge, %208, %209 : vector<64x1xi32>
    %c-1_i32_106 = arith.constant -1 : i32
    %211 = vector.broadcast %c-1_i32_106 : i32 to vector<64x1xi32>
    %212 = arith.addi %204, %211 : vector<64x1xi32>
    %c8_i32_107 = arith.constant 8 : i32
    %213 = vector.broadcast %c8_i32_107 : i32 to vector<64x1xi32>
    %214 = arith.cmpi slt, %212, %213 : vector<64x1xi32>
    %215 = arith.andi %210, %214 : vector<64x1xi1>
    %216 = arith.extui %215 : vector<64x1xi1> to vector<64x1xi32>
    %217 = arith.sitofp %216 : vector<64x1xi32> to vector<64x1xf32>
    %218 = vector.broadcast %217 : vector<64x1xf32> to vector<64x64xf32>
    %219 = arith.mulf %206, %218 : vector<64x64xf32>
    %220 = arith.truncf %219 : vector<64x64xf32> to vector<64x64xbf16>
    %c0_108 = arith.constant 0 : index
    %c0_109 = arith.constant 0 : index
    %221 = vector.load %arg13[%c0_108, %c0_109] : memref<576x64xbf16, #tpu.memory_space<vmem>>, vector<64x64xbf16>
    %cst_110 = arith.constant dense<0.000000e+00> : vector<64x64xf32>
    %222 = tpu.matmul %220, %221, %cst_110 {dimension_numbers = #tpu.dot_dimension_numbers<[1], [0], [0], [1], [0, 0, 1, 1], [], []>} : vector<64x64xbf16>, vector<64x64xbf16>, vector<64x64xf32> -> vector<64x64xf32>
    %223 = arith.addf %205, %222 : vector<64x64xf32>
    %c1_111 = arith.constant 1 : index
    %c0_112 = arith.constant 0 : index
    %224 = vector.load %arg18[%c1_111, %c0_112] : memref<296x64xf32, #tpu.memory_space<vmem>>, vector<64x64xf32>
    %225 = arith.truncf %224 : vector<64x64xf32> to vector<64x64xbf16>
    %c64_113 = arith.constant 64 : index
    %c0_114 = arith.constant 0 : index
    %226 = vector.load %arg13[%c64_113, %c0_114] : memref<576x64xbf16, #tpu.memory_space<vmem>>, vector<64x64xbf16>
    %cst_115 = arith.constant dense<0.000000e+00> : vector<64x64xf32>
    %227 = tpu.matmul %225, %226, %cst_115 {dimension_numbers = #tpu.dot_dimension_numbers<[1], [0], [0], [1], [0, 0, 1, 1], [], []>} : vector<64x64xbf16>, vector<64x64xbf16>, vector<64x64xf32> -> vector<64x64xf32>
    %228 = arith.addf %223, %227 : vector<64x64xf32>
    %c2_116 = arith.constant 2 : index
    %c0_117 = arith.constant 0 : index
    %229 = vector.load %arg18[%c2_116, %c0_117] : memref<296x64xf32, #tpu.memory_space<vmem>>, vector<64x64xf32>
    %c1_i32_118 = arith.constant 1 : i32
    %230 = vector.broadcast %c1_i32_118 : i32 to vector<64x1xi32>
    %231 = arith.addi %204, %230 : vector<64x1xi32>
    %c0_i32_119 = arith.constant 0 : i32
    %232 = vector.broadcast %c0_i32_119 : i32 to vector<64x1xi32>
    %233 = arith.cmpi sge, %231, %232 : vector<64x1xi32>
    %c1_i32_120 = arith.constant 1 : i32
    %234 = vector.broadcast %c1_i32_120 : i32 to vector<64x1xi32>
    %235 = arith.addi %204, %234 : vector<64x1xi32>
    %c8_i32_121 = arith.constant 8 : i32
    %236 = vector.broadcast %c8_i32_121 : i32 to vector<64x1xi32>
    %237 = arith.cmpi slt, %235, %236 : vector<64x1xi32>
    %238 = arith.andi %233, %237 : vector<64x1xi1>
    %239 = arith.extui %238 : vector<64x1xi1> to vector<64x1xi32>
    %240 = arith.sitofp %239 : vector<64x1xi32> to vector<64x1xf32>
    %241 = vector.broadcast %240 : vector<64x1xf32> to vector<64x64xf32>
    %242 = arith.mulf %229, %241 : vector<64x64xf32>
    %243 = arith.truncf %242 : vector<64x64xf32> to vector<64x64xbf16>
    %c128_122 = arith.constant 128 : index
    %c0_123 = arith.constant 0 : index
    %244 = vector.load %arg13[%c128_122, %c0_123] : memref<576x64xbf16, #tpu.memory_space<vmem>>, vector<64x64xbf16>
    %cst_124 = arith.constant dense<0.000000e+00> : vector<64x64xf32>
    %245 = tpu.matmul %243, %244, %cst_124 {dimension_numbers = #tpu.dot_dimension_numbers<[1], [0], [0], [1], [0, 0, 1, 1], [], []>} : vector<64x64xbf16>, vector<64x64xbf16>, vector<64x64xf32> -> vector<64x64xf32>
    %246 = arith.addf %228, %245 : vector<64x64xf32>
    %c8 = arith.constant 8 : index
    %c0_125 = arith.constant 0 : index
    %247 = vector.load %arg18[%c8, %c0_125] : memref<296x64xf32, #tpu.memory_space<vmem>>, vector<64x64xf32>
    %c-1_i32_126 = arith.constant -1 : i32
    %248 = vector.broadcast %c-1_i32_126 : i32 to vector<64x1xi32>
    %249 = arith.addi %204, %248 : vector<64x1xi32>
    %c0_i32_127 = arith.constant 0 : i32
    %250 = vector.broadcast %c0_i32_127 : i32 to vector<64x1xi32>
    %251 = arith.cmpi sge, %249, %250 : vector<64x1xi32>
    %c-1_i32_128 = arith.constant -1 : i32
    %252 = vector.broadcast %c-1_i32_128 : i32 to vector<64x1xi32>
    %253 = arith.addi %204, %252 : vector<64x1xi32>
    %c8_i32_129 = arith.constant 8 : i32
    %254 = vector.broadcast %c8_i32_129 : i32 to vector<64x1xi32>
    %255 = arith.cmpi slt, %253, %254 : vector<64x1xi32>
    %256 = arith.andi %251, %255 : vector<64x1xi1>
    %257 = arith.extui %256 : vector<64x1xi1> to vector<64x1xi32>
    %258 = arith.sitofp %257 : vector<64x1xi32> to vector<64x1xf32>
    %259 = vector.broadcast %258 : vector<64x1xf32> to vector<64x64xf32>
    %260 = arith.mulf %247, %259 : vector<64x64xf32>
    %261 = arith.truncf %260 : vector<64x64xf32> to vector<64x64xbf16>
    %c192_130 = arith.constant 192 : index
    %c0_131 = arith.constant 0 : index
    %262 = vector.load %arg13[%c192_130, %c0_131] : memref<576x64xbf16, #tpu.memory_space<vmem>>, vector<64x64xbf16>
    %cst_132 = arith.constant dense<0.000000e+00> : vector<64x64xf32>
    %263 = tpu.matmul %261, %262, %cst_132 {dimension_numbers = #tpu.dot_dimension_numbers<[1], [0], [0], [1], [0, 0, 1, 1], [], []>} : vector<64x64xbf16>, vector<64x64xbf16>, vector<64x64xf32> -> vector<64x64xf32>
    %264 = arith.addf %246, %263 : vector<64x64xf32>
    %c9_133 = arith.constant 9 : index
    %c0_134 = arith.constant 0 : index
    %265 = vector.load %arg18[%c9_133, %c0_134] : memref<296x64xf32, #tpu.memory_space<vmem>>, vector<64x64xf32>
    %266 = arith.truncf %265 : vector<64x64xf32> to vector<64x64xbf16>
    %c256_135 = arith.constant 256 : index
    %c0_136 = arith.constant 0 : index
    %267 = vector.load %arg13[%c256_135, %c0_136] : memref<576x64xbf16, #tpu.memory_space<vmem>>, vector<64x64xbf16>
    %cst_137 = arith.constant dense<0.000000e+00> : vector<64x64xf32>
    %268 = tpu.matmul %266, %267, %cst_137 {dimension_numbers = #tpu.dot_dimension_numbers<[1], [0], [0], [1], [0, 0, 1, 1], [], []>} : vector<64x64xbf16>, vector<64x64xbf16>, vector<64x64xf32> -> vector<64x64xf32>
    %269 = arith.addf %264, %268 : vector<64x64xf32>
    %c10 = arith.constant 10 : index
    %c0_138 = arith.constant 0 : index
    %270 = vector.load %arg18[%c10, %c0_138] : memref<296x64xf32, #tpu.memory_space<vmem>>, vector<64x64xf32>
    %c1_i32_139 = arith.constant 1 : i32
    %271 = vector.broadcast %c1_i32_139 : i32 to vector<64x1xi32>
    %272 = arith.addi %204, %271 : vector<64x1xi32>
    %c0_i32_140 = arith.constant 0 : i32
    %273 = vector.broadcast %c0_i32_140 : i32 to vector<64x1xi32>
    %274 = arith.cmpi sge, %272, %273 : vector<64x1xi32>
    %c1_i32_141 = arith.constant 1 : i32
    %275 = vector.broadcast %c1_i32_141 : i32 to vector<64x1xi32>
    %276 = arith.addi %204, %275 : vector<64x1xi32>
    %c8_i32_142 = arith.constant 8 : i32
    %277 = vector.broadcast %c8_i32_142 : i32 to vector<64x1xi32>
    %278 = arith.cmpi slt, %276, %277 : vector<64x1xi32>
    %279 = arith.andi %274, %278 : vector<64x1xi1>
    %280 = arith.extui %279 : vector<64x1xi1> to vector<64x1xi32>
    %281 = arith.sitofp %280 : vector<64x1xi32> to vector<64x1xf32>
    %282 = vector.broadcast %281 : vector<64x1xf32> to vector<64x64xf32>
    %283 = arith.mulf %270, %282 : vector<64x64xf32>
    %284 = arith.truncf %283 : vector<64x64xf32> to vector<64x64xbf16>
    %c320_143 = arith.constant 320 : index
    %c0_144 = arith.constant 0 : index
    %285 = vector.load %arg13[%c320_143, %c0_144] : memref<576x64xbf16, #tpu.memory_space<vmem>>, vector<64x64xbf16>
    %cst_145 = arith.constant dense<0.000000e+00> : vector<64x64xf32>
    %286 = tpu.matmul %284, %285, %cst_145 {dimension_numbers = #tpu.dot_dimension_numbers<[1], [0], [0], [1], [0, 0, 1, 1], [], []>} : vector<64x64xbf16>, vector<64x64xbf16>, vector<64x64xf32> -> vector<64x64xf32>
    %287 = arith.addf %269, %286 : vector<64x64xf32>
    %c16_146 = arith.constant 16 : index
    %c0_147 = arith.constant 0 : index
    %288 = vector.load %arg18[%c16_146, %c0_147] : memref<296x64xf32, #tpu.memory_space<vmem>>, vector<64x64xf32>
    %c-1_i32_148 = arith.constant -1 : i32
    %289 = vector.broadcast %c-1_i32_148 : i32 to vector<64x1xi32>
    %290 = arith.addi %204, %289 : vector<64x1xi32>
    %c0_i32_149 = arith.constant 0 : i32
    %291 = vector.broadcast %c0_i32_149 : i32 to vector<64x1xi32>
    %292 = arith.cmpi sge, %290, %291 : vector<64x1xi32>
    %c-1_i32_150 = arith.constant -1 : i32
    %293 = vector.broadcast %c-1_i32_150 : i32 to vector<64x1xi32>
    %294 = arith.addi %204, %293 : vector<64x1xi32>
    %c8_i32_151 = arith.constant 8 : i32
    %295 = vector.broadcast %c8_i32_151 : i32 to vector<64x1xi32>
    %296 = arith.cmpi slt, %294, %295 : vector<64x1xi32>
    %297 = arith.andi %292, %296 : vector<64x1xi1>
    %298 = arith.extui %297 : vector<64x1xi1> to vector<64x1xi32>
    %299 = arith.sitofp %298 : vector<64x1xi32> to vector<64x1xf32>
    %300 = vector.broadcast %299 : vector<64x1xf32> to vector<64x64xf32>
    %301 = arith.mulf %288, %300 : vector<64x64xf32>
    %302 = arith.truncf %301 : vector<64x64xf32> to vector<64x64xbf16>
    %c384_152 = arith.constant 384 : index
    %c0_153 = arith.constant 0 : index
    %303 = vector.load %arg13[%c384_152, %c0_153] : memref<576x64xbf16, #tpu.memory_space<vmem>>, vector<64x64xbf16>
    %cst_154 = arith.constant dense<0.000000e+00> : vector<64x64xf32>
    %304 = tpu.matmul %302, %303, %cst_154 {dimension_numbers = #tpu.dot_dimension_numbers<[1], [0], [0], [1], [0, 0, 1, 1], [], []>} : vector<64x64xbf16>, vector<64x64xbf16>, vector<64x64xf32> -> vector<64x64xf32>
    %305 = arith.addf %287, %304 : vector<64x64xf32>
    %c17_155 = arith.constant 17 : index
    %c0_156 = arith.constant 0 : index
    %306 = vector.load %arg18[%c17_155, %c0_156] : memref<296x64xf32, #tpu.memory_space<vmem>>, vector<64x64xf32>
    %307 = arith.truncf %306 : vector<64x64xf32> to vector<64x64xbf16>
    %c448_157 = arith.constant 448 : index
    %c0_158 = arith.constant 0 : index
    %308 = vector.load %arg13[%c448_157, %c0_158] : memref<576x64xbf16, #tpu.memory_space<vmem>>, vector<64x64xbf16>
    %cst_159 = arith.constant dense<0.000000e+00> : vector<64x64xf32>
    %309 = tpu.matmul %307, %308, %cst_159 {dimension_numbers = #tpu.dot_dimension_numbers<[1], [0], [0], [1], [0, 0, 1, 1], [], []>} : vector<64x64xbf16>, vector<64x64xbf16>, vector<64x64xf32> -> vector<64x64xf32>
    %310 = arith.addf %305, %309 : vector<64x64xf32>
    %c18_160 = arith.constant 18 : index
    %c0_161 = arith.constant 0 : index
    %311 = vector.load %arg18[%c18_160, %c0_161] : memref<296x64xf32, #tpu.memory_space<vmem>>, vector<64x64xf32>
    %c1_i32_162 = arith.constant 1 : i32
    %312 = vector.broadcast %c1_i32_162 : i32 to vector<64x1xi32>
    %313 = arith.addi %204, %312 : vector<64x1xi32>
    %c0_i32_163 = arith.constant 0 : i32
    %314 = vector.broadcast %c0_i32_163 : i32 to vector<64x1xi32>
    %315 = arith.cmpi sge, %313, %314 : vector<64x1xi32>
    %c1_i32_164 = arith.constant 1 : i32
    %316 = vector.broadcast %c1_i32_164 : i32 to vector<64x1xi32>
    %317 = arith.addi %204, %316 : vector<64x1xi32>
    %c8_i32_165 = arith.constant 8 : i32
    %318 = vector.broadcast %c8_i32_165 : i32 to vector<64x1xi32>
    %319 = arith.cmpi slt, %317, %318 : vector<64x1xi32>
    %320 = arith.andi %315, %319 : vector<64x1xi1>
    %321 = arith.extui %320 : vector<64x1xi1> to vector<64x1xi32>
    %322 = arith.sitofp %321 : vector<64x1xi32> to vector<64x1xf32>
    %323 = vector.broadcast %322 : vector<64x1xf32> to vector<64x64xf32>
    %324 = arith.mulf %311, %323 : vector<64x64xf32>
    %325 = arith.truncf %324 : vector<64x64xf32> to vector<64x64xbf16>
    %c512_166 = arith.constant 512 : index
    %c0_167 = arith.constant 0 : index
    %326 = vector.load %arg13[%c512_166, %c0_167] : memref<576x64xbf16, #tpu.memory_space<vmem>>, vector<64x64xbf16>
    %cst_168 = arith.constant dense<0.000000e+00> : vector<64x64xf32>
    %327 = tpu.matmul %325, %326, %cst_168 {dimension_numbers = #tpu.dot_dimension_numbers<[1], [0], [0], [1], [0, 0, 1, 1], [], []>} : vector<64x64xbf16>, vector<64x64xbf16>, vector<64x64xf32> -> vector<64x64xf32>
    %328 = arith.addf %310, %327 : vector<64x64xf32>
    %c0_169 = arith.constant 0 : index
    %c0_170 = arith.constant 0 : index
    %329 = vector.load %arg14[%c0_169, %c0_170] : memref<1x64xf32, #tpu.memory_space<vmem>>, vector<1x64xf32>
    %330 = vector.broadcast %329 : vector<1x64xf32> to vector<64x64xf32>
    %331 = arith.addf %328, %330 : vector<64x64xf32>
    %cst_171 = arith.constant 0.000000e+00 : f32
    %332 = vector.broadcast %cst_171 : f32 to vector<64x64xf32>
    %333 = arith.maximumf %331, %332 : vector<64x64xf32>
    %334 = arith.truncf %333 : vector<64x64xf32> to vector<64x64xbf16>
    %c0_172 = arith.constant 0 : index
    %c0_173 = arith.constant 0 : index
    %335 = vector.load %arg15[%c0_172, %c0_173] : memref<64x16xbf16, #tpu.memory_space<vmem>>, vector<64x16xbf16>
    %cst_174 = arith.constant dense<0.000000e+00> : vector<64x16xf32>
    %336 = tpu.matmul %334, %335, %cst_174 {dimension_numbers = #tpu.dot_dimension_numbers<[1], [0], [0], [1], [0, 0, 1, 1], [], []>} : vector<64x64xbf16>, vector<64x16xbf16>, vector<64x16xf32> -> vector<64x16xf32>
    %c0_175 = arith.constant 0 : index
    %c0_176 = arith.constant 0 : index
    %337 = vector.load %arg16[%c0_175, %c0_176] : memref<1x16xf32, #tpu.memory_space<vmem>>, vector<1x16xf32>
    %338 = vector.broadcast %337 : vector<1x16xf32> to vector<64x16xf32>
    %339 = arith.addf %336, %338 : vector<64x16xf32>
    %340 = arith.addf %339, %176 : vector<64x16xf32>
    %cst_177 = arith.constant 0.000000e+00 : f32
    %341 = vector.broadcast %cst_177 : f32 to vector<64x16xf32>
    %342 = arith.maximumf %340, %341 : vector<64x16xf32>
    %c0_178 = arith.constant 0 : index
    %c0_179 = arith.constant 0 : index
    %c0_180 = arith.constant 0 : index
    %343 = vector.load %arg17[%c0_178, %c0_179, %c0_180] : memref<1x64x16xf32, #tpu.memory_space<vmem>>, vector<1x64x16xf32>
    %344 = vector.shape_cast %343 : vector<1x64x16xf32> to vector<64x16xf32>
    %345 = vector.shape_cast %342 : vector<64x16xf32> to vector<1x64x16xf32>
    tpu.vector_store %arg17[%c0_178, %c0_179, %c0_180], %345 {strides = array<i32>} : memref<1x64x16xf32, #tpu.memory_space<vmem>>, vector<1x64x16xf32>,
    return
  }
  func.func @transform_0(%arg0: i32) -> (i32, i32, i32) {
    %c0_i32 = arith.constant 0 : i32
    %c0_i32_0 = arith.constant 0 : i32
    %c0_i32_1 = arith.constant 0 : i32
    return %arg0, %c0_i32, %c0_i32_0 : i32, i32, i32
  }
  func.func @transform_1(%arg0: i32) -> (i32, i32) {
    %c0_i32 = arith.constant 0 : i32
    %c0_i32_0 = arith.constant 0 : i32
    %c0_i32_1 = arith.constant 0 : i32
    return %c0_i32, %c0_i32_0 : i32, i32
  }
  func.func @transform_2(%arg0: i32) -> (i32, i32) {
    %c0_i32 = arith.constant 0 : i32
    %c0_i32_0 = arith.constant 0 : i32
    %c0_i32_1 = arith.constant 0 : i32
    return %c0_i32, %c0_i32_0 : i32, i32
  }
  func.func @transform_3(%arg0: i32) -> (i32, i32) {
    %c0_i32 = arith.constant 0 : i32
    %c0_i32_0 = arith.constant 0 : i32
    %c0_i32_1 = arith.constant 0 : i32
    return %c0_i32, %c0_i32_0 : i32, i32
  }
  func.func @transform_4(%arg0: i32) -> (i32, i32) {
    %c0_i32 = arith.constant 0 : i32
    %c0_i32_0 = arith.constant 0 : i32
    %c0_i32_1 = arith.constant 0 : i32
    return %c0_i32, %c0_i32_0 : i32, i32
  }
  func.func @transform_5(%arg0: i32) -> (i32, i32) {
    %c0_i32 = arith.constant 0 : i32
    %c0_i32_0 = arith.constant 0 : i32
    %c0_i32_1 = arith.constant 0 : i32
    return %c0_i32, %c0_i32_0 : i32, i32
  }
  func.func @transform_6(%arg0: i32) -> (i32, i32) {
    %c0_i32 = arith.constant 0 : i32
    %c0_i32_0 = arith.constant 0 : i32
    %c0_i32_1 = arith.constant 0 : i32
    return %c0_i32, %c0_i32_0 : i32, i32
  }
  func.func @transform_7(%arg0: i32) -> (i32, i32) {
    %c0_i32 = arith.constant 0 : i32
    %c0_i32_0 = arith.constant 0 : i32
    %c0_i32_1 = arith.constant 0 : i32
    return %c0_i32, %c0_i32_0 : i32, i32
  }
  func.func @transform_8(%arg0: i32) -> (i32, i32) {
    %c0_i32 = arith.constant 0 : i32
    %c0_i32_0 = arith.constant 0 : i32
    %c0_i32_1 = arith.constant 0 : i32
    return %c0_i32, %c0_i32_0 : i32, i32
  }
  func.func @transform_9(%arg0: i32) -> (i32, i32) {
    %c0_i32 = arith.constant 0 : i32
    %c0_i32_0 = arith.constant 0 : i32
    %c0_i32_1 = arith.constant 0 : i32
    return %c0_i32, %c0_i32_0 : i32, i32
  }
  func.func @transform_10(%arg0: i32) -> (i32, i32) {
    %c0_i32 = arith.constant 0 : i32
    %c0_i32_0 = arith.constant 0 : i32
    %c0_i32_1 = arith.constant 0 : i32
    return %c0_i32, %c0_i32_0 : i32, i32
  }
  func.func @transform_11(%arg0: i32) -> (i32, i32) {
    %c0_i32 = arith.constant 0 : i32
    %c0_i32_0 = arith.constant 0 : i32
    %c0_i32_1 = arith.constant 0 : i32
    return %c0_i32, %c0_i32_0 : i32, i32
  }
  func.func @transform_12(%arg0: i32) -> (i32, i32) {
    %c0_i32 = arith.constant 0 : i32
    %c0_i32_0 = arith.constant 0 : i32
    %c0_i32_1 = arith.constant 0 : i32
    return %c0_i32, %c0_i32_0 : i32, i32
  }
  func.func @transform_13(%arg0: i32) -> (i32, i32) {
    %c0_i32 = arith.constant 0 : i32
    %c0_i32_0 = arith.constant 0 : i32
    %c0_i32_1 = arith.constant 0 : i32
    return %c0_i32, %c0_i32_0 : i32, i32
  }
  func.func @transform_14(%arg0: i32) -> (i32, i32) {
    %c0_i32 = arith.constant 0 : i32
    %c0_i32_0 = arith.constant 0 : i32
    %c0_i32_1 = arith.constant 0 : i32
    return %c0_i32, %c0_i32_0 : i32, i32
  }
  func.func @transform_15(%arg0: i32) -> (i32, i32) {
    %c0_i32 = arith.constant 0 : i32
    %c0_i32_0 = arith.constant 0 : i32
    %c0_i32_1 = arith.constant 0 : i32
    return %c0_i32, %c0_i32_0 : i32, i32
  }
  func.func @transform_16(%arg0: i32) -> (i32, i32, i32) {
    %c0_i32 = arith.constant 0 : i32
    %c0_i32_0 = arith.constant 0 : i32
    %c0_i32_1 = arith.constant 0 : i32
    return %arg0, %c0_i32, %c0_i32_0 : i32, i32, i32
  }
}

</mosaic_0001>

<bundles_post_ra>
// kernel: corblock_s_forward.1
= control target key start
LH: loop header
LB: loop body
LE: loop exit
PB: predicated region body
PF: predicated region fallthrough
CT: control target
= control target key end

     0   :  { %s11946_s0 = inlined_call_operand.vmem [shape: bf16[2,256,4], index: 0, kind: input, shape index: {}]   ;;  %s11947_s1 = inlined_call_operand.vmem [shape: f32[64,256], index: 1, kind: input, shape index: {}]   ;;  %s11948_s2 = inlined_call_operand.vmem [shape: bf16[4,16], index: 2, kind: input, shape index: {}]   ;;  %s11949_s3 = inlined_call_operand.vmem [shape: f32[1,16], index: 3, kind: input, shape index: {}]   ;;  %s11950_s4 = inlined_call_operand.vmem [shape: bf16[4,64], index: 4, kind: input, shape index: {}]   ;;  %s11951_s5 = inlined_call_operand.vmem [shape: f32[1,64], index: 5, kind: input, shape index: {}]   ;;  %s11952_s6 = inlined_call_operand.vmem [shape: bf16[576,64], index: 6, kind: input, shape index: {}]   ;;  %s11953_s7 = inlined_call_operand.vmem [shape: f32[1,64], index: 7, kind: input, shape index: {}]   ;;  %s11954_s8 = inlined_call_operand.vmem [shape: bf16[64,16], index: 8, kind: input, shape index: {}]   ;;  %s11955_s9 = inlined_call_operand.vmem [shape: f32[1,16], index: 9, kind: input, shape index: {}]   ;;  %s11956_s10 = inlined_call_operand.vmem [shape: bf16[16,64], index: 10, kind: input, shape index: {}]   ;;  %s11957_s11 = inlined_call_operand.vmem [shape: f32[1,64], index: 11, kind: input, shape index: {}]   ;;  %s11958_s12 = inlined_call_operand.vmem [shape: bf16[576,64], index: 12, kind: input, shape index: {}]   ;;  %s11959_s13 = inlined_call_operand.vmem [shape: f32[1,64], index: 13, kind: input, shape index: {}]   ;;  %s11960_s14 = inlined_call_operand.vmem [shape: bf16[64,16], index: 14, kind: input, shape index: {}]   ;;  %s11961_s15 = inlined_call_operand.vmem [shape: f32[1,16], index: 15, kind: input, shape index: {}]   ;;  %s11962_s16 = inlined_call_operand.hbm [shape: f32[2,64,16], index: 16, kind: output, shape index: {}]  }
   0x1   :  { %12158 = sst [smem:[#allocation178_spill]] %s11946_s0 }
   0x2   :  { %12159 = sst [smem:[#allocation179_spill]] %s11947_s1 }
   0x3   :  { %21 = vsyncpa [#allocation4], 0 }
   0x4   :  { %23 = vsyncpa [#allocation4 + $0x1], 0  ;;  %s8762_s21 = smov 0   ;;  %s8764_s22 = smov 0  }
   0x5   :  { %s8766_s23 = smov 0   ;;  %s8768_s24 = smov 0  }
   0x6 LB: > { %12160 = sst [smem:[#allocation6_spill]] %s8667_s23  ;;  %s8783_s25 = sadd.s32 4294967295, %s8671_s24   ;;  %s8671_s24 = sphi %s8768_s24, %s12683_s24   ;;  %s8667_s23 = sphi %s8766_s23, %s12685_s23   ;;  %s8663_s22 = sphi %s8764_s22, %s12687_s22   ;;  %s8659_s21 = sphi %s8762_s21, %s12686_s21  }
   0x7   : > { %s7054_s26 = sadd.s32 4294967294, %s8671_s24   ;;  %s8787_s27 = sadd.s32 1, %s8671_s24  }
   0x8   : > { %12161 = sst [smem:[#allocation7_spill]] %s8787_s27  ;;  %s377_s28 = sadd.s32 1, %s8667_s23 }
   0x9   : > { %s374_s29 = ssub.s32 %s8671_s24, %s8787_s27  ;;  %p387_p0 = scmp.ne.s32.totalorder %s8667_s23, %s8663_s22 }
   0xa   : > { %p375_p1 = scmp.eq.s32.totalorder %s374_s29, 0  ;;  %p388_p2 = scmp.eq.s32.totalorder %s8783_s25, 1 }
   0xb   : > { %p393_p3 = scmp.ne.s32.totalorder %s8663_s22, %s8659_s21  ;;  %p394_p4 = scmp.eq.s32.totalorder %s7054_s26, 1 }
   0xc   : > { %s8798_s30 = scalar_select %p375_p1, %s8667_s23, %s377_s28  }
   0xd   : > { %p8800_p5 = por %p388_p2, %p387_p0  ;;  %p8804_p6 = por %p394_p4, %p393_p3 }
   0xe   : > { %12162 = sst [smem:[#allocation8_spill]] %s8798_s30  ;;  %p7057_p7 = scmp.ge.s32.totalorder %s8671_s24, 1 }
   0xf   : > { %s12164_s17 = scalar_select %p8804_p6, 1, 0 }
  0x10   : > { %p465_p8 = scmp.lt.s32.totalorder %s8671_s24, 3 }
  0x11   : > { %12165 = sst [smem:[#allocation9_spill]] %s12164_s17 }
  0x12   : > { %p466_p9 = pnand %p7057_p7, %p465_p8 }
  0x14   : > { %469 = sbr.rel (%p466_p9) target bundleno = 2240 (0x8c0), region = 84 }
  0x19   : > { %p515_p10 = scmp.lt.s32.totalorder %s8783_s25, 1  ;;  %s12166_s1 = sld [smem:[#allocation179_spill]]  ;;  %vm731_vm0 = vcmask 1041408   ;;  %vm718_vm1 = vcmask 31744   ;;  %vm1132_vm2 = vcmask 523264  }
  0x1a   : > { %s12167_s30 = sld [smem:[#allocation178_spill]]  ;;  %s512_s27 = sand.u32 1, %s8663_s22  }
  0x1b   : > { %s516_s20 = scalar_select %p515_p10, %s8783_s25, 1 }
  0x1c   : > { %s7431_s29 = sshll.u32 %s8783_s25, 10  ;;  %s11906_s25 = scalar_lea.sflag [#allocation4], %s512_s27 }
  0x1d   : > { %s7430_s26 = sshll.u32 %s516_s20, 7  ;;  %s11896_s19 = scalar_lea.hbm %s11962_s16, %s7431_s29 }
  0x1e   : > { %s8674_s20 = smov [#allocation3]  }
  0x1f   : > { %v554_v0 = vld [vmem:[%s12166_s1 + $0x8] sm:$0xff]  ;;  %v553_v49 = vld [vmem:[%s12166_s1] sm:$0xff]  ;;  %v556_v50 = vld [vmem:[%s12166_s1 + $0x18] sm:$0xff] }
  0x20   : > { %665 = vmatprep.mubr.f32.mxu0 %v554_v0  ;;  %s8818_s23 = scalar_lea.vmem %s12167_s30, %s7430_s26  ;;  %v555_v51 = vld [vmem:[%s12166_s1 + $0x10] sm:$0xff]  ;;  %v558_v52 = vld [vmem:[%s12166_s1 + $0x28] sm:$0xff]  ;;  %v557_v53 = vld [vmem:[%s12166_s1 + $0x20] sm:$0xff]  ;;  %s7058_s26 = sshll.u32 %s512_s27, 6 }
  0x21   : > { %v8821_v1 = vld [vmem:[%s8818_s23 + $0x78] sm:$0xff]   ;;  %v8827_v3 = vld [vmem:[%s8818_s23 + $0x70] sm:$0xff]   ;;  %v8839_v11 = vld [vmem:[%s8818_s23 + $0x68] sm:$0xff]   ;;  %s11865_s28 = scalar_lea.vmem [#allocation3], %s7058_s26  ;;  %s8615_s26 = sshll.u32 %s8674_s20, 4  ;;  %s8616_s26 = int_to_ptr.vmem [resolvable:$false] %s8615_s26 }
  0x22   : > { %v8824_v2 = vld [vmem:[%s8818_s23 + $0x38] sm:$0xff]   ;;  %v600_v4 = vunpack.c.h.bf16 %v8821_v1  ;;  %v8832_v6 = vld [vmem:[%s8818_s23 + $0x30] sm:$0xff]   ;;  %v599_v7 = vunpack.c.l.bf16 %v8821_v1  ;;  %v598_v9 = vunpack.c.h.bf16 %v8827_v3  ;;  %v597_v12 = vunpack.c.l.bf16 %v8827_v3  ;;  %v8843_v13 = vld [vmem:[%s8818_s23 + $0x28] sm:$0xff]   ;;  %s8617_s29 = scalar_lea.vmem %s8616_s26, 2048 }
  0x23   : > { %v584_v5 = vunpack.c.h.bf16 %v8824_v2  ;;  %v583_v8 = vunpack.c.l.bf16 %v8824_v2  ;;  %v582_v10 = vunpack.c.h.bf16 %v8832_v6  ;;  %v581_v14 = vunpack.c.l.bf16 %v8832_v6  ;;  %v8847_v15 = vld [vmem:[%s8818_s23 + $0x60] sm:$0xff]   ;;  %v8857_v21 = vld [vmem:[%s8818_s23 + $0x58] sm:$0xff]   ;;  %v8867_v27 = vld [vmem:[%s8818_s23 + $0x50] sm:$0xff]  }
  0x24   : > { %7432 = vmatprep.subr.mxu0 %v600_v4  ;;  %v596_v16 = vunpack.c.h.bf16 %v8839_v11  ;;  %v8851_v17 = vld [vmem:[%s8818_s23 + $0x20] sm:$0xff]   ;;  %v580_v18 = vunpack.c.h.bf16 %v8843_v13  ;;  %v595_v19 = vunpack.c.l.bf16 %v8839_v11  ;;  %v579_v20 = vunpack.c.l.bf16 %v8843_v13  ;;  %v8861_v23 = vld [vmem:[%s8818_s23 + $0x18] sm:$0xff]   ;;  %v8871_v29 = vld [vmem:[%s8818_s23 + $0x10] sm:$0xff]  }
  0x25   : > { %7433 = vmatpush3.msra.mxu0 %v584_v5  ;;  %v594_v22 = vunpack.c.h.bf16 %v8847_v15  ;;  %v578_v24 = vunpack.c.h.bf16 %v8851_v17  ;;  %v593_v25 = vunpack.c.l.bf16 %v8847_v15  ;;  %v577_v26 = vunpack.c.l.bf16 %v8851_v17  ;;  %v8877_v33 = vld [vmem:[%s8818_s23 + $0x48] sm:$0xff]   ;;  %v8887_v39 = vld [vmem:[%s8818_s23 + $0x40] sm:$0xff]   ;;  %v560_v54 = vld [vmem:[%s12166_s1 + $0x38] sm:$0xff] }
  0x26   : > { %7434 = vmatprep.subr.mxu0 %v599_v7  ;;  %v592_v28 = vunpack.c.h.bf16 %v8857_v21  ;;  %v576_v30 = vunpack.c.h.bf16 %v8861_v23  ;;  %v591_v31 = vunpack.c.l.bf16 %v8857_v21  ;;  %v575_v32 = vunpack.c.l.bf16 %v8861_v23  ;;  %v8881_v35 = vld [vmem:[%s8818_s23 + $0x8] sm:$0xff]   ;;  %v8891_v41 = vld [vmem:[%s8818_s23] sm:$0xff]   ;;  %v559_v55 = vld [vmem:[%s12166_s1 + $0x30] sm:$0xff]  ;;  %s6992_s23 = sshll.u32 %s11865_s28, 4  ;;  %s11898_s23 = int_to_ptr.vmem [resolvable:$true] %s6992_s23 }
  0x27   : > { %7435 = vmatpush3.msra.mxu0 %v583_v8  ;;  %v590_v34 = vunpack.c.h.bf16 %v8867_v27  ;;  %v574_v36 = vunpack.c.h.bf16 %v8871_v29  ;;  %v589_v37 = vunpack.c.l.bf16 %v8867_v27  ;;  %v573_v38 = vunpack.c.l.bf16 %v8871_v29  ;;  %v562_v56 = vld [vmem:[%s12166_s1 + $0x48] sm:$0xff]  ;;  %v561_v57 = vld [vmem:[%s12166_s1 + $0x40] sm:$0xff]  ;;  %v564_v58 = vld [vmem:[%s12166_s1 + $0x58] sm:$0xff]  ;;  %s8611_s17 = scalar_lea.vmem %s11898_s23, 1024  ;;  %p8618_p0 = scmp.lt.s32.totalorder %s11898_s23, %s8616_s26 }
  0x28   : > { %7436 = vmatprep.subr.mxu0 %v598_v9  ;;  %v588_v40 = vunpack.c.h.bf16 %v8877_v33  ;;  %v572_v42 = vunpack.c.h.bf16 %v8881_v35  ;;  %v587_v43 = vunpack.c.l.bf16 %v8877_v33  ;;  %v571_v44 = vunpack.c.l.bf16 %v8881_v35  ;;  %v563_v59 = vld [vmem:[%s12166_s1 + $0x50] sm:$0xff]  ;;  %v566_v60 = vld [vmem:[%s12166_s1 + $0x68] sm:$0xff]  ;;  %v565_v61 = vld [vmem:[%s12166_s1 + $0x60] sm:$0xff]  ;;  %p8612_p11 = scmp.ne.s32.totalorder %s11898_s23, %s8611_s17  ;;  %p8619_p1 = scmp.lt.s32.totalorder %s8617_s29, %s8611_s17 }
  0x29   : > { %7437 = vmatpush3.msra.mxu0 %v582_v10  ;;  %v586_v45 = vunpack.c.h.bf16 %v8887_v39  ;;  %v570_v46 = vunpack.c.h.bf16 %v8891_v41  ;;  %v585_v47 = vunpack.c.l.bf16 %v8887_v39  ;;  %v569_v48 = vunpack.c.l.bf16 %v8891_v41  ;;  %v568_v62 = vld [vmem:[%s12166_s1 + $0x78] sm:$0xff]  ;;  %v567_v63 = vld [vmem:[%s12166_s1 + $0x70] sm:$0xff]  ;;  %v710_v0 = vld [vmem:[%s11948_s2] sm:$0x3] }
  0x2a   : > { %7438 = vmatprep.subr.mxu0 %v597_v12  ;;  %8437 = vmatprep.subr.msk.bf16.mxu1 %vm731_vm0, %v710_v0  ;;  %v733_v4 = vsel %vm731_vm0, %v710_v0, 0  ;;  %v800_v5 = vld [vmem:[%s11950_s4] sm:$0x3]  ;;  %p8613_p12 = pnand %p8612_p11, %p8800_p5  ;;  %p8620_p2 = por %p8619_p1, %p8618_p0 }
  0x2b   : > { %7439 = vmatpush3.msra.mxu0 %v581_v14  ;;  %7840 = vmatpush3.bf16.msra.mxu1 %v733_v4  ;;  %v937_v7 = vsel %vm731_vm0, %v800_v5, 0 }
  0x2c   : > { %7440 = vmatprep.subr.mxu0 %v596_v16  ;;  %8438 = vmatprep.subr.msk.bf16.mxu1 %vm731_vm0, %v800_v5  ;;  %p8614_p13 = pneg %p8613_p12 }
  0x2d   : > { %7441 = vmatpush3.msra.mxu0 %v580_v18 }
  0x2e   : > { %7442 = vmatprep.subr.mxu0 %v595_v19  ;;  %p8621_p3 = pnand %p8620_p2, %p8614_p13 }
  0x2f   : > { %7443 = vmatpush3.msra.mxu0 %v579_v20 }
  0x30   : > { %7444 = vmatprep.subr.mxu0 %v594_v22 }
  0x31   : > { %7445 = vmatpush3.msra.mxu0 %v578_v24 }
  0x32   : > { %7446 = vmatprep.subr.mxu0 %v593_v25 }
  0x33   : > { %7447 = vmatpush3.msra.mxu0 %v577_v26 }
  0x34   : > { %7448 = vmatprep.subr.mxu0 %v592_v28 }
  0x35   : > { %7449 = vmatpush3.msra.mxu0 %v576_v30 }
  0x36   : > { %7450 = vmatprep.subr.mxu0 %v591_v31 }
  0x37   : > { %7451 = vmatpush3.msra.mxu0 %v575_v32 }
  0x38   : > { %7452 = vmatprep.subr.mxu0 %v590_v34 }
  0x39   : > { %7453 = vmatpush3.msra.mxu0 %v574_v36 }
  0x3a   : > { %7454 = vmatprep.subr.mxu0 %v589_v37 }
  0x3b   : > { %7455 = vmatpush3.msra.mxu0 %v573_v38 }
  0x3c   : > { %7456 = vmatprep.subr.mxu0 %v588_v40 }
  0x3d   : > { %7457 = vmatpush3.msra.mxu0 %v572_v42 }
  0x3e   : > { %7458 = vmatprep.subr.mxu0 %v587_v43 }
  0x3f   : > { %7459 = vmatpush3.msra.mxu0 %v571_v44 }
  0x40   : > { %7460 = vmatprep.subr.mxu0 %v586_v45 }
  0x41   : > { %7461 = vmatpush3.msra.mxu0 %v570_v46 }
  0x42   : > { %7462 = vmatprep.subr.mxu0 %v585_v47 }
  0x43   : > { %7463 = vmatpush3.msra.mxu0 %v569_v48 }
  0x44   : > { %666 = vmatmul.mubr.f32.vlgmr.msra.gmra.mxu0 %v553_v49 }
  0x45   : > { %670 = vmatprep.mubr.f32.mxu0 %v556_v50 }
  0x48   : > { %671 = vmatmul.mubr.f32.gmra.mxu0 %v555_v51 }
  0x49   : > { %675 = vmatprep.mubr.f32.mxu0 %v558_v52 }
  0x4c   : > { %676 = vmatmul.mubr.f32.gmra.mxu0 %v557_v53 }
  0x4d   : > { %680 = vmatprep.mubr.f32.mxu0 %v560_v54  ;;  %v9101_v54 = vld [vmem:[%s11952_s6 + $0x58] sm:$0xff]  }
  0x50   : > { %681 = vmatmul.mubr.f32.gmra.mxu0 %v559_v55  ;;  %v9107_v55 = vld [vmem:[%s11952_s6 + $0x78] sm:$0xff]  }
  0x51   : > { %685 = vmatprep.mubr.f32.mxu0 %v562_v56 }
  0x54   : > { %686 = vmatmul.mubr.f32.gmra.mxu0 %v561_v57 }
  0x55   : > { %690 = vmatprep.mubr.f32.mxu0 %v564_v58 }
  0x58   : > { %691 = vmatmul.mubr.f32.gmra.mxu0 %v563_v59 }
  0x59   : > { %695 = vmatprep.mubr.f32.mxu0 %v566_v60 }
  0x5c   : > { %696 = vmatmul.mubr.f32.gmra.mxu0 %v565_v61 }
  0x5d   : > { %700 = vmatprep.mubr.f32.mxu0 %v568_v62 }
  0x60   : > { %701 = vmatmul.mubr.f32.gmra.mxu0 %v567_v63 }
 0x104   : > { %v7464_v8 = vpop.f32.mrf.mxu0 }
 0x106   : > { %v7465_v9 = vpop.f32.mrf.mxu0 }
 0x107   : > { %v7466_v14 = vadd.f32 %v7465_v9, %v7464_v8 }
 0x108   : > { %v7467_v10 = vpop.f32.mrf.mxu0 }
 0x10a   : > { %v7468_v12 = vpop.f32.mrf.mxu0 }
 0x10b   : > { %v7469_v16 = vadd.f32 %v7468_v12, %v7467_v10 }
 0x10c   : > { %v7470_v18 = vpop.f32.mrf.mxu0 }
 0x10d   : > { %v706_v19 = vpack.c.bf16 %v7469_v16, %v7466_v14 }
 0x10e   : > { %v7471_v20 = vpop.f32.mrf.mxu0 }
 0x10f   : > { %7841 = vmatprep.mubr.msk.bf16.mxu1 %vm718_vm1, %v706_v19  ;;  %v7472_v25 = vadd.f32 %v7471_v20, %v7470_v18 }
 0x110   : > { %v7473_v22 = vpop.f32.mrf.mxu0 }
 0x112   : > { %v7474_v24 = vpop.f32.mrf.mxu0 }
 0x113   : > { %v7475_v26 = vadd.f32 %v7474_v24, %v7473_v22 }
 0x114   : > { %v7476_v28 = vpop.f32.mrf.mxu0 }
 0x115   : > { %v707_v30 = vpack.c.bf16 %v7475_v26, %v7472_v25  ;;  %v9153_v26 = vld [vmem:[%s11951_s5] ss:$0 sm:$0xff] }
 0x116   : > { %v7477_v31 = vpop.f32.mrf.mxu0 }
 0x117   : > { %7842 = vmatmul.mubr.msk.bf16.vlgmr.msra.gmra.mxu1 %vm718_vm1, %v707_v30  ;;  %v7478_v36 = vadd.f32 %v7477_v31, %v7476_v28 }
 0x118   : > { %v7479_v32 = vpop.f32.mrf.mxu0  ;;  %7850 = vmatpush3.bf16.msra.mxu1 %v937_v7 }
 0x11a   : > { %v7480_v34 = vpop.f32.mrf.mxu0 }
 0x11b   : > { %v7481_v37 = vadd.f32 %v7480_v34, %v7479_v32 }
 0x11c   : > { %v7482_v38 = vpop.f32.mrf.mxu0 }
 0x11d   : > { %v708_v40 = vpack.c.bf16 %v7481_v37, %v7478_v36 }
 0x11e   : > { %v7483_v42 = vpop.f32.mrf.mxu0 }
 0x11f   : > { %7845 = vmatprep.mubr.msk.bf16.mxu1 %vm718_vm1, %v708_v40  ;;  %v7484_v45 = vadd.f32 %v7483_v42, %v7482_v38 }
 0x120   : > { %v7485_v43 = vpop.f32.mrf.mxu0 }
 0x122   : > { %v7486_v44 = vpop.f32.mrf.mxu0 }
 0x123   : > { %v7487_v46 = vadd.f32 %v7486_v44, %v7485_v43 }
 0x125   : > { %v709_v47 = vpack.c.bf16 %v7487_v46, %v7484_v45 }
 0x127   : > { %7846 = vmatmul.mubr.msk.bf16.gmra.mxu1 %vm718_vm1, %v709_v47 }
 0x128   : > { %7851 = vmatprep.mubr.msk.bf16.mxu1 %vm718_vm1, %v8891_v41 }
 0x12f   : > { %7852 = vmatmul.mubr.msk.bf16.vlgmr.msra.gmra.mxu1 %vm718_vm1, %v8881_v35  ;;  %v8504_v35 = vld [vmem:[%s11952_s6] sm:$0xff]  }
 0x130   : > { %7855 = vmatprep.mubr.msk.bf16.mxu1 %vm718_vm1, %v8871_v29 }
 0x137   : > { %7856 = vmatmul.mubr.msk.bf16.gmra.mxu1 %vm718_vm1, %v8861_v23  ;;  %v8502_v23 = vld [vmem:[%s11952_s6 + $0x8] sm:$0xff]  }
 0x138   : > { %7859 = vmatprep.mubr.msk.bf16.mxu1 %vm718_vm1, %v8851_v17 }
 0x13f   : > { %7860 = vmatmul.mubr.msk.bf16.gmra.mxu1 %vm718_vm1, %v8843_v13  ;;  %v1202_v13 = vlaneseq }
 0x140   : > { %7863 = vmatprep.mubr.msk.bf16.mxu1 %vm718_vm1, %v8832_v6  ;;  %v8498_v6 = vld [vmem:[%s11952_s6 + $0x18] sm:$0xff]  }
 0x141   : > { %7923 = vmatprep.subr.bf16.mxu1 %v8498_v6 }
 0x142   : > { %7924 = vmatpush3.bf16.msra.mxu1 %v8498_v6 }
 0x147   : > { %7864 = vmatmul.mubr.msk.bf16.gmra.mxu1 %vm718_vm1, %v8824_v2  ;;  %v8497_v2 = vld [vmem:[%s11952_s6 + $0x38] sm:$0xff]  }
 0x148   : > { %7867 = vmatprep.mubr.msk.bf16.mxu1 %vm718_vm1, %v8887_v39  ;;  %7883 = vmatprep.subr.bf16.mxu0 %v8497_v2 }
 0x149   : > { %7884 = vmatpush3.bf16.msra.mxu0 %v8497_v2 }
 0x14f   : > { %7868 = vmatmul.mubr.msk.bf16.gmra.mxu1 %vm718_vm1, %v8877_v33  ;;  %v8503_v33 = vld [vmem:[%s11952_s6 + $0x20] sm:$0xff]  }
 0x150   : > { %7871 = vmatprep.mubr.msk.bf16.mxu1 %vm718_vm1, %v8867_v27 }
 0x157   : > { %7872 = vmatmul.mubr.msk.bf16.gmra.mxu1 %vm718_vm1, %v8857_v21  ;;  %v8501_v21 = vld [vmem:[%s11952_s6 + $0x28] sm:$0xff]  }
 0x158   : > { %7875 = vmatprep.mubr.msk.bf16.mxu1 %vm718_vm1, %v8847_v15  ;;  %v11967_v15 = vmov 0.0  }
 0x159   : > { %1137 = vst.msk [vmem:[#allocation2 + $0x20] sm:$0xff] %vm1132_vm2, %v11967_v15  ;;  %1138 = vst.msk [vmem:[#allocation2 + $0x28] sm:$0xff] %vm1132_vm2, %v11967_v15 }
 0x15a   : > { %1133 = vst.msk [vmem:[#allocation2] sm:$0xff] %vm1132_vm2, %v11967_v15  ;;  %1134 = vst.msk [vmem:[#allocation2 + $0x8] sm:$0xff] %vm1132_vm2, %v11967_v15 }
 0x15b   : > { %1135 = vst.msk [vmem:[#allocation2 + $0x10] sm:$0xff] %vm1132_vm2, %v11967_v15  ;;  %1136 = vst.msk [vmem:[#allocation2 + $0x18] sm:$0xff] %vm1132_vm2, %v11967_v15 }
 0x15c   : > { %1139 = vst.msk [vmem:[#allocation2 + $0x30] sm:$0xff] %vm1132_vm2, %v11967_v15  ;;  %1140 = vst.msk [vmem:[#allocation2 + $0x38] sm:$0xff] %vm1132_vm2, %v11967_v15 }
 0x15d   : > { %1141 = vst.msk [vmem:[#allocation2 + $0x40] sm:$0xff] %vm1132_vm2, %v11967_v15  ;;  %1142 = vst.msk [vmem:[#allocation2 + $0x48] sm:$0xff] %vm1132_vm2, %v11967_v15 }
 0x15e   : > { %1143 = vst.msk [vmem:[#allocation2 + $0x50] sm:$0xff] %vm1132_vm2, %v11967_v15  ;;  %1144 = vst.msk [vmem:[#allocation2 + $0x58] sm:$0xff] %vm1132_vm2, %v11967_v15 }
 0x15f   : > { %7876 = vmatmul.mubr.msk.bf16.gmra.mxu1 %vm718_vm1, %v8839_v11  ;;  %1145 = vst.msk [vmem:[#allocation2 + $0x60] sm:$0xff] %vm1132_vm2, %v11967_v15  ;;  %1146 = vst.msk [vmem:[#allocation2 + $0x68] sm:$0xff] %vm1132_vm2, %v11967_v15  ;;  %v9073_v11 = vshrl.u32 %v1202_v13, 7 }
 0x160   : > { %7879 = vmatprep.mubr.msk.bf16.mxu1 %vm718_vm1, %v8827_v3  ;;  %1147 = vst.msk [vmem:[#allocation2 + $0x70] sm:$0xff] %vm1132_vm2, %v11967_v15  ;;  %1148 = vst.msk [vmem:[#allocation2 + $0x78] sm:$0xff] %vm1132_vm2, %v11967_v15  ;;  %v8500_v3 = vld [vmem:[%s11952_s6 + $0x10] sm:$0xff]  }
 0x161   : > { %1149 = vst.msk [vmem:[#allocation2 + $0x80] sm:$0xff] %vm1132_vm2, %v11967_v15  ;;  %1150 = vst.msk [vmem:[#allocation2 + $0x88] sm:$0xff] %vm1132_vm2, %v11967_v15  ;;  %7925 = vmatprep.subr.bf16.mxu1 %v8500_v3  ;;  %v1239_v17 = vand.u32 15, %v9073_v11  ;;  %v1619_v39 = vld [vmem:[#allocation2] sm:$0xff]  ;;  %v1620_v50 = vld [vmem:[#allocation2 + $0x8] sm:$0xff]  ;;  %v9115_v58 = vadd.s32 16, %v9073_v11 }
 0x162   : > { %1151 = vst.msk [vmem:[#allocation2 + $0x90] sm:$0xff] %vm1132_vm2, %v11967_v15  ;;  %1152 = vst.msk [vmem:[#allocation2 + $0x98] sm:$0xff] %vm1132_vm2, %v11967_v15  ;;  %7926 = vmatpush3.bf16.msra.mxu1 %v8500_v3  ;;  %v1899_v48 = vld [vmem:[#allocation2 + $0x1] sm:$0xff]  ;;  %v1900_v49 = vld [vmem:[#allocation2 + $0x9] sm:$0xff]  ;;  %v9118_v59 = vadd.s32 8, %v9073_v11  ;;  %v9123_v61 = vadd.s32 32, %v9073_v11 }
 0x163   : > { %1153 = vst.msk [vmem:[#allocation2 + $0xa0] sm:$0xff] %vm1132_vm2, %v11967_v15  ;;  %1154 = vst.msk [vmem:[#allocation2 + $0xa8] sm:$0xff] %vm1132_vm2, %v11967_v15  ;;  %v1651_v27 = vadd.s32 4294967295, %v1239_v17  ;;  %7927 = vmatprep.subr.bf16.mxu1 %v8502_v23  ;;  %v1931_v51 = vpack.c.bf16 %v1900_v49, %v1899_v48  ;;  %v9092_v53 = vld [vmem:[#allocation2 + $0x2] sm:$0xff]  ;;  %v1253_v62 = vand.u32 15, %v9115_v58  ;;  %v9128_v0 = vadd.s32 24, %v9073_v11 }
 0x164   : > { %1155 = vst.msk [vmem:[#allocation2 + $0xb0] sm:$0xff] %vm1132_vm2, %v11967_v15  ;;  %1156 = vst.msk [vmem:[#allocation2 + $0xb8] sm:$0xff] %vm1132_vm2, %v11967_v15  ;;  %v1246_v63 = vand.u32 15, %v9118_v59  ;;  %v1267_v5 = vand.u32 15, %v9123_v61  ;;  %v9136_v9 = vadd.s32 48, %v9073_v11  ;;  %v1211_v20 = vadd.s32 64, %v9073_v11 }
 0x165   : > { %1157 = vst.msk [vmem:[#allocation2 + $0xc0] sm:$0xff] %vm1132_vm2, %v11967_v15  ;;  %1158 = vst.msk [vmem:[#allocation2 + $0xc8] sm:$0xff] %vm1132_vm2, %v11967_v15  ;;  %vm1683_vm3 = vcmp.ge.s32.totalorder %v1651_v27, 0  ;;  %7891 = vmatprep.mubr.msk.bf16.mxu0 %vm1132_vm2, %v1931_v51  ;;  %v1653_v8 = vadd.s32 4294967295, %v1253_v62  ;;  %v1260_v12 = vand.u32 15, %v9128_v0  ;;  %v9146_v24 = vadd.s32 56, %v9073_v11 }
 0x166   : > { %1159 = vst.msk [vmem:[#allocation2 + $0xd0] sm:$0xff] %vm1132_vm2, %v11967_v15  ;;  %1160 = vst.msk [vmem:[#allocation2 + $0xd8] sm:$0xff] %vm1132_vm2, %v11967_v15  ;;  %7928 = vmatpush3.bf16.msra.mxu1 %v8502_v23  ;;  %v9083_v29 = vsel %vm1683_vm3, 1.0, %v11967_v15  ;;  %v2454_v10 = vadd.s32 1, %v1246_v63  ;;  %v1655_v16 = vadd.s32 4294967295, %v1267_v5  ;;  %v1281_v19 = vand.u32 15, %v9136_v9 }
 0x167   : > { %7880 = vmatmul.mubr.msk.bf16.gmra.mxu1 %vm718_vm1, %v8821_v1  ;;  %1161 = vst.msk [vmem:[#allocation2 + $0xe0] sm:$0xff] %vm1132_vm2, %v11967_v15  ;;  %1162 = vst.msk [vmem:[#allocation2 + $0xe8] sm:$0xff] %vm1132_vm2, %v11967_v15  ;;  %v8499_v1 = vld [vmem:[%s11952_s6 + $0x30] sm:$0xff]   ;;  %v1843_v41 = vmul.f32 %v9083_v29, %v1619_v39  ;;  %7929 = vmatprep.subr.bf16.mxu1 %v8504_v35  ;;  %vm1685_vm4 = vcmp.ge.s32.totalorder %v1653_v8, 0  ;;  %v2456_v22 = vadd.s32 1, %v1260_v12  ;;  %v1213_v28 = vadd.s32 80, %v9073_v11 }
 0x168   : > { %1163 = vst.msk [vmem:[#allocation2 + $0xf0] sm:$0xff] %vm1132_vm2, %v11967_v15  ;;  %1164 = vst.msk [vmem:[#allocation2 + $0xf8] sm:$0xff] %vm1132_vm2, %v11967_v15  ;;  %7885 = vmatprep.subr.bf16.mxu0 %v8499_v1  ;;  %vm2518_vm5 = vcmp.lt.s32.totalorder %v2454_v10, 16  ;;  %v9157_v30 = vadd.s32 40, %v9073_v11  ;;  %v1212_v31 = vadd.s32 72, %v9073_v11  ;;  %vm1687_vm6 = vcmp.ge.s32.totalorder %v1655_v16, 0 }
 0x169   : > { %1165 = vst.msk [vmem:[#allocation2 + $0x100] sm:$0xff] %vm1132_vm2, %v11967_v15  ;;  %1166 = vst.msk [vmem:[#allocation2 + $0x108] sm:$0xff] %vm1132_vm2, %v11967_v15  ;;  %7886 = vmatpush3.bf16.msra.mxu0 %v8499_v1  ;;  %v1875_v52 = vpack.c.bf16 %v1620_v50, %v1843_v41  ;;  %v1215_v32 = vadd.s32 96, %v9073_v11  ;;  %v1214_v34 = vadd.s32 88, %v9073_v11  ;;  %v9163_v37 = vsel %vm1685_vm4, 1.0, %v11967_v15 }
 0x16a   : > { %1167 = vst.msk [vmem:[#allocation2 + $0x110] sm:$0xff] %vm1132_vm2, %v11967_v15  ;;  %1168 = vst.msk [vmem:[#allocation2 + $0x118] sm:$0xff] %vm1132_vm2, %v11967_v15  ;;  %7887 = vmatprep.subr.bf16.mxu0 %v8501_v21  ;;  %7930 = vmatpush3.bf16.msra.mxu1 %v8504_v35  ;;  %v1657_v38 = vadd.s32 4294967295, %v1281_v19  ;;  %v9166_v40 = vsel %vm2518_vm5, 1.0, %v11967_v15  ;;  %v1295_v43 = vand.u32 15, %v1211_v20  ;;  %vm2520_vm7 = vcmp.lt.s32.totalorder %v2456_v22, 16 }
 0x16b   : > { %1169 = vst.msk [vmem:[#allocation2 + $0x120] sm:$0xff] %vm1132_vm2, %v11967_v15  ;;  %12168 = vst [vmem:[#allocation10_spill] sm:$0xff] %v9073_v11  ;;  %7931 = vmatprep.mubr.msk.bf16.mxu1 %vm1132_vm2, %v1875_v52  ;;  %8003 = vmatprep.subr.bf16.mxu1 %v9107_v55  ;;  %v1288_v44 = vand.u32 15, %v9146_v24  ;;  %v9171_v46 = vsel %vm1687_vm6, 1.0, %v11967_v15  ;;  %v1309_v47 = vand.u32 15, %v1213_v28  ;;  %v1274_v2 = vand.u32 15, %v9157_v30 }
 0x16c   : > { %5381 = vst.msk [vmem:[#allocation2] sm:$0xff] %vm1132_vm2, %v11967_v15  ;;  %12171 = vst [vmem:[#allocation13_spill] sm:$0xff] %v9115_v58  ;;  %v1302_v6 = vand.u32 15, %v1212_v31  ;;  %v1323_v3 = vand.u32 15, %v1215_v32  ;;  %v1316_v17 = vand.u32 15, %v1214_v34  ;;  %vm1689_vm8 = vcmp.ge.s32.totalorder %v1657_v38, 0 }
 0x16d   : > { %7888 = vmatpush3.bf16.msra.mxu0 %v8501_v21  ;;  %12172 = vst [vmem:[#allocation14_spill] sm:$0xff] %v9118_v59  ;;  %12174 = vst [vmem:[#allocation16_spill] sm:$0xff] %v9123_v61  ;;  %v1217_v23 = vadd.s32 112, %v9073_v11  ;;  %v9177_v27 = vsel %vm2520_vm7, 1.0, %v11967_v15  ;;  %v1659_v41 = vadd.s32 4294967295, %v1295_v43  ;;  %v2460_v48 = vadd.s32 1, %v1288_v44 }
 0x16e   : > { %7889 = vmatprep.subr.bf16.mxu0 %v8503_v33  ;;  %12175 = vst [vmem:[#allocation17_spill] sm:$0xff] %v9128_v0  ;;  %12178 = vst [vmem:[#allocation20_spill] sm:$0xff] %v9136_v9  ;;  %v1661_v50 = vadd.s32 4294967295, %v1309_v47  ;;  %v1219_v51 = vadd.s32 128, %v9073_v11  ;;  %v9183_v52 = vadd.s32 1, %v1274_v2  ;;  %v2462_v62 = vadd.s32 1, %v1302_v6 }
 0x16f   : > { %12181 = vst [vmem:[#allocation23_spill] sm:$0xff] %v9146_v24  ;;  %12183 = vst [vmem:[#allocation25_spill] sm:$0xff] %v9157_v30  ;;  %v1663_v8 = vadd.s32 4294967295, %v1323_v3  ;;  %v2464_v10 = vadd.s32 1, %v1316_v17  ;;  %v9189_v16 = vsel %vm1689_vm8, 1.0, %v11967_v15  ;;  %v1337_v19 = vand.u32 15, %v1217_v23 }
 0x170   : > { %12184 = vst [vmem:[#allocation26_spill] sm:$0xff] %v9166_v40  ;;  %12185 = vst [vmem:[#allocation27_spill] sm:$0xff] %v9177_v27  ;;  %v1218_v22 = vadd.s32 120, %v9073_v11  ;;  %vm1691_vm9 = vcmp.ge.s32.totalorder %v1659_v41, 0  ;;  %vm2524_vm10 = vcmp.lt.s32.totalorder %v2460_v48, 16  ;;  %vm1693_vm11 = vcmp.ge.s32.totalorder %v1661_v50, 0 }
 0x171   : > { %7890 = vmatpush3.bf16.msra.mxu0 %v8503_v33  ;;  %v1216_v33 = vadd.s32 104, %v9073_v11  ;;  %12186 = vst [vmem:[#allocation28_spill] sm:$0xff] %v9189_v16  ;;  %v1351_v34 = vand.u32 15, %v1219_v51  ;;  %vm2526_vm12 = vcmp.lt.s32.totalorder %v2462_v62, 16  ;;  %vm1695_vm13 = vcmp.ge.s32.totalorder %v1663_v8, 0 }
 0x172   : > { %7963 = vmatprep.subr.bf16.mxu0 %v9101_v54  ;;  %vm2528_vm14 = vcmp.lt.s32.totalorder %v2464_v10, 16  ;;  %v9197_v44 = vadd.s32 4294967295, %v1337_v19  ;;  %v1344_v47 = vand.u32 15, %v1218_v22  ;;  %v1220_v2 = vadd.s32 136, %v9073_v11 }
 0x173   : > { %v1330_v20 = vand.u32 15, %v1216_v33  ;;  %v9210_v3 = vsel %vm2524_vm10, 1.0, %v11967_v15  ;;  %v9216_v23 = vsel %vm1693_vm11, 1.0, %v11967_v15  ;;  %v9218_v33 = vadd.s32 4294967295, %v1351_v34 }
 0x174   : > { %12188 = vst [vmem:[#allocation30_spill] sm:$0xff] %v9210_v3  ;;  %12189 = vst [vmem:[#allocation31_spill] sm:$0xff] %v9216_v23  ;;  %v9224_v41 = vsel %vm2526_vm12, 1.0, %v11967_v15  ;;  %v9230_v51 = vsel %vm1695_vm13, 1.0, %v11967_v15  ;;  %v9236_v50 = vsel %vm2528_vm14, 1.0, %v11967_v15  ;;  %vm1697_vm15 = vcmp.ge.s32.totalorder %v9197_v44, 0 }
 0x175   : > { %12190 = vst [vmem:[#allocation32_spill] sm:$0xff] %v9224_v41  ;;  %12191 = vst [vmem:[#allocation33_spill] sm:$0xff] %v9230_v51  ;;  %v9240_v62 = vadd.s32 1, %v1344_v47  ;;  %vm1699_vm1 = vcmp.ge.s32.totalorder %v9218_v33, 0  ;;  %v9266_v47 = vld [vmem:[%s11952_s6 + $0x70] sm:$0xff]   ;;  %v9285_v61 = vadd.s32 176, %v9073_v11 }
 0x176   : > { %12192 = vst [vmem:[#allocation34_spill] sm:$0xff] %v9236_v50  ;;  %v9321_v44 = vld [vmem:[%s11952_s6 + $0x48] sm:$0xff]   ;;  %vm2522_vm14 = vcmp.lt.s32.totalorder %v9183_v52, 16 }
 0x177   : > { %v9360_v33 = vld [vmem:[%s11952_s6 + $0x68] sm:$0xff]   ;;  %vm2532_vm4 = vcmp.lt.s32.totalorder %v9240_v62, 16 }
 0x1d7   : > { %v9110_v56 = vpop.f32.mrf.mxu1 }
 0x1d8   : > { %12169 = vst [vmem:[#allocation11_spill] sm:$0xff] %v9110_v56 }
 0x1d9   : > { %v9112_v57 = vpop.f32.mrf.mxu1 }
 0x1da   : > { %12170 = vst [vmem:[#allocation12_spill] sm:$0xff] %v9112_v57 }
 0x1db   : > { %v9120_v60 = vpop.f32.mrf.mxu1 }
 0x1dc   : > { %12173 = vst [vmem:[#allocation15_spill] sm:$0xff] %v9120_v60 }
 0x1dd   : > { %v9130_v4 = vpop.f32.mrf.mxu1 }
 0x1de   : > { %12176 = vst [vmem:[#allocation18_spill] sm:$0xff] %v9130_v4  ;;  %v9375_v4 = vld [vmem:[%s11952_s6 + $0x40] sm:$0xff]  }
 0x1e7   : > { %v9133_v7 = vpop.f32.mrf.mxu1 }
 0x1e8   : > { %12177 = vst [vmem:[#allocation19_spill] sm:$0xff] %v9133_v7 }
 0x1e9   : > { %v9139_v14 = vpop.f32.mrf.mxu1 }
 0x1ea   : > { %12179 = vst [vmem:[#allocation21_spill] sm:$0xff] %v9139_v14 }
 0x1eb   : > { %v9141_v18 = vpop.f32.mrf.mxu1 }
 0x1ec   : > { %12180 = vst [vmem:[#allocation22_spill] sm:$0xff] %v9141_v18 }
 0x1ed   : > { %v9148_v25 = vpop.f32.mrf.mxu1 }
 0x1ee   : > { %12182 = vst [vmem:[#allocation24_spill] sm:$0xff] %v9148_v25 }
 0x1ef   : > { %v7853_v36 = vpop.f32.mrf.mxu1 }
 0x1f0   : > { %v982_v42 = vadd.f32 %v7853_v36, %v9153_v26  ;;  %v1221_v36 = vadd.s32 144, %v9073_v11 }
 0x1f1   : > { %v973_v45 = vpop.f32.mrf.mxu1 }
 0x1f2   : > { %v1102_v13 = vmax.f32 %v982_v42, 0.0  ;;  %v974_v1 = vadd.f32 %v9153_v26, %v973_v45  ;;  %v9199_v45 = vadd.s32 1, %v1330_v20 }
 0x1f3   : > { %v7854_v21 = vpop.f32.mrf.mxu1 }
 0x1f4   : > { %1172 = vst.msk [vmem:[#allocation2 + $0x21] sm:$0xff] %vm1132_vm2, %v1102_v13  ;;  %v1100_v35 = vmax.f32 %v974_v1, 0.0  ;;  %v985_v39 = vadd.f32 %v7854_v21, %v9153_v26  ;;  %v9206_v1 = vsel %vm1691_vm9, 1.0, %v11967_v15  ;;  %vm2530_vm0 = vcmp.lt.s32.totalorder %v9199_v45, 16 }
 0x1f5   : > { %v976_v49 = vpop.f32.mrf.mxu1  ;;  %12187 = vst [vmem:[#allocation29_spill] sm:$0xff] %v9206_v1 }
 0x1f6   : > { %1170 = vst.msk [vmem:[#allocation2 + $0x11] sm:$0xff] %vm1132_vm2, %v1100_v35  ;;  %v1103_v63 = vmax.f32 %v985_v39, 0.0  ;;  %v977_v5 = vadd.f32 %v9153_v26, %v976_v49  ;;  %v1365_v35 = vand.u32 15, %v1221_v36 }
 0x1f7   : > { %v7857_v12 = vpop.f32.mrf.mxu1 }
 0x1f8   : > { %1173 = vst.msk [vmem:[#allocation2 + $0x29] sm:$0xff] %vm1132_vm2, %v1103_v63  ;;  %v1101_v28 = vmax.f32 %v977_v5, 0.0  ;;  %v998_v31 = vadd.f32 %v7857_v12, %v9153_v26  ;;  %v1358_v5 = vand.u32 15, %v1220_v2  ;;  %v9269_v2 = vadd.s32 152, %v9073_v11 }
 0x1f9   : > { %v989_v32 = vpop.f32.mrf.mxu1 }
 0x1fa   : > { %1171 = vst.msk [vmem:[#allocation2 + $0x19] sm:$0xff] %vm1132_vm2, %v1101_v28  ;;  %v1106_v38 = vmax.f32 %v998_v31, 0.0  ;;  %v990_v42 = vadd.f32 %v9153_v26, %v989_v32  ;;  %v9247_v28 = vadd.s32 160, %v9073_v11  ;;  %v9252_v31 = vld [vmem:[%s11952_s6 + $0x50] sm:$0xff]  }
 0x1fb   : > { %v7858_v43 = vpop.f32.mrf.mxu1  ;;  %v1903_v10 = vld [vmem:[#allocation2 + $0x21] sm:$0xff] }
 0x1fc   : > { %1176 = vst.msk [vmem:[#allocation2 + $0x41] sm:$0xff] %vm1132_vm2, %v1106_v38  ;;  %v1104_v6 = vmax.f32 %v990_v42, 0.0  ;;  %v1001_v13 = vadd.f32 %v7858_v43, %v9153_v26  ;;  %v9261_v43 = vadd.s32 4294967295, %v1365_v35  ;;  %v1379_v0 = vand.u32 15, %v9247_v28 }
 0x1fd   : > { %v992_v17 = vpop.f32.mrf.mxu1  ;;  %v9212_v21 = vld [vmem:[#allocation2 + $0x10] sm:$0xff] }
 0x1fe   : > { %v9220_v39 = vld [vmem:[#allocation2 + $0xa] sm:$0xff]  ;;  %1174 = vst.msk [vmem:[#allocation2 + $0x31] sm:$0xff] %vm1132_vm2, %v1104_v6  ;;  %v1107_v48 = vmax.f32 %v1001_v13, 0.0  ;;  %v993_v49 = vadd.f32 %v9153_v26, %v992_v17  ;;  %v1845_v20 = vmul.f32 %v9163_v37, %v9212_v21  ;;  %v9271_v6 = vld [vmem:[#allocation2 + $0x21] sm:$0xff]  ;;  %vm1701_vm3 = vcmp.ge.s32.totalorder %v9261_v43, 0 }
 0x1ff   : > { %5382 = vst.msk [vmem:[#allocation2 + $0x8] sm:$0xff] %vm1132_vm2, %v11967_v15  ;;  %v7861_v63 = vpop.f32.mrf.mxu1  ;;  %v1901_v19 = vld [vmem:[#allocation2 + $0x11] sm:$0xff]  ;;  %v1904_v22 = vld [vmem:[#allocation2 + $0x29] sm:$0xff]  ;;  %12195 = vst [vmem:[#allocation37_spill] sm:$0xff] %v9271_v6  ;;  %v9370_v14 = vadd.s32 4294967295, %v1379_v0 }
 0x200   : > { %1177 = vst.msk [vmem:[#allocation2 + $0x49] sm:$0xff] %vm1132_vm2, %v1107_v48  ;;  %v1105_v8 = vmax.f32 %v993_v49, 0.0  ;;  %v1014_v12 = vadd.f32 %v7861_v63, %v9153_v26  ;;  %v9254_v32 = vld [vmem:[#allocation2 + $0x11] sm:$0xff]  ;;  %v1933_v9 = vpack.c.bf16 %v1904_v22, %v1903_v10  ;;  %v9349_v59 = vld [vmem:[#allocation2 + $0x28] sm:$0xff]  ;;  %v9388_v0 = vld [vmem:[%s11952_s6 + $0x60] sm:$0xff]  }
 0x201   : > { %12193 = vst [vmem:[#allocation35_spill] sm:$0xff] %v9254_v32  ;;  %v1005_v34 = vpop.f32.mrf.mxu1  ;;  %v1902_v36 = vld [vmem:[#allocation2 + $0x19] sm:$0xff]  ;;  %12208 = vst [vmem:[#allocation49_spill] sm:$0xff] %v9349_v59  ;;  %vm1703_vm6 = vcmp.ge.s32.totalorder %v9370_v14, 0 }
 0x202   : > { %v9256_v38 = vld [vmem:[#allocation2 + $0x18] sm:$0xff]  ;;  %v9258_v42 = vld [vmem:[#allocation2 + $0x20] sm:$0xff]  ;;  %1175 = vst.msk [vmem:[#allocation2 + $0x39] sm:$0xff] %vm1132_vm2, %v1105_v8  ;;  %v1110_v13 = vmax.f32 %v1014_v12, 0.0  ;;  %v1006_v17 = vadd.f32 %v9153_v26, %v1005_v34  ;;  %v1932_v48 = vpack.c.bf16 %v1902_v36, %v1901_v19  ;;  %v9289_v12 = vadd.s32 1, %v1358_v5  ;;  %v9303_v5 = vld [vmem:[#allocation2 + $0x28] sm:$0xff] }
 0x203   : > { %12194 = vst [vmem:[#allocation36_spill] sm:$0xff] %v9256_v38  ;;  %v1876_v49 = vpack.c.bf16 %v9256_v38, %v1845_v20  ;;  %v9276_v35 = vld [vmem:[#allocation2 + $0x12] sm:$0xff]  ;;  %v9278_v63 = vld [vmem:[#allocation2 + $0x1a] sm:$0xff]  ;;  %v7862_v24 = vpop.f32.mrf.mxu1  ;;  %v1847_v30 = vmul.f32 %v9171_v46, %v9258_v42  ;;  %v9287_v8 = vld [vmem:[#allocation2 + $0x22] sm:$0xff]  ;;  %v12200_v19 = vmov 0.0  }
 0x204   : > { %12196 = vst [vmem:[#allocation38_spill] sm:$0xff] %v9276_v35  ;;  %12197 = vst [vmem:[#allocation39_spill] sm:$0xff] %v9278_v63  ;;  %v9280_v15 = vld [vmem:[#allocation2 + $0x19] sm:$0xff]  ;;  %v9297_v34 = vld [vmem:[#allocation2 + $0x22] sm:$0xff]  ;;  %v1108_v10 = vmax.f32 %v1006_v17, 0.0  ;;  %v1017_v22 = vadd.f32 %v7862_v24, %v9153_v26  ;;  %7892 = vmatmul.mubr.msk.bf16.vlgmr.msra.gmra.mxu0 %vm1132_vm2, %v1932_v48  ;;  %v9308_v36 = vsel %vm1697_vm15, 1.0, %v12200_v19 }
 0x205   : > { %12198 = vst [vmem:[#allocation40_spill] sm:$0xff] %v9280_v15  ;;  %12199 = vst [vmem:[#allocation41_spill] sm:$0xff] %v9287_v8  ;;  %v9295_v20 = vld [vmem:[#allocation2 + $0x20] sm:$0xff]  ;;  %7932 = vmatmul.mubr.msk.bf16.vlgmr.msra.gmra.mxu1 %vm1132_vm2, %v1876_v49  ;;  %v1008_v17 = vpop.f32.mrf.mxu1  ;;  %7895 = vmatprep.mubr.msk.bf16.mxu0 %vm1132_vm2, %v1933_v9  ;;  %v1877_v24 = vpack.c.bf16 %v9303_v5, %v1847_v30  ;;  %v9326_v28 = vsel %vm2530_vm0, 1.0, %v12200_v19  ;;  %v1372_v48 = vand.u32 15, %v9269_v2  ;;  %v9330_v49 = vadd.s32 168, %v9073_v11 }
 0x206   : > { %5384 = vst.msk [vmem:[#allocation2 + $0x18] sm:$0xff] %vm1132_vm2, %v12200_v19  ;;  %5383 = vst.msk [vmem:[#allocation2 + $0x10] sm:$0xff] %vm1132_vm2, %v12200_v19  ;;  %7964 = vmatpush3.bf16.msra.mxu0 %v9101_v54  ;;  %v9332_v9 = vld [vmem:[#allocation2 + $0x29] sm:$0xff]  ;;  %v1111_v54 = vmax.f32 %v1017_v22, 0.0  ;;  %v1009_v58 = vadd.f32 %v9153_v26, %v1008_v17  ;;  %v9343_v45 = vsel %vm1699_vm1, 1.0, %v12200_v19  ;;  %8004 = vmatpush3.bf16.msra.mxu1 %v9107_v55  ;;  %v1393_v17 = vand.u32 15, %v9285_v61 }
 0x207   : > { %12201 = vst [vmem:[#allocation42_spill] sm:$0xff] %v9297_v34  ;;  %1180 = vst.msk [vmem:[#allocation2 + $0x61] sm:$0xff] %vm1132_vm2, %v1110_v13  ;;  %v9313_v13 = vld [vmem:[#allocation2 + $0x30] sm:$0xff]  ;;  %7965 = vmatprep.subr.bf16.mxu0 %v9252_v31  ;;  %7935 = vmatprep.mubr.msk.bf16.mxu1 %vm1132_vm2, %v1877_v24  ;;  %v7865_v22 = vpop.f32.mrf.mxu1  ;;  %vm2534_vm5 = vcmp.lt.s32.totalorder %v9289_v12, 16  ;;  %v1907_v7 = vld [vmem:[#allocation2 + $0x41] sm:$0xff]  ;;  %v1386_v34 = vand.u32 15, %v9330_v49 }
 0x208   : > { %12202 = vst [vmem:[#allocation43_spill] sm:$0xff] %v9303_v5  ;;  %5385 = vst.msk [vmem:[#allocation2 + $0x20] sm:$0xff] %vm1132_vm2, %v12200_v19  ;;  %v9337_v30 = vmul.f32 %v9163_v37, %v9313_v13  ;;  %v9347_v2 = vld [vmem:[#allocation2 + $0x2a] sm:$0xff]  ;;  %8005 = vmatprep.subr.bf16.mxu1 %v9266_v47  ;;  %v1109_v55 = vmax.f32 %v1009_v58, 0.0  ;;  %v1030_v24 = vadd.f32 %v7865_v22, %v9153_v26  ;;  %v9390_v22 = vadd.s32 1, %v1372_v48  ;;  %v9406_v49 = vld [vmem:[#allocation2 + $0x42] sm:$0xff] }
 0x209   : > { %12203 = vst [vmem:[#allocation44_spill] sm:$0xff] %v9313_v13  ;;  %12204 = vst [vmem:[#allocation45_spill] sm:$0xff] %v9332_v9  ;;  %v1905_v61 = vld [vmem:[#allocation2 + $0x31] sm:$0xff]  ;;  %v1849_v25 = vmul.f32 %v9189_v16, %v9313_v13  ;;  %v1908_v18 = vld [vmem:[#allocation2 + $0x49] sm:$0xff]  ;;  %v1021_v56 = vpop.f32.mrf.mxu1 }
 0x20a   : > { %1178 = vst.msk [vmem:[#allocation2 + $0x51] sm:$0xff] %vm1132_vm2, %v1108_v10  ;;  %12205 = vst [vmem:[#allocation46_spill] sm:$0xff] %v9337_v30  ;;  %v9351_v10 = vld [vmem:[#allocation2 + $0x2a] sm:$0xff]  ;;  %v1906_v60 = vld [vmem:[#allocation2 + $0x39] sm:$0xff]  ;;  %7966 = vmatpush3.bf16.msra.mxu0 %v9252_v31  ;;  %v1022_v9 = vadd.f32 %v9153_v26, %v1021_v56  ;;  %8006 = vmatpush3.bf16.msra.mxu1 %v9266_v47  ;;  %vm2536_vm8 = vcmp.lt.s32.totalorder %v9390_v22, 16 }
 0x20b   : > { %12206 = vst [vmem:[#allocation47_spill] sm:$0xff] %v9343_v45  ;;  %12207 = vst [vmem:[#allocation48_spill] sm:$0xff] %v9347_v2  ;;  %v9377_v57 = vld [vmem:[#allocation2 + $0x38] sm:$0xff]  ;;  %v9379_v58 = vld [vmem:[#allocation2 + $0x40] sm:$0xff]  ;;  %v1934_v6 = vpack.c.bf16 %v1906_v60, %v1905_v61  ;;  %7967 = vmatprep.subr.bf16.mxu0 %v9321_v44  ;;  %v9410_v60 = vadd.s32 4294967295, %v1393_v17  ;;  %8007 = vmatprep.subr.bf16.mxu1 %v9360_v33  ;;  %v9418_v61 = vadd.s32 184, %v9073_v11 }
 0x20c   : > { %12209 = vst [vmem:[#allocation50_spill] sm:$0xff] %v9351_v10  ;;  %5386 = vst.msk [vmem:[#allocation2 + $0x28] sm:$0xff] %vm1132_vm2, %v12200_v19  ;;  %v1114_v10 = vmax.f32 %v1030_v24, 0.0  ;;  %v1878_v15 = vpack.c.bf16 %v9377_v57, %v1849_v25  ;;  %v9396_v32 = vld [vmem:[#allocation2 + $0x48] sm:$0xff]  ;;  %v9402_v48 = vld [vmem:[#allocation2 + $0x31] sm:$0xff]  ;;  %v1935_v24 = vpack.c.bf16 %v1908_v18, %v1907_v7  ;;  %v1851_v56 = vmul.f32 %v9206_v1, %v9379_v58 }
 0x20d   : > { %1181 = vst.msk [vmem:[#allocation2 + $0x69] sm:$0xff] %vm1132_vm2, %v1111_v54  ;;  %12210 = vst [vmem:[#allocation51_spill] sm:$0xff] %v9377_v57  ;;  %v9382_v54 = vadd.s32 192, %v9073_v11  ;;  %v9400_v31 = vld [vmem:[#allocation2 + $0x42] sm:$0xff]  ;;  %v9413_v25 = vld [vmem:[#allocation2 + $0x3a] sm:$0xff]  ;;  %7896 = vmatmul.mubr.msk.bf16.gmra.mxu0 %vm1132_vm2, %v1934_v6  ;;  %v9430_v18 = vsel %vm2532_vm4, 1.0, %v12200_v19 }
 0x20e   : > { %12211 = vst [vmem:[#allocation52_spill] sm:$0xff] %v9379_v58  ;;  %1179 = vst.msk [vmem:[#allocation2 + $0x59] sm:$0xff] %vm1132_vm2, %v1109_v55  ;;  %v9404_v13 = vld [vmem:[#allocation2 + $0x41] sm:$0xff]  ;;  %v7866_v55 = vpop.f32.mrf.mxu1  ;;  %v9415_v47 = vld [vmem:[#allocation2 + $0x32] sm:$0xff]  ;;  %7936 = vmatmul.mubr.msk.bf16.gmra.mxu1 %vm1132_vm2, %v1878_v15  ;;  %7899 = vmatprep.mubr.msk.bf16.mxu0 %vm1132_vm2, %v1935_v24  ;;  %v1879_v6 = vpack.c.bf16 %v9396_v32, %v1851_v56  ;;  %v9455_v24 = vmul.f32 %v9083_v29, %v9295_v20  ;;  %v9475_v20 = vsel %vm2534_vm5, 1.0, %v12200_v19  ;;  %vm5295_vm5 = vcmask 130048  }
 0x20f   : > { %12212 = vst [vmem:[#allocation53_spill] sm:$0xff] %v9396_v32  ;;  %12213 = vst [vmem:[#allocation54_spill] sm:$0xff] %v9400_v31  ;;  %v1033_v7 = vadd.f32 %v7866_v55, %v9153_v26  ;;  %v9432_v17 = vld [vmem:[#allocation2 + $0x38] sm:$0xff]  ;;  %v1407_v15 = vand.u32 15, %v9382_v54  ;;  %7968 = vmatpush3.bf16.msra.mxu0 %v9321_v44  ;;  %v9451_v31 = vadd.s32 1, %v1386_v34  ;;  %v9468_v34 = vsel %vm1701_vm3, 1.0, %v12200_v19  ;;  %8008 = vmatpush3.bf16.msra.mxu1 %v9360_v33 }
 0x210   : > { %12214 = vst [vmem:[#allocation55_spill] sm:$0xff] %v9402_v48  ;;  %12215 = vst [vmem:[#allocation56_spill] sm:$0xff] %v9404_v13  ;;  %v9420_v48 = vld [vmem:[#allocation2 + $0x39] sm:$0xff]  ;;  %7969 = vmatprep.subr.bf16.mxu0 %v9375_v4  ;;  %v9477_v56 = vld [vmem:[#allocation2 + $0x49] sm:$0xff]  ;;  %7939 = vmatprep.mubr.msk.bf16.mxu1 %vm1132_vm2, %v1879_v6  ;;  %v9487_v33 = vsel %vm1703_vm6, 1.0, %v12200_v19  ;;  %vm1705_vm7 = vcmp.ge.s32.totalorder %v9410_v60, 0 }
 0x211   : > { %12216 = vst [vmem:[#allocation57_spill] sm:$0xff] %v9406_v49  ;;  %12217 = vst [vmem:[#allocation58_spill] sm:$0xff] %v9413_v25  ;;  %v1112_v49 = vmax.f32 %v1022_v9, 0.0  ;;  %v9434_v13 = vld [vmem:[#allocation2 + $0x40] sm:$0xff]  ;;  %v1024_v9 = vpop.f32.mrf.mxu1  ;;  %v9444_v62 = vld [vmem:[#allocation2 + $0x4a] sm:$0xff]  ;;  %v1115_v44 = vmax.f32 %v1033_v7, 0.0  ;;  %8009 = vmatprep.subr.bf16.mxu1 %v9388_v0 }
 0x212   : > { %12218 = vst [vmem:[#allocation59_spill] sm:$0xff] %v9415_v47  ;;  %12219 = vst [vmem:[#allocation60_spill] sm:$0xff] %v9420_v48  ;;  %v9436_v48 = vld [vmem:[#allocation2 + $0x32] sm:$0xff]  ;;  %v1025_v54 = vadd.f32 %v9153_v26, %v1024_v9  ;;  %v9481_v7 = vld [vmem:[#allocation2 + $0x4a] sm:$0xff]  ;;  %v1400_v12 = vand.u32 15, %v9418_v61  ;;  %v9506_v58 = vmul.f32 %v9210_v3, %v9444_v62  ;;  %vm2538_vm9 = vcmp.lt.s32.totalorder %v9451_v31, 16 }
 0x213   : > { %1184 = vst.msk [vmem:[#allocation2 + $0x81] sm:$0xff] %vm1132_vm2, %v1114_v10  ;;  %12220 = vst [vmem:[#allocation61_spill] sm:$0xff] %v9432_v17  ;;  %v9440_v10 = vld [vmem:[#allocation2 + $0x50] sm:$0xff]  ;;  %v9449_v55 = vld [vmem:[%s11952_s6 + $0x98] sm:$0xff]   ;;  %v7869_v43 = vpop.f32.mrf.mxu1  ;;  %7970 = vmatpush3.bf16.msra.mxu0 %v9375_v4  ;;  %8010 = vmatpush3.bf16.msra.mxu1 %v9388_v0  ;;  %v9543_v0 = vsel %vm2536_vm8, 1.0, %v12200_v19  ;;  %v9627_v17 = vmul.f32 %v9171_v46, %v9434_v13 }
 0x214   : > { %12221 = vst [vmem:[#allocation62_spill] sm:$0xff] %v9436_v48  ;;  %12222 = vst [vmem:[#allocation63_spill] sm:$0xff] %v9440_v10  ;;  %v9496_v9 = vld [vmem:[%s11952_s6 + $0xb8] sm:$0xff]   ;;  %v3329_v6 = vld [vmem:[#allocation2 + $0x61] sm:$0xff]  ;;  %v1113_v14 = vmax.f32 %v1025_v54, 0.0  ;;  %v1046_v48 = vadd.f32 %v7869_v43, %v9153_v26  ;;  %v1853_v32 = vmul.f32 %v9216_v23, %v9440_v10  ;;  %8043 = vmatprep.subr.bf16.mxu0 %v9449_v55 }
 0x215   : > { %12223 = vst [vmem:[#allocation64_spill] sm:$0xff] %v9444_v62  ;;  %12224 = vst [vmem:[#allocation65_spill] sm:$0xff] %v9449_v55  ;;  %v1911_v47 = vld [vmem:[#allocation2 + $0x61] sm:$0xff]  ;;  %v1912_v61 = vld [vmem:[#allocation2 + $0x69] sm:$0xff]  ;;  %v1037_v57 = vpop.f32.mrf.mxu1  ;;  %8083 = vmatprep.subr.bf16.mxu1 %v9496_v9 }
 0x216   : > { %12225 = vst [vmem:[#allocation66_spill] sm:$0xff] %v9455_v24  ;;  %5387 = vst.msk [vmem:[#allocation2 + $0x30] sm:$0xff] %vm1132_vm2, %v12200_v19  ;;  %v3330_v25 = vld [vmem:[#allocation2 + $0x69] sm:$0xff]  ;;  %v1910_v8 = vld [vmem:[#allocation2 + $0x59] sm:$0xff]  ;;  %v1038_v62 = vadd.f32 %v9153_v26, %v1037_v57  ;;  %v9554_v24 = vadd.s32 1, %v1400_v12  ;;  %v9578_v12 = vsel %vm2538_vm9, 1.0, %v12200_v19 }
 0x217   : > { %5388 = vst.msk [vmem:[#allocation2 + $0x38] sm:$0xff] %vm1132_vm2, %v12200_v19  ;;  %5389 = vst.msk [vmem:[#allocation2 + $0x40] sm:$0xff] %vm1132_vm2, %v12200_v19  ;;  %v9508_v5 = vld [vmem:[#allocation2 + $0x58] sm:$0xff]  ;;  %v9510_v35 = vld [vmem:[#allocation2 + $0x60] sm:$0xff]  ;;  %v9516_v43 = vpack.c.bf16 %v3330_v25, %v3329_v6 }
 0x218   : > { %1182 = vst.msk [vmem:[#allocation2 + $0x71] sm:$0xff] %vm1132_vm2, %v1112_v49  ;;  %12226 = vst [vmem:[#allocation67_spill] sm:$0xff] %v9468_v34  ;;  %v9479_v49 = vld [vmem:[#allocation2 + $0x48] sm:$0xff]  ;;  %v3327_v54 = vld [vmem:[#allocation2 + $0x51] sm:$0xff]  ;;  %v1880_v38 = vpack.c.bf16 %v9508_v5, %v1853_v32  ;;  %v1855_v57 = vmul.f32 %v9230_v51, %v9510_v35  ;;  %v9536_v32 = vadd.s32 208, %v9073_v11  ;;  %vm2540_vm11 = vcmp.lt.s32.totalorder %v9554_v24, 16 }
 0x219   : > { %12227 = vst [vmem:[#allocation68_spill] sm:$0xff] %v9477_v56  ;;  %12228 = vst [vmem:[#allocation69_spill] sm:$0xff] %v9479_v49  ;;  %v1909_v56 = vld [vmem:[#allocation2 + $0x51] sm:$0xff]  ;;  %v9526_v4 = vld [vmem:[#allocation2 + $0x5a] sm:$0xff] }
 0x21a   : > { %12229 = vst [vmem:[#allocation70_spill] sm:$0xff] %v9481_v7  ;;  %12230 = vst [vmem:[#allocation71_spill] sm:$0xff] %v9496_v9  ;;  %v1936_v3 = vpack.c.bf16 %v1910_v8, %v1909_v56  ;;  %v9528_v7 = vld [vmem:[#allocation2 + $0x62] sm:$0xff]  ;;  %v3328_v25 = vld [vmem:[#allocation2 + $0x59] sm:$0xff]  ;;  %7940 = vmatmul.mubr.msk.bf16.gmra.mxu1 %vm1132_vm2, %v1880_v38 }
 0x21b   : > { %5390 = vst.msk [vmem:[#allocation2 + $0x48] sm:$0xff] %vm1132_vm2, %v12200_v19  ;;  %1185 = vst.msk [vmem:[#allocation2 + $0x89] sm:$0xff] %vm1132_vm2, %v1115_v44  ;;  %v9512_v44 = vadd.s32 4294967295, %v1407_v15  ;;  %v9523_v15 = vld [vmem:[#allocation2 + $0x68] sm:$0xff]  ;;  %v9531_v6 = vld [vmem:[#allocation2 + $0x50] sm:$0xff]  ;;  %v9556_v22 = vpack.c.bf16 %v3328_v25, %v3327_v54  ;;  %v9582_v54 = vmul.f32 %v9224_v41, %v9526_v4  ;;  %v9594_v25 = vadd.s32 200, %v9073_v11 }
 0x21c   : > { %12231 = vst [vmem:[#allocation72_spill] sm:$0xff] %v9506_v58  ;;  %12232 = vst [vmem:[#allocation73_spill] sm:$0xff] %v9508_v5  ;;  %v1118_v58 = vmax.f32 %v1046_v48, 0.0  ;;  %v1937_v48 = vpack.c.bf16 %v1912_v61, %v1911_v47  ;;  %v9538_v8 = vld [vmem:[#allocation2 + $0x52] sm:$0xff]  ;;  %v9548_v10 = vld [vmem:[#allocation2 + $0x62] sm:$0xff]  ;;  %v1116_v47 = vmax.f32 %v1038_v62, 0.0  ;;  %7900 = vmatmul.mubr.msk.bf16.gmra.mxu0 %vm1132_vm2, %v1936_v3 }
 0x21d   : > { %12233 = vst [vmem:[#allocation74_spill] sm:$0xff] %v9510_v35  ;;  %12234 = vst [vmem:[#allocation75_spill] sm:$0xff] %v9516_v43  ;;  %v9546_v56 = vld [vmem:[#allocation2 + $0x58] sm:$0xff]  ;;  %v9558_v59 = vld [vmem:[#allocation2 + $0x60] sm:$0xff]  ;;  %v9571_v3 = vsel %vm1705_vm7, 1.0, %v12200_v19  ;;  %vm1707_vm10 = vcmp.ge.s32.totalorder %v9512_v44, 0 }
 0x21e   : > { %1183 = vst.msk [vmem:[#allocation2 + $0x79] sm:$0xff] %vm1132_vm2, %v1113_v14  ;;  %12235 = vst [vmem:[#allocation76_spill] sm:$0xff] %v9523_v15  ;;  %v7870_v14 = vpop.f32.mrf.mxu1  ;;  %v9560_v43 = vld [vmem:[#allocation2 + $0x52] sm:$0xff]  ;;  %v9562_v35 = vld [vmem:[#allocation2 + $0x5a] sm:$0xff]  ;;  %7903 = vmatprep.mubr.msk.bf16.mxu0 %vm1132_vm2, %v1937_v48 }
 0x21f   : > { %12236 = vst [vmem:[#allocation77_spill] sm:$0xff] %v9526_v4  ;;  %12237 = vst [vmem:[#allocation78_spill] sm:$0xff] %v9528_v7  ;;  %v1049_v61 = vadd.f32 %v7870_v14, %v9153_v26  ;;  %v9566_v62 = vld [vmem:[#allocation2 + $0x70] sm:$0xff]  ;;  %v9596_v14 = vld [vmem:[#allocation2 + $0x68] sm:$0xff] }
 0x220   : > { %12238 = vst [vmem:[#allocation79_spill] sm:$0xff] %v9538_v8  ;;  %12239 = vst [vmem:[#allocation80_spill] sm:$0xff] %v9546_v56  ;;  %v1040_v5 = vpop.f32.mrf.mxu1  ;;  %v9573_v38 = vld [vmem:[#allocation2 + $0x6a] sm:$0xff] }
 0x221   : > { %12240 = vst [vmem:[#allocation81_spill] sm:$0xff] %v9548_v10  ;;  %1188 = vst.msk [vmem:[#allocation2 + $0xa1] sm:$0xff] %vm1132_vm2, %v1118_v58  ;;  %v1881_v58 = vpack.c.bf16 %v9523_v15, %v1855_v57  ;;  %v1119_v60 = vmax.f32 %v1049_v61, 0.0  ;;  %v1041_v31 = vadd.f32 %v9153_v26, %v1040_v5  ;;  %v9598_v48 = vld [vmem:[#allocation2 + $0x6a] sm:$0xff]  ;;  %v9606_v5 = vmul.f32 %v9236_v50, %v9573_v38  ;;  %v3333_v61 = vld [vmem:[#allocation2 + $0x81] sm:$0xff] }
 0x222   : > { %12241 = vst [vmem:[#allocation82_spill] sm:$0xff] %v9556_v22  ;;  %12242 = vst [vmem:[#allocation83_spill] sm:$0xff] %v9560_v43  ;;  %v7873_v57 = vpop.f32.mrf.mxu1  ;;  %v1913_v22 = vld [vmem:[#allocation2 + $0x71] sm:$0xff]  ;;  %v1916_v8 = vld [vmem:[#allocation2 + $0x89] sm:$0xff] }
 0x223   : > { %12243 = vst [vmem:[#allocation84_spill] sm:$0xff] %v9566_v62  ;;  %12244 = vst [vmem:[#allocation85_spill] sm:$0xff] %v9573_v38  ;;  %7943 = vmatprep.mubr.msk.bf16.mxu1 %vm1132_vm2, %v1881_v58  ;;  %v1117_v58 = vmax.f32 %v1041_v31, 0.0  ;;  %v1062_v4 = vadd.f32 %v7873_v57, %v9153_v26  ;;  %v3334_v38 = vld [vmem:[#allocation2 + $0x89] sm:$0xff]  ;;  %v3331_v31 = vld [vmem:[#allocation2 + $0x71] sm:$0xff] }
 0x224   : > { %12245 = vst [vmem:[#allocation86_spill] sm:$0xff] %v9582_v54  ;;  %5392 = vst.msk [vmem:[#allocation2 + $0x58] sm:$0xff] %vm1132_vm2, %v12200_v19  ;;  %v1915_v54 = vld [vmem:[#allocation2 + $0x81] sm:$0xff]  ;;  %v1053_v9 = vpop.f32.mrf.mxu1  ;;  %v9623_v57 = vpack.c.bf16 %v3334_v38, %v3333_v61 }
 0x225   : > { %5391 = vst.msk [vmem:[#allocation2 + $0x50] sm:$0xff] %vm1132_vm2, %v12200_v19  ;;  %5393 = vst.msk [vmem:[#allocation2 + $0x60] sm:$0xff] %vm1132_vm2, %v12200_v19  ;;  %v1914_v55 = vld [vmem:[#allocation2 + $0x79] sm:$0xff]  ;;  %v1122_v10 = vmax.f32 %v1062_v4, 0.0  ;;  %v1054_v43 = vadd.f32 %v9153_v26, %v1053_v9  ;;  %v9640_v61 = vld [vmem:[#allocation2 + $0x82] sm:$0xff]  ;;  %v1939_v7 = vpack.c.bf16 %v1916_v8, %v1915_v54  ;;  %v9645_v4 = vadd.s32 224, %v9073_v11 }
 0x226   : > { %1186 = vst.msk [vmem:[#allocation2 + $0x91] sm:$0xff] %vm1132_vm2, %v1116_v47  ;;  %12246 = vst [vmem:[#allocation87_spill] sm:$0xff] %v9596_v14  ;;  %v1857_v47 = vmul.f32 %v9308_v36, %v9566_v62  ;;  %v9617_v15 = vld [vmem:[#allocation2 + $0x78] sm:$0xff]  ;;  %v9619_v30 = vld [vmem:[#allocation2 + $0x80] sm:$0xff]  ;;  %v9631_v62 = vmul.f32 %v9189_v16, %v9531_v6  ;;  %v1938_v50 = vpack.c.bf16 %v1914_v55, %v1913_v22  ;;  %v9650_v55 = vadd.s32 216, %v9073_v11 }
 0x227   : > { %12247 = vst [vmem:[#allocation88_spill] sm:$0xff] %v9598_v48  ;;  %12248 = vst [vmem:[#allocation89_spill] sm:$0xff] %v9606_v5  ;;  %v9638_v38 = vld [vmem:[#allocation2 + $0x7a] sm:$0xff]  ;;  %v7874_v5 = vpop.f32.mrf.mxu1  ;;  %v1859_v6 = vmul.f32 %v9343_v45, %v9619_v30  ;;  %v9647_v9 = vld [vmem:[#allocation2 + $0x72] sm:$0xff] }
 0x228   : > { %5394 = vst.msk [vmem:[#allocation2 + $0x68] sm:$0xff] %vm1132_vm2, %v12200_v19  ;;  %1189 = vst.msk [vmem:[#allocation2 + $0xa9] sm:$0xff] %vm1132_vm2, %v1119_v60  ;;  %v1882_v41 = vpack.c.bf16 %v9617_v15, %v1857_v47  ;;  %v9636_v60 = vld [vmem:[#allocation2 + $0x88] sm:$0xff]  ;;  %v3332_v13 = vld [vmem:[#allocation2 + $0x79] sm:$0xff]  ;;  %v1065_v8 = vadd.f32 %v7874_v5, %v9153_v26  ;;  %7904 = vmatmul.mubr.msk.bf16.gmra.mxu0 %vm1132_vm2, %v1938_v50 }
 0x229   : > { %12249 = vst [vmem:[#allocation90_spill] sm:$0xff] %v9617_v15  ;;  %12250 = vst [vmem:[#allocation91_spill] sm:$0xff] %v9619_v30  ;;  %v9652_v22 = vld [vmem:[#allocation2 + $0x78] sm:$0xff]  ;;  %v9654_v47 = vld [vmem:[#allocation2 + $0x82] sm:$0xff]  ;;  %v9660_v54 = vpack.c.bf16 %v3332_v13, %v3331_v31  ;;  %v9664_v30 = vmul.f32 %v9326_v28, %v9638_v38  ;;  %7907 = vmatprep.mubr.msk.bf16.mxu0 %vm1132_vm2, %v1939_v7  ;;  %v12265_v13 = vand.u32 15, %v9536_v32  ;;  %v9699_v31 = vsel %vm2540_vm11, 1.0, %v12200_v19 }
 0x22a   : > { %12251 = vst [vmem:[#allocation92_spill] sm:$0xff] %v9623_v57  ;;  %12252 = vst [vmem:[#allocation93_spill] sm:$0xff] %v9627_v17  ;;  %v4003_v57 = vld [vmem:[#allocation2 + $0x70] sm:$0xff]  ;;  %7944 = vmatmul.mubr.msk.bf16.gmra.mxu1 %vm1132_vm2, %v1882_v41  ;;  %v4005_v15 = vld [vmem:[#allocation2 + $0x80] sm:$0xff]  ;;  %v9677_v41 = vsel %vm1707_vm10, 1.0, %v12200_v19  ;;  %v1123_v7 = vmax.f32 %v1065_v8, 0.0 }
 0x22b   : > { %12253 = vst [vmem:[#allocation94_spill] sm:$0xff] %v9631_v62  ;;  %1187 = vst.msk [vmem:[#allocation2 + $0x99] sm:$0xff] %vm1132_vm2, %v1117_v58  ;;  %v1120_v58 = vmax.f32 %v1054_v43, 0.0  ;;  %v9666_v16 = vld [vmem:[#allocation2 + $0x72] sm:$0xff]  ;;  %v9668_v48 = vld [vmem:[#allocation2 + $0x7a] sm:$0xff] }
 0x22c   : > { %12254 = vst [vmem:[#allocation95_spill] sm:$0xff] %v9636_v60  ;;  %12255 = vst [vmem:[#allocation96_spill] sm:$0xff] %v9638_v38  ;;  %v9701_v5 = vld [vmem:[#allocation2 + $0x88] sm:$0xff] }
 0x22d   : > { %12256 = vst [vmem:[#allocation97_spill] sm:$0xff] %v9640_v61  ;;  %12257 = vst [vmem:[#allocation98_spill] sm:$0xff] %v9647_v9  ;;  %v9672_v43 = vld [vmem:[#allocation2 + $0x90] sm:$0xff]  ;;  %v1919_v38 = vld [vmem:[#allocation2 + $0xa1] sm:$0xff] }
 0x22e   : > { %12258 = vst [vmem:[#allocation99_spill] sm:$0xff] %v9652_v22  ;;  %12259 = vst [vmem:[#allocation100_spill] sm:$0xff] %v9654_v47  ;;  %v1056_v47 = vpop.f32.mrf.mxu1  ;;  %v9679_v50 = vld [vmem:[#allocation2 + $0x8a] sm:$0xff] }
 0x22f   : > { %1192 = vst.msk [vmem:[#allocation2 + $0xc1] sm:$0xff] %vm1132_vm2, %v1122_v10  ;;  %12260 = vst [vmem:[#allocation101_spill] sm:$0xff] %v9660_v54  ;;  %v1883_v10 = vpack.c.bf16 %v9636_v60, %v1859_v6  ;;  %v1057_v44 = vadd.f32 %v9153_v26, %v1056_v47  ;;  %v9694_v6 = vadd.s32 4294967295, %v12265_v13  ;;  %v9703_v17 = vld [vmem:[#allocation2 + $0x8a] sm:$0xff]  ;;  %v9711_v32 = vmul.f32 %v9430_v18, %v9679_v50 }
 0x230   : > { %12261 = vst [vmem:[#allocation102_spill] sm:$0xff] %v9664_v30  ;;  %12262 = vst [vmem:[#allocation103_spill] sm:$0xff] %v9666_v16  ;;  %v7877_v49 = vpop.f32.mrf.mxu1  ;;  %v1917_v13 = vld [vmem:[#allocation2 + $0x91] sm:$0xff]  ;;  %v1920_v47 = vld [vmem:[#allocation2 + $0xa9] sm:$0xff]  ;;  %v1428_v30 = vand.u32 15, %v9650_v55 }
 0x231   : > { %12263 = vst [vmem:[#allocation104_spill] sm:$0xff] %v9672_v43  ;;  %12264 = vst [vmem:[#allocation105_spill] sm:$0xff] %v9679_v50  ;;  %7947 = vmatprep.mubr.msk.bf16.mxu1 %vm1132_vm2, %v1883_v10  ;;  %v1121_v8 = vmax.f32 %v1057_v44, 0.0  ;;  %v1078_v10 = vadd.f32 %v7877_v49, %v9153_v26  ;;  %v9733_v49 = vmul.f32 %v9216_v23, %v4003_v57  ;;  %v9745_v57 = vld [vmem:[#allocation2 + $0xa8] sm:$0xff]  ;;  %vm1709_vm12 = vcmp.ge.s32.totalorder %v9694_v6, 0 }
 0x232   : > { %5395 = vst.msk [vmem:[#allocation2 + $0x70] sm:$0xff] %vm1132_vm2, %v12200_v19  ;;  %5396 = vst.msk [vmem:[#allocation2 + $0x78] sm:$0xff] %vm1132_vm2, %v12200_v19  ;;  %v1069_v54 = vpop.f32.mrf.mxu1  ;;  %v1918_v60 = vld [vmem:[#allocation2 + $0x99] sm:$0xff]  ;;  %v9736_v44 = vmul.f32 %v9230_v51, %v4005_v15  ;;  %v9743_v61 = vpack.c.bf16 %v1920_v47, %v1919_v38  ;;  %v9760_v47 = vld [vmem:[#allocation2 + $0xa2] sm:$0xff] }
 0x233   : > { %5397 = vst.msk [vmem:[#allocation2 + $0x80] sm:$0xff] %vm1132_vm2, %v12200_v19  ;;  %1190 = vst.msk [vmem:[#allocation2 + $0xb1] sm:$0xff] %vm1132_vm2, %v1120_v58  ;;  %v1435_v58 = vand.u32 15, %v9645_v4  ;;  %v1861_v4 = vmul.f32 %v9468_v34, %v9672_v43  ;;  %v9722_v9 = vld [vmem:[#allocation2 + $0x98] sm:$0xff]  ;;  %v9724_v24 = vld [vmem:[#allocation2 + $0xa0] sm:$0xff]  ;;  %v1126_v55 = vmax.f32 %v1078_v10, 0.0  ;;  %v1070_v56 = vadd.f32 %v9153_v26, %v1069_v54 }
 0x234   : > { %12266 = vst [vmem:[#allocation106_spill] sm:$0xff] %v9701_v5  ;;  %12267 = vst [vmem:[#allocation107_spill] sm:$0xff] %v9711_v32  ;;  %v1940_v43 = vpack.c.bf16 %v1918_v60, %v1917_v13  ;;  %v9741_v62 = vld [vmem:[#allocation2 + $0x9a] sm:$0xff]  ;;  %v1863_v15 = vmul.f32 %v9487_v33, %v9724_v24  ;;  %v3335_v60 = vld [vmem:[#allocation2 + $0x91] sm:$0xff] }
 0x235   : > { %5398 = vst.msk [vmem:[#allocation2 + $0x88] sm:$0xff] %vm1132_vm2, %v12200_v19  ;;  %1193 = vst.msk [vmem:[#allocation2 + $0xc9] sm:$0xff] %vm1132_vm2, %v1123_v7  ;;  %v9730_v7 = vmul.f32 %v9206_v1, %v9558_v59  ;;  %v1884_v50 = vpack.c.bf16 %v9722_v9, %v1861_v4  ;;  %v3336_v32 = vld [vmem:[#allocation2 + $0x99] sm:$0xff]  ;;  %v7878_v59 = vpop.f32.mrf.mxu1  ;;  %v9749_v51 = vadd.s32 4294967295, %v1435_v58  ;;  %v4007_v54 = vld [vmem:[#allocation2 + $0x90] sm:$0xff]  ;;  %v1124_v10 = vmax.f32 %v1070_v56, 0.0 }
 0x236   : > { %12268 = vst [vmem:[#allocation108_spill] sm:$0xff] %v9722_v9  ;;  %12269 = vst [vmem:[#allocation109_spill] sm:$0xff] %v9724_v24  ;;  %v1081_v13 = vadd.f32 %v7878_v59, %v9153_v26  ;;  %7908 = vmatmul.mubr.msk.bf16.gmra.mxu0 %vm1132_vm2, %v1940_v43  ;;  %v9758_v38 = vld [vmem:[#allocation2 + $0x92] sm:$0xff]  ;;  %v9762_v58 = vpack.c.bf16 %v3336_v32, %v3335_v60  ;;  %v9766_v4 = vmul.f32 %v9475_v20, %v9741_v62  ;;  %v9768_v24 = vld [vmem:[#allocation2 + $0xa1] sm:$0xff] }
 0x237   : > { %12270 = vst [vmem:[#allocation110_spill] sm:$0xff] %v9730_v7  ;;  %12271 = vst [vmem:[#allocation111_spill] sm:$0xff] %v9733_v49  ;;  %7948 = vmatmul.mubr.msk.bf16.gmra.mxu1 %vm1132_vm2, %v1884_v50  ;;  %v1072_v56 = vpop.f32.mrf.mxu1  ;;  %7911 = vmatprep.mubr.msk.bf16.mxu0 %vm1132_vm2, %v9743_v61  ;;  %v1885_v43 = vpack.c.bf16 %v9745_v57, %v1863_v15  ;;  %v12284_v59 = vand.u32 15, %v9594_v25  ;;  %v9795_v9 = vadd.s32 232, %v9073_v11  ;;  %v9797_v25 = vld [vmem:[#allocation2 + $0x98] sm:$0xff]  ;;  %v9813_v14 = vld [vmem:[#allocation2 + $0xa9] sm:$0xff] }
 0x238   : > { %12272 = vst [vmem:[#allocation112_spill] sm:$0xff] %v9736_v44  ;;  %1191 = vst.msk [vmem:[#allocation2 + $0xb9] sm:$0xff] %vm1132_vm2, %v1121_v8  ;;  %v9752_v8 = vadd.s32 240, %v9073_v11  ;;  %v1127_v15 = vmax.f32 %v1081_v13, 0.0  ;;  %v9799_v23 = vld [vmem:[#allocation2 + $0x9a] sm:$0xff]  ;;  %vm1711_vm13 = vcmp.ge.s32.totalorder %v9749_v51, 0 }
 0x239   : > { %12273 = vst [vmem:[#allocation113_spill] sm:$0xff] %v9741_v62  ;;  %12274 = vst [vmem:[#allocation114_spill] sm:$0xff] %v9743_v61  ;;  %v9782_v60 = vadd.s32 1, %v12284_v59  ;;  %v9788_v62 = vld [vmem:[#allocation2 + $0xa2] sm:$0xff]  ;;  %v1073_v61 = vadd.f32 %v9153_v26, %v1072_v56  ;;  %7951 = vmatprep.mubr.msk.bf16.mxu1 %vm1132_vm2, %v1885_v43 }
 0x23a   : > { %12275 = vst [vmem:[#allocation115_spill] sm:$0xff] %v9745_v57  ;;  %1196 = vst.msk [vmem:[#allocation2 + $0xe1] sm:$0xff] %vm1132_vm2, %v1126_v55  ;;  %v9770_v55 = vld [vmem:[#allocation2 + $0x92] sm:$0xff]  ;;  %v9778_v32 = vld [vmem:[#allocation2 + $0xaa] sm:$0xff]  ;;  %v9792_v57 = vadd.s32 1, %v1428_v30  ;;  %v1449_v7 = vand.u32 15, %v9752_v8 }
 0x23b   : > { %12276 = vst [vmem:[#allocation116_spill] sm:$0xff] %v9758_v38  ;;  %12277 = vst [vmem:[#allocation117_spill] sm:$0xff] %v9760_v47  ;;  %v9775_v50 = vld [vmem:[#allocation2 + $0xb0] sm:$0xff]  ;;  %v4009_v59 = vld [vmem:[#allocation2 + $0xa0] sm:$0xff]  ;;  %v9807_v30 = vmul.f32 %v9543_v0, %v9778_v32  ;;  %v1125_v8 = vmax.f32 %v1073_v61, 0.0  ;;  %vm2542_vm15 = vcmp.lt.s32.totalorder %v9782_v60, 16 }
 0x23c   : > { %12278 = vst [vmem:[#allocation118_spill] sm:$0xff] %v9762_v58  ;;  %12279 = vst [vmem:[#allocation119_spill] sm:$0xff] %v9766_v4  ;;  %v7881_v58 = vpop.f32.mrf.mxu1  ;;  %v9811_v56 = vld [vmem:[#allocation2 + $0xa8] sm:$0xff]  ;;  %v1865_v4 = vmul.f32 %v9571_v3, %v9775_v50  ;;  %vm2544_vm0 = vcmp.lt.s32.totalorder %v9792_v57, 16 }
 0x23d   : > { %12280 = vst [vmem:[#allocation120_spill] sm:$0xff] %v9768_v24  ;;  %12281 = vst [vmem:[#allocation121_spill] sm:$0xff] %v9770_v55  ;;  %v1094_v43 = vadd.f32 %v7881_v58, %v9153_v26  ;;  %v1923_v13 = vld [vmem:[#allocation2 + $0xc1] sm:$0xff]  ;;  %v1924_v49 = vld [vmem:[#allocation2 + $0xc9] sm:$0xff] }
 0x23e   : > { %12282 = vst [vmem:[#allocation122_spill] sm:$0xff] %v9775_v50  ;;  %12283 = vst [vmem:[#allocation123_spill] sm:$0xff] %v9778_v32  ;;  %v9824_v22 = vld [vmem:[#allocation2 + $0xaa] sm:$0xff]  ;;  %v1085_v11 = vpop.f32.mrf.mxu1  ;;  %v9838_v50 = vmul.f32 %v9343_v45, %v4009_v59  ;;  %v9851_v59 = vpack.c.bf16 %v1924_v49, %v1923_v13  ;;  %v9892_v13 = vsel %vm1709_vm12, 1.0, %v12200_v19 }
 0x23f   : > { %5399 = vst.msk [vmem:[#allocation2 + $0x90] sm:$0xff] %vm1132_vm2, %v12200_v19  ;;  %12285 = vst [vmem:[#allocation124_spill] sm:$0xff] %v9788_v62  ;;  %v1922_v38 = vld [vmem:[#allocation2 + $0xb9] sm:$0xff]  ;;  %v1130_v62 = vmax.f32 %v1094_v43, 0.0  ;;  %v1086_v55 = vadd.f32 %v9153_v26, %v1085_v11  ;;  %v4011_v58 = vld [vmem:[#allocation2 + $0xb0] sm:$0xff]  ;;  %v9857_v43 = vadd.s32 4294967295, %v1449_v7 }
 0x240   : > { %1194 = vst.msk [vmem:[#allocation2 + $0xd1] sm:$0xff] %vm1132_vm2, %v1124_v10  ;;  %12286 = vst [vmem:[#allocation125_spill] sm:$0xff] %v9797_v25  ;;  %v1921_v10 = vld [vmem:[#allocation2 + $0xb1] sm:$0xff]  ;;  %v9828_v1 = vld [vmem:[#allocation2 + $0xc0] sm:$0xff]  ;;  %v7882_v44 = vpop.f32.mrf.mxu1 }
 0x241   : > { %12287 = vst [vmem:[#allocation126_spill] sm:$0xff] %v9807_v30  ;;  %12288 = vst [vmem:[#allocation127_spill] sm:$0xff] %v9811_v56  ;;  %v9826_v32 = vld [vmem:[#allocation2 + $0xb8] sm:$0xff]  ;;  %v9844_v16 = vpack.c.bf16 %v1922_v38, %v1921_v10  ;;  %v9853_v5 = vld [vmem:[#allocation2 + $0xc8] sm:$0xff]  ;;  %v1442_v38 = vand.u32 15, %v9795_v9  ;;  %v1128_v10 = vmax.f32 %v1086_v55, 0.0  ;;  %v1097_v49 = vadd.f32 %v7882_v44, %v9153_v26 }
 0x242   : > { %12289 = vst [vmem:[#allocation128_spill] sm:$0xff] %v9813_v14  ;;  %5400 = vst.msk [vmem:[#allocation2 + $0x98] sm:$0xff] %vm1132_vm2, %v12200_v19  ;;  %v1886_v61 = vpack.c.bf16 %v9826_v32, %v1865_v4  ;;  %v9847_v30 = vld [vmem:[#allocation2 + $0xba] sm:$0xff]  ;;  %v9860_v11 = vld [vmem:[#allocation2 + $0xb2] sm:$0xff]  ;;  %v1088_v26 = vpop.f32.mrf.mxu1  ;;  %vm1713_vm1 = vcmp.ge.s32.totalorder %v9857_v43, 0  ;;  %v2646_v43 = vmul.f32 %v9166_v40, %v9220_v39  ;;  %v10034_v39 = vmul.f32 %v9177_v27, %v9278_v63 }
 0x243   : > { %5401 = vst.msk [vmem:[#allocation2 + $0xa0] sm:$0xff] %vm1132_vm2, %v12200_v19  ;;  %1197 = vst.msk [vmem:[#allocation2 + $0xe9] sm:$0xff] %vm1132_vm2, %v1127_v15  ;;  %v9835_v15 = vmul.f32 %v9308_v36, %v4007_v54  ;;  %v9849_v54 = vld [vmem:[#allocation2 + $0xb1] sm:$0xff]  ;;  %7912 = vmatmul.mubr.msk.bf16.gmra.mxu0 %vm1132_vm2, %v9844_v16  ;;  %v9872_v7 = vmul.f32 %v9578_v12, %v9847_v30  ;;  %v9876_v9 = vld [vmem:[#allocation2 + $0xb9] sm:$0xff]  ;;  %v1131_v6 = vmax.f32 %v1097_v49, 0.0  ;;  %v9920_v49 = vadd.s32 1, %v1442_v38 }
 0x244   : > { %12290 = vst [vmem:[#allocation129_spill] sm:$0xff] %v9826_v32  ;;  %12291 = vst [vmem:[#allocation130_spill] sm:$0xff] %v9828_v1  ;;  %v9863_v4 = vld [vmem:[#allocation2 + $0xb8] sm:$0xff]  ;;  %7952 = vmatmul.mubr.msk.bf16.gmra.mxu1 %vm1132_vm2, %v1886_v61  ;;  %7915 = vmatprep.mubr.msk.bf16.mxu0 %vm1132_vm2, %v9851_v59  ;;  %v9917_v56 = vld [vmem:[#allocation2 + $0xc2] sm:$0xff] }
 0x245   : > { %12292 = vst [vmem:[#allocation131_spill] sm:$0xff] %v9835_v15  ;;  %12293 = vst [vmem:[#allocation132_spill] sm:$0xff] %v9838_v50  ;;  %v9882_v55 = vld [vmem:[#allocation2 + $0xba] sm:$0xff]  ;;  %v9894_v15 = vld [vmem:[#allocation2 + $0xc2] sm:$0xff]  ;;  %vm2546_vm3 = vcmp.lt.s32.totalorder %v9920_v49, 16  ;;  %v10083_v49 = vmul.f32 %v9163_v37, %v9258_v42 }
 0x246   : > { %5402 = vst.msk [vmem:[#allocation2 + $0xa8] sm:$0xff] %vm1132_vm2, %v12200_v19  ;;  %1195 = vst.msk [vmem:[#allocation2 + $0xd9] sm:$0xff] %vm1132_vm2, %v1125_v8  ;;  %v1867_v8 = vmul.f32 %v9677_v41, %v9828_v1  ;;  %v9878_v1 = vld [vmem:[#allocation2 + $0xc1] sm:$0xff]  ;;  %v9915_v50 = vld [vmem:[#allocation2 + $0xc9] sm:$0xff]  ;;  %v10068_v40 = vsel %vm2546_vm3, 1.0, %v12200_v19 }
 0x247   : > { %12294 = vst [vmem:[#allocation133_spill] sm:$0xff] %v9844_v16  ;;  %12295 = vst [vmem:[#allocation134_spill] sm:$0xff] %v9847_v30  ;;  %v9887_v61 = vld [vmem:[#allocation2 + $0xd0] sm:$0xff]  ;;  %v4013_v16 = vld [vmem:[#allocation2 + $0xc0] sm:$0xff] }
 0x248   : > { %12296 = vst [vmem:[#allocation135_spill] sm:$0xff] %v9849_v54  ;;  %12297 = vst [vmem:[#allocation136_spill] sm:$0xff] %v9851_v59  ;;  %v1887_v44 = vpack.c.bf16 %v9853_v5, %v1867_v8  ;;  %v9896_v25 = vld [vmem:[#allocation2 + $0xca] sm:$0xff]  ;;  %v8594_v8 = vld [vmem:[%s11951_s5] ss:$0 sm:$0xff]  ;;  %v1869_v38 = vmul.f32 %v9892_v13, %v9887_v61 }
 0x249   : > { %12298 = vst [vmem:[#allocation137_spill] sm:$0xff] %v9853_v5  ;;  %12299 = vst [vmem:[#allocation138_spill] sm:$0xff] %v9860_v11  ;;  %v1089_v59 = vadd.f32 %v8594_v8, %v1088_v26  ;;  %v9912_v5 = vsel %vm1711_vm13, 1.0, %v12200_v19  ;;  %v9926_v51 = vmul.f32 %v9699_v31, %v9896_v25  ;;  %v9930_v30 = vld [vmem:[#allocation2 + $0xc8] sm:$0xff]  ;;  %v4015_v11 = vld [vmem:[#allocation2 + $0xd0] sm:$0xff] }
 0x24a   : > { %12300 = vst [vmem:[#allocation139_spill] sm:$0xff] %v9863_v4  ;;  %1200 = vst.msk [vmem:[#allocation2 + $0x101] sm:$0xff] %vm1132_vm2, %v1130_v62  ;;  %v9880_v62 = vld [vmem:[#allocation2 + $0xb2] sm:$0xff]  ;;  %7955 = vmatprep.mubr.msk.bf16.mxu1 %vm1132_vm2, %v1887_v44  ;;  %v1927_v32 = vld [vmem:[#allocation2 + $0xe1] sm:$0xff]  ;;  %v10008_v54 = vmul.f32 %v9571_v3, %v4015_v11 }
 0x24b   : > { %12301 = vst [vmem:[#allocation140_spill] sm:$0xff] %v9872_v7  ;;  %12302 = vst [vmem:[#allocation141_spill] sm:$0xff] %v9876_v9  ;;  %v1129_v44 = vmax.f32 %v1089_v59, 0.0  ;;  %v1928_v26 = vld [vmem:[#allocation2 + $0xe9] sm:$0xff]  ;;  %v9939_v7 = vmul.f32 %v9468_v34, %v4011_v58  ;;  %v9973_v59 = vld [vmem:[#allocation2 + $0xd1] sm:$0xff] }
 0x24c   : > { %12303 = vst [vmem:[#allocation142_spill] sm:$0xff] %v9878_v1  ;;  %12304 = vst [vmem:[#allocation143_spill] sm:$0xff] %v9887_v61  ;;  %v9941_v8 = vld [vmem:[#allocation2 + $0xca] sm:$0xff]  ;;  %v9952_v61 = vmul.f32 %v9487_v33, %v4013_v16  ;;  %v9969_v16 = vsel %vm2542_vm15, 1.0, %v12200_v19  ;;  %v9975_v1 = vpack.c.bf16 %v1928_v26, %v1927_v32  ;;  %v10001_v32 = vsel %vm1713_vm1, 1.0, %v12200_v19 }
 0x24d   : > { %12305 = vst [vmem:[#allocation144_spill] sm:$0xff] %v9896_v25  ;;  %5403 = vst.msk [vmem:[#allocation2 + $0xb0] sm:$0xff] %vm1132_vm2, %v12200_v19  ;;  %v1926_v24 = vld [vmem:[#allocation2 + $0xd9] sm:$0xff]  ;;  %v9962_v45 = vld [vmem:[#allocation2 + $0xe8] sm:$0xff] }
 0x24e   : > { %5404 = vst.msk [vmem:[#allocation2 + $0xb8] sm:$0xff] %vm1132_vm2, %v12200_v19  ;;  %1198 = vst.msk [vmem:[#allocation2 + $0xf1] sm:$0xff] %vm1132_vm2, %v1128_v10  ;;  %v1925_v10 = vld [vmem:[#allocation2 + $0xd1] sm:$0xff]  ;;  %v9945_v25 = vld [vmem:[#allocation2 + $0xe0] sm:$0xff] }
 0x24f   : > { %12306 = vst [vmem:[#allocation145_spill] sm:$0xff] %v9915_v50  ;;  %12307 = vst [vmem:[#allocation146_spill] sm:$0xff] %v9917_v56  ;;  %v9943_v14 = vld [vmem:[#allocation2 + $0xd8] sm:$0xff]  ;;  %v9959_v47 = vpack.c.bf16 %v1926_v24, %v1925_v10  ;;  %v9982_v10 = vsel %vm2544_vm0, 1.0, %v12200_v19  ;;  %v9992_v50 = vld [vmem:[#allocation2 + $0xe9] sm:$0xff] }
 0x250   : > { %12308 = vst [vmem:[#allocation147_spill] sm:$0xff] %v9926_v51  ;;  %12309 = vst [vmem:[#allocation148_spill] sm:$0xff] %v9930_v30  ;;  %v1888_v34 = vpack.c.bf16 %v9943_v14, %v1869_v38  ;;  %v9971_v58 = vld [vmem:[#allocation2 + $0xda] sm:$0xff]  ;;  %v9977_v24 = vld [vmem:[#allocation2 + $0xd2] sm:$0xff]  ;;  %v10039_v30 = vsel %vm2522_vm14, 1.0, %v12200_v19 }
 0x251   : > { %5405 = vst.msk [vmem:[#allocation2 + $0xc0] sm:$0xff] %vm1132_vm2, %v12200_v19  ;;  %1201 = vst.msk [vmem:[#allocation2 + $0x109] sm:$0xff] %vm1132_vm2, %v1131_v6  ;;  %v1871_v6 = vmul.f32 %v9912_v5, %v9945_v25  ;;  %v9990_v38 = vld [vmem:[#allocation2 + $0xd9] sm:$0xff]  ;;  %7916 = vmatmul.mubr.msk.bf16.gmra.mxu0 %vm1132_vm2, %v9959_v47  ;;  %v12338_v63 = vld [vmem:[#allocation38_spill] sm:$0xff] }
 0x252   : > { %12310 = vst [vmem:[#allocation149_spill] sm:$0xff] %v9939_v7  ;;  %12311 = vst [vmem:[#allocation150_spill] sm:$0xff] %v9952_v61  ;;  %7956 = vmatmul.mubr.msk.bf16.gmra.mxu1 %vm1132_vm2, %v1888_v34  ;;  %v10005_v60 = vld [vmem:[#allocation2 + $0xd8] sm:$0xff]  ;;  %v4017_v9 = vld [vmem:[#allocation2 + $0xe0] sm:$0xff]  ;;  %7919 = vmatprep.mubr.msk.bf16.mxu0 %vm1132_vm2, %v9975_v1 }
 0x253   : > { %5406 = vst.msk [vmem:[#allocation2 + $0xc8] sm:$0xff] %vm1132_vm2, %v12200_v19  ;;  %1199 = vst.msk [vmem:[#allocation2 + $0xf9] sm:$0xff] %vm1132_vm2, %v1129_v44  ;;  %v9986_v44 = vmul.f32 %v9969_v16, %v9971_v58  ;;  %v1889_v57 = vpack.c.bf16 %v9962_v45, %v1871_v6  ;;  %v10010_v7 = vld [vmem:[#allocation2 + $0xe1] sm:$0xff]  ;;  %v10012_v4 = vld [vmem:[#allocation2 + $0xd2] sm:$0xff]  ;;  %v10056_v52 = vmul.f32 %v9677_v41, %v4017_v9 }
 0x254   : > { %12312 = vst [vmem:[#allocation151_spill] sm:$0xff] %v9959_v47  ;;  %12313 = vst [vmem:[#allocation152_spill] sm:$0xff] %v9973_v59  ;;  %v10020_v6 = vld [vmem:[#allocation2 + $0xe2] sm:$0xff]  ;;  %v12367_v56 = vld [vmem:[#allocation28_spill] sm:$0xff] }
 0x255   : > { %12314 = vst [vmem:[#allocation153_spill] sm:$0xff] %v9975_v1  ;;  %12315 = vst [vmem:[#allocation154_spill] sm:$0xff] %v9986_v44  ;;  %v10016_v34 = vld [vmem:[#allocation2 + $0xf0] sm:$0xff]  ;;  %7959 = vmatprep.mubr.msk.bf16.mxu1 %vm1132_vm2, %v1889_v57  ;;  %v10045_v1 = vld [vmem:[#allocation2 + $0x101] sm:$0xff] }
 0x256   : > { %12316 = vst [vmem:[#allocation155_spill] sm:$0xff] %v9990_v38  ;;  %12317 = vst [vmem:[#allocation156_spill] sm:$0xff] %v9992_v50  ;;  %v10022_v26 = vld [vmem:[#allocation2 + $0xea] sm:$0xff]  ;;  %v2998_v50 = vmul.f32 %v9083_v29, %v9212_v21  ;;  %v2650_v29 = vmul.f32 %v10039_v30, %v9347_v2 }
 0x257   : > { %12318 = vst [vmem:[#allocation157_spill] sm:$0xff] %v10001_v32  ;;  %12319 = vst [vmem:[#allocation158_spill] sm:$0xff] %v10005_v60  ;;  %v10043_v11 = vmul.f32 %v9982_v10, %v10022_v26  ;;  %v10047_v61 = vld [vmem:[#allocation2 + $0xe8] sm:$0xff]  ;;  %v4019_v59 = vld [vmem:[#allocation2 + $0xf0] sm:$0xff] }
 0x258   : > { %12320 = vst [vmem:[#allocation159_spill] sm:$0xff] %v10008_v54  ;;  %12321 = vst [vmem:[#allocation160_spill] sm:$0xff] %v10010_v7  ;;  %v1929_v38 = vld [vmem:[#allocation2 + $0xf1] sm:$0xff]  ;;  %v10049_v57 = vld [vmem:[#allocation2 + $0x108] sm:$0xff]  ;;  %v10061_v27 = vmul.f32 %v9892_v13, %v4019_v59  ;;  %v2677_v59 = vpack.c.bf16 %v2646_v43, %v9092_v53 }
 0x259   : > { %12322 = vst [vmem:[#allocation161_spill] sm:$0xff] %v10012_v4  ;;  %12323 = vst [vmem:[#allocation162_spill] sm:$0xff] %v10020_v6  ;;  %v10051_v44 = vld [vmem:[#allocation2 + $0x109] sm:$0xff]  ;;  %v4690_v60 = vld [vmem:[#allocation2 + $0xda] sm:$0xff] }
 0x25a   : > { %5407 = vst.msk [vmem:[#allocation2 + $0xd0] sm:$0xff] %vm1132_vm2, %v12200_v19  ;;  %12324 = vst [vmem:[#allocation163_spill] sm:$0xff] %v10039_v30  ;;  %v10072_v54 = vld [vmem:[#allocation2 + $0x102] sm:$0xff]  ;;  %v10074_v9 = vld [vmem:[#allocation2 + $0x10a] sm:$0xff] }
 0x25b   : > { %12325 = vst [vmem:[#allocation164_spill] sm:$0xff] %v10043_v11  ;;  %12326 = vst [vmem:[#allocation165_spill] sm:$0xff] %v10045_v1  ;;  %v1873_v1 = vmul.f32 %v10001_v32, %v10016_v34  ;;  %v1930_v51 = vld [vmem:[#allocation2 + $0xf9] sm:$0xff]  ;;  %v12335_v43 = vld [vmem:[#allocation70_spill] sm:$0xff] }
 0x25c   : > { %12327 = vst [vmem:[#allocation166_spill] sm:$0xff] %v10047_v61  ;;  %12328 = vst [vmem:[#allocation167_spill] sm:$0xff] %v10051_v44  ;;  %v10076_v7 = vld [vmem:[#allocation2 + $0xf8] sm:$0xff]  ;;  %v10093_v11 = vpack.c.bf16 %v1930_v51, %v1929_v38  ;;  %v2996_v21 = vld [vmem:[#allocation2 + $0x100] sm:$0xff]  ;;  %v10104_v47 = vmul.f32 %v10039_v30, %v12335_v43  ;;  %v2678_v51 = vpack.c.bf16 %v10034_v39, %v12338_v63 }
 0x25d   : > { %12329 = vst [vmem:[#allocation168_spill] sm:$0xff] %v10056_v52  ;;  %12330 = vst [vmem:[#allocation169_spill] sm:$0xff] %v10061_v27  ;;  %v10087_v44 = vld [vmem:[#allocation2 + $0xf1] sm:$0xff]  ;;  %v1890_v53 = vpack.c.bf16 %v10076_v7, %v1873_v1  ;;  %v10098_v37 = vld [vmem:[#allocation2 + $0xfa] sm:$0xff]  ;;  %v10110_v38 = vmul.f32 %v10001_v32, %v2996_v21  ;;  %v10130_v43 = vmul.f32 %v9912_v5, %v2996_v21 }
 0x25e   : > { %12331 = vst [vmem:[#allocation170_spill] sm:$0xff] %v10076_v7  ;;  %12332 = vst [vmem:[#allocation171_spill] sm:$0xff] %v10087_v44  ;;  %v10100_v42 = vld [vmem:[#allocation2 + $0xf8] sm:$0xff]  ;;  %v10114_v1 = vmul.f32 %v10068_v40, %v10098_v37  ;;  %v10118_v7 = vld [vmem:[#allocation2 + $0xe2] sm:$0xff]  ;;  %7920 = vmatmul.mubr.msk.bf16.gmra.mxu0 %vm1132_vm2, %v10093_v11 }
 0x25f   : > { %5408 = vst.msk [vmem:[#allocation2 + $0xd8] sm:$0xff] %vm1132_vm2, %v12200_v19  ;;  %5414 = vst.msk [vmem:[#allocation2 + $0x108] sm:$0xff] %vm1132_vm2, %v12200_v19  ;;  %v12337_v52 = vld [vmem:[#allocation36_spill] sm:$0xff]  ;;  %v4692_v6 = vld [vmem:[#allocation2 + $0xea] sm:$0xff]  ;;  %7960 = vmatmul.mubr.msk.bf16.gmra.mxu1 %vm1132_vm2, %v1890_v53  ;;  %7971 = vmatprep.mubr.msk.bf16.mxu0 %vm1132_vm2, %v2677_v59 }
 0x260   : > { %12333 = vst [vmem:[#allocation172_spill] sm:$0xff] %v10093_v11  ;;  %12334 = vst [vmem:[#allocation173_spill] sm:$0xff] %v10100_v42  ;;  %v3030_v61 = vpack.c.bf16 %v12337_v52, %v2998_v50  ;;  %v10116_v2 = vld [vmem:[#allocation2 + $0xf9] sm:$0xff]  ;;  %v12345_v53 = vld [vmem:[#allocation43_spill] sm:$0xff]  ;;  %v10206_v11 = vmul.f32 %v9699_v31, %v4690_v60  ;;  %v10223_v60 = vmul.f32 %v10068_v40, %v10074_v9 }
 0x261   : > { %12336 = vst [vmem:[#allocation70_spill] sm:$0xff] %v10104_v47  ;;  %12339 = vst [vmem:[#allocation36_spill] sm:$0xff] %v10110_v38  ;;  %v10123_v50 = vld [vmem:[#allocation2 + $0xf2] sm:$0xff]  ;;  %v3031_v39 = vpack.c.bf16 %v12345_v53, %v10083_v49  ;;  %v4694_v32 = vld [vmem:[#allocation2 + $0xfa] sm:$0xff] }
 0x262   : > { %12340 = vst [vmem:[#allocation38_spill] sm:$0xff] %v10114_v1  ;;  %12341 = vst [vmem:[#allocation174_spill] sm:$0xff] %v10116_v2  ;;  %v10136_v47 = vld [vmem:[#allocation2 + $0xf2] sm:$0xff]  ;;  %8011 = vmatprep.mubr.msk.bf16.mxu1 %vm1132_vm2, %v3030_v61  ;;  %v12346_v44 = vld [vmem:[#allocation41_spill] sm:$0xff]  ;;  %v10181_v1 = vmul.f32 %v9475_v20, %v9824_v22  ;;  %v10219_v38 = vmul.f32 %v9982_v10, %v4694_v32 }
 0x263   : > { %12342 = vst [vmem:[#allocation175_spill] sm:$0xff] %v10118_v7  ;;  %12343 = vst [vmem:[#allocation176_spill] sm:$0xff] %v10130_v43  ;;  %v2679_v2 = vpack.c.bf16 %v2650_v29, %v12346_v44  ;;  %v12347_v27 = vld [vmem:[#allocation44_spill] sm:$0xff]  ;;  %v12348_v49 = vld [vmem:[#allocation30_spill] sm:$0xff] }
 0x264   : > { %5409 = vst.msk [vmem:[#allocation2 + $0xe0] sm:$0xff] %vm1132_vm2, %v12200_v19  ;;  %5410 = vst.msk [vmem:[#allocation2 + $0xe8] sm:$0xff] %vm1132_vm2, %v12200_v19  ;;  %v3002_v59 = vmul.f32 %v9171_v46, %v12347_v27  ;;  %v10155_v53 = vmul.f32 %v12348_v49, %v9562_v35  ;;  %v12350_v21 = vld [vmem:[#allocation88_spill] sm:$0xff]  ;;  %v12352_v29 = vld [vmem:[#allocation34_spill] sm:$0xff]  ;;  %v10171_v27 = vmul.f32 %v9326_v28, %v9703_v17 }
 0x265   : > { %12344 = vst [vmem:[#allocation177_spill] sm:$0xff] %v10136_v47  ;;  %5411 = vst.msk [vmem:[#allocation2 + $0xf0] sm:$0xff] %vm1132_vm2, %v12200_v19  ;;  %v12351_v52 = vld [vmem:[#allocation32_spill] sm:$0xff]  ;;  %v10167_v46 = vmul.f32 %v12352_v29, %v9668_v48  ;;  %v10175_v35 = vmul.f32 %v9430_v18, %v9799_v23  ;;  %v10189_v48 = vmul.f32 %v9578_v12, %v9941_v8  ;;  %v12356_v23 = vld [vmem:[#allocation103_spill] sm:$0xff] }
 0x266   : > { %12349 = vst [vmem:[#allocation43_spill] sm:$0xff] %v10155_v53  ;;  %5412 = vst.msk [vmem:[#allocation2 + $0xf8] sm:$0xff] %vm1132_vm2, %v12200_v19  ;;  %v10163_v42 = vmul.f32 %v12351_v52, %v12350_v21  ;;  %v10185_v21 = vmul.f32 %v9543_v0, %v9882_v55  ;;  %v12357_v30 = vld [vmem:[#allocation100_spill] sm:$0xff]  ;;  %v12358_v61 = vld [vmem:[#allocation121_spill] sm:$0xff]  ;;  %v10216_v55 = vmul.f32 %v9969_v16, %v4692_v6  ;;  %7972 = vmatmul.mubr.msk.bf16.vlgmr.msra.gmra.mxu0 %vm1132_vm2, %v2678_v51 }
 0x267   : > { %5413 = vst.msk [vmem:[#allocation2 + $0x100] sm:$0xff] %vm1132_vm2, %v12200_v19  ;;  %12354 = vst [vmem:[#allocation44_spill] sm:$0xff] %v10189_v48  ;;  %v12359_v53 = vld [vmem:[#allocation124_spill] sm:$0xff]  ;;  %v12361_v17 = vld [vmem:[#allocation51_spill] sm:$0xff]  ;;  %8012 = vmatmul.mubr.msk.bf16.vlgmr.msra.gmra.mxu1 %vm1132_vm2, %v3031_v39  ;;  %7975 = vmatprep.mubr.msk.bf16.mxu0 %vm1132_vm2, %v2679_v2 }
 0x268   : > { %12360 = vst [vmem:[#allocation30_spill] sm:$0xff] %v10206_v11  ;;  %v3032_v44 = vpack.c.bf16 %v12361_v17, %v3002_v59  ;;  %v8514_v43 = vld [vmem:[%s11952_s6 + $0x90] sm:$0xff]   ;;  %12362 = vst [vmem:[#allocation88_spill] sm:$0xff] %v10216_v55  ;;  %v12365_v8 = vld [vmem:[#allocation58_spill] sm:$0xff] }
 0x269   : > { %v8516_v22 = vld [vmem:[%s11952_s6 + $0xb0] sm:$0xff]   ;;  %12363 = vst [vmem:[#allocation32_spill] sm:$0xff] %v10219_v38  ;;  %12364 = vst [vmem:[#allocation34_spill] sm:$0xff] %v10223_v60  ;;  %v2652_v51 = vmul.f32 %v12348_v49, %v12365_v8  ;;  %v12366_v39 = vld [vmem:[#allocation52_spill] sm:$0xff] }
 0x26a   : > { %8015 = vmatprep.mubr.msk.bf16.mxu1 %vm1132_vm2, %v3032_v44  ;;  %v3004_v48 = vmul.f32 %v12367_v56, %v12366_v39  ;;  %v12368_v59 = vld [vmem:[#allocation65_spill] sm:$0xff]  ;;  %v12369_v2 = vld [vmem:[#allocation71_spill] sm:$0xff]  ;;  %v12370_v44 = vld [vmem:[#allocation64_spill] sm:$0xff] }
 0x26b   : > { %8044 = vmatpush3.bf16.msra.mxu0 %v12368_v59  ;;  %8084 = vmatpush3.bf16.msra.mxu1 %v12369_v2  ;;  %v2654_v4 = vmul.f32 %v12351_v52, %v12370_v44  ;;  %v8517_v32 = vld [vmem:[%s11952_s6 + $0x88] sm:$0xff]   ;;  %v12371_v17 = vld [vmem:[#allocation63_spill] sm:$0xff]  ;;  %v12372_v6 = vld [vmem:[#allocation29_spill] sm:$0xff] }
 0x26c   : > { %8045 = vmatprep.subr.bf16.mxu0 %v8514_v43  ;;  %8085 = vmatprep.subr.bf16.mxu1 %v8516_v22  ;;  %v8518_v49 = vld [vmem:[%s11952_s6 + $0xa8] sm:$0xff]   ;;  %v3006_v56 = vmul.f32 %v12372_v6, %v12371_v17  ;;  %v12373_v39 = vld [vmem:[#allocation59_spill] sm:$0xff]  ;;  %v12374_v60 = vld [vmem:[#allocation53_spill] sm:$0xff] }
 0x26d   : > { %v2680_v59 = vpack.c.bf16 %v2652_v51, %v12373_v39  ;;  %v3033_v2 = vpack.c.bf16 %v12374_v60, %v3004_v48  ;;  %v12375_v52 = vld [vmem:[#allocation54_spill] sm:$0xff]  ;;  %v12376_v47 = vld [vmem:[#allocation73_spill] sm:$0xff]  ;;  %v12379_v48 = vld [vmem:[#allocation31_spill] sm:$0xff] }
 0x26e   : > { %v2681_v44 = vpack.c.bf16 %v2654_v4, %v12375_v52  ;;  %v3034_v38 = vpack.c.bf16 %v12376_v47, %v3006_v56  ;;  %v8519_v7 = vld [vmem:[%s11952_s6 + $0x80] sm:$0xff]   ;;  %v10276_v51 = vld [vmem:[%s11952_s6 + $0xd8] sm:$0xff]  }
 0x26f   : > { %8046 = vmatpush3.bf16.msra.mxu0 %v8514_v43  ;;  %8086 = vmatpush3.bf16.msra.mxu1 %v8516_v22  ;;  %v8520_v6 = vld [vmem:[%s11952_s6 + $0xa0] sm:$0xff]   ;;  %v12378_v43 = vld [vmem:[#allocation74_spill] sm:$0xff]  ;;  %v12395_v11 = vld [vmem:[#allocation108_spill] sm:$0xff] }
 0x270   : > { %8047 = vmatprep.subr.bf16.mxu0 %v8517_v32  ;;  %8087 = vmatprep.subr.bf16.mxu1 %v8518_v49  ;;  %v12377_v4 = vld [vmem:[#allocation77_spill] sm:$0xff]  ;;  %v3008_v22 = vmul.f32 %v12379_v48, %v12378_v43  ;;  %v12386_v43 = vld [vmem:[#allocation90_spill] sm:$0xff] }
 0x271   : > { %7976 = vmatmul.mubr.msk.bf16.gmra.mxu0 %vm1132_vm2, %v2680_v59  ;;  %8016 = vmatmul.mubr.msk.bf16.gmra.mxu1 %vm1132_vm2, %v3033_v2  ;;  %v2656_v47 = vmul.f32 %v12352_v29, %v12377_v4  ;;  %v12380_v60 = vld [vmem:[#allocation85_spill] sm:$0xff]  ;;  %v12381_v29 = vld [vmem:[#allocation84_spill] sm:$0xff] }
 0x272   : > { %7979 = vmatprep.mubr.msk.bf16.mxu0 %vm1132_vm2, %v2681_v44  ;;  %8019 = vmatprep.mubr.msk.bf16.mxu1 %vm1132_vm2, %v3034_v38  ;;  %v2658_v17 = vmul.f32 %v9326_v28, %v12380_v60  ;;  %v10281_v38 = vld [vmem:[%s11952_s6 + $0xf8] sm:$0xff]   ;;  %v12382_v56 = vld [vmem:[#allocation33_spill] sm:$0xff]  ;;  %v12385_v28 = vld [vmem:[#allocation78_spill] sm:$0xff] }
 0x273   : > { %8048 = vmatpush3.bf16.msra.mxu0 %v8517_v32  ;;  %8088 = vmatpush3.bf16.msra.mxu1 %v8518_v49  ;;  %v3010_v59 = vmul.f32 %v12382_v56, %v12381_v29  ;;  %v12383_v32 = vld [vmem:[#allocation79_spill] sm:$0xff]  ;;  %v12384_v2 = vld [vmem:[#allocation76_spill] sm:$0xff]  ;;  %v12389_v60 = vld [vmem:[#allocation105_spill] sm:$0xff] }
 0x274   : > { %8049 = vmatprep.subr.bf16.mxu0 %v8519_v7  ;;  %8089 = vmatprep.subr.bf16.mxu1 %v8520_v6  ;;  %v2682_v49 = vpack.c.bf16 %v2656_v47, %v12383_v32  ;;  %v3035_v44 = vpack.c.bf16 %v12384_v2, %v3008_v22  ;;  %v2683_v4 = vpack.c.bf16 %v2658_v17, %v12385_v28  ;;  %v12387_v47 = vld [vmem:[#allocation96_spill] sm:$0xff]  ;;  %v12391_v56 = vld [vmem:[#allocation47_spill] sm:$0xff]  ;;  %v12392_v2 = vld [vmem:[#allocation98_spill] sm:$0xff] }
 0x275   : > { %v3036_v48 = vpack.c.bf16 %v12386_v43, %v3010_v59  ;;  %v2662_v17 = vmul.f32 %v9475_v20, %v12389_v60  ;;  %v12390_v29 = vld [vmem:[#allocation104_spill] sm:$0xff]  ;;  %v12393_v43 = vld [vmem:[#allocation95_spill] sm:$0xff]  ;;  %v12394_v55 = vld [vmem:[#allocation97_spill] sm:$0xff] }
 0x276   : > { %v3014_v59 = vmul.f32 %v12391_v56, %v12390_v29  ;;  %v12397_v20 = vld [vmem:[#allocation109_spill] sm:$0xff]  ;;  %v12400_v60 = vld [vmem:[#allocation122_spill] sm:$0xff]  ;;  %v12402_v56 = vld [vmem:[#allocation115_spill] sm:$0xff] }
 0x277   : > { %8050 = vmatpush3.bf16.msra.mxu0 %v8519_v7  ;;  %8090 = vmatpush3.bf16.msra.mxu1 %v8520_v6  ;;  %v2660_v7 = vmul.f32 %v9430_v18, %v12387_v47  ;;  %v12388_v6 = vld [vmem:[#allocation91_spill] sm:$0xff] }
 0x278   : > { %8123 = vmatprep.subr.bf16.mxu0 %v10276_v51  ;;  %8163 = vmatprep.subr.bf16.mxu1 %v10281_v38  ;;  %v3012_v22 = vmul.f32 %v9308_v36, %v12388_v6  ;;  %v12396_v36 = vld [vmem:[#allocation113_spill] sm:$0xff]  ;;  %v12398_v47 = vld [vmem:[#allocation67_spill] sm:$0xff] }
 0x279   : > { %7980 = vmatmul.mubr.msk.bf16.gmra.mxu0 %vm1132_vm2, %v2682_v49  ;;  %8020 = vmatmul.mubr.msk.bf16.gmra.mxu1 %vm1132_vm2, %v3035_v44  ;;  %v2684_v49 = vpack.c.bf16 %v2660_v7, %v12392_v2  ;;  %v2664_v18 = vmul.f32 %v9543_v0, %v12396_v36  ;;  %v3016_v7 = vmul.f32 %v12398_v47, %v12397_v20  ;;  %v12399_v6 = vld [vmem:[#allocation123_spill] sm:$0xff]  ;;  %v12405_v0 = vld [vmem:[#allocation134_spill] sm:$0xff]  ;;  %v12408_v20 = vld [vmem:[#allocation144_spill] sm:$0xff] }
 0x27a   : > { %7983 = vmatprep.mubr.msk.bf16.mxu0 %vm1132_vm2, %v2683_v4  ;;  %8023 = vmatprep.mubr.msk.bf16.mxu1 %vm1132_vm2, %v3036_v48  ;;  %v3037_v44 = vpack.c.bf16 %v12393_v43, %v3012_v22  ;;  %v2685_v4 = vpack.c.bf16 %v2662_v17, %v12394_v55  ;;  %v3038_v48 = vpack.c.bf16 %v12395_v11, %v3014_v59  ;;  %v12401_v17 = vld [vmem:[#allocation116_spill] sm:$0xff]  ;;  %v12407_v36 = vld [vmem:[#allocation10_spill] sm:$0xff] }
 0x27b   : > { %v2666_v22 = vmul.f32 %v9578_v12, %v12399_v6  ;;  %v3018_v11 = vmul.f32 %v9487_v33, %v12400_v60  ;;  %v2686_v29 = vpack.c.bf16 %v2664_v18, %v12401_v17  ;;  %v3039_v59 = vpack.c.bf16 %v12402_v56, %v3016_v7  ;;  %v12406_v33 = vld [vmem:[#allocation130_spill] sm:$0xff]  ;;  %v12409_v7 = vld [vmem:[#allocation143_spill] sm:$0xff] }
 0x27c   : > { %v2668_v12 = vmul.f32 %v9699_v31, %v12405_v0  ;;  %v1234_v18 = vadd.s32 248, %v12407_v36  ;;  %v2670_v47 = vmul.f32 %v9969_v16, %v12408_v20  ;;  %v3022_v6 = vmul.f32 %v9677_v41, %v12409_v7  ;;  %v12412_v0 = vld [vmem:[#allocation162_spill] sm:$0xff]  ;;  %v12418_v20 = vld [vmem:[#allocation36_spill] sm:$0xff]  ;;  %v12421_v7 = vld [vmem:[#allocation27_spill] sm:$0xff] }
 0x27d   : > { %v3024_v41 = vmul.f32 %v9892_v13, %v9945_v25  ;;  %v12415_v25 = vld [vmem:[#allocation26_spill] sm:$0xff] }
 0x27e   : > { %v1456_v56 = vand.u32 15, %v1234_v18  ;;  %v3042_v31 = vpack.c.bf16 %v9943_v14, %v3022_v6  ;;  %v3026_v14 = vmul.f32 %v9912_v5, %v10016_v34  ;;  %v12534_v36 = vld [vmem:[#allocation42_spill] sm:$0xff] }
 0x280   : > { %v2484_v16 = vadd.s32 1, %v1456_v56  ;;  %v12424_v56 = vld [vmem:[#allocation45_spill] sm:$0xff] }
 0x281   : > { %7984 = vmatmul.mubr.msk.bf16.gmra.mxu0 %vm1132_vm2, %v2684_v49  ;;  %8024 = vmatmul.mubr.msk.bf16.gmra.mxu1 %vm1132_vm2, %v3037_v44  ;;  %v12403_v49 = vld [vmem:[#allocation117_spill] sm:$0xff] }
 0x282   : > { %7987 = vmatprep.mubr.msk.bf16.mxu0 %vm1132_vm2, %v2685_v4  ;;  %8027 = vmatprep.mubr.msk.bf16.mxu1 %vm1132_vm2, %v3038_v48  ;;  %v2687_v43 = vpack.c.bf16 %v2666_v22, %v12403_v49  ;;  %v12404_v44 = vld [vmem:[#allocation129_spill] sm:$0xff]  ;;  %v3020_v48 = vmul.f32 %v9571_v3, %v12406_v33  ;;  %v12410_v22 = vld [vmem:[#allocation138_spill] sm:$0xff]  ;;  %v2672_v3 = vmul.f32 %v9982_v10, %v9971_v58  ;;  %vm2548_vm4 = vcmp.lt.s32.totalorder %v2484_v16, 16  ;;  %v12416_v10 = vld [vmem:[#allocation35_spill] sm:$0xff] }
 0x283   : > { %v3040_v4 = vpack.c.bf16 %v12404_v44, %v3018_v11  ;;  %v2688_v60 = vpack.c.bf16 %v2668_v12, %v12410_v22  ;;  %v12411_v11 = vld [vmem:[#allocation137_spill] sm:$0xff]  ;;  %v12413_v33 = vld [vmem:[#allocation170_spill] sm:$0xff] }
 0x284   : > { %v2690_v44 = vpack.c.bf16 %v2672_v3, %v9977_v24  ;;  %v12426_v3 = vld [vmem:[#allocation55_spill] sm:$0xff] }
 0x289   : > { %7988 = vmatmul.mubr.msk.bf16.gmra.mxu0 %vm1132_vm2, %v2686_v29  ;;  %8028 = vmatmul.mubr.msk.bf16.gmra.mxu1 %vm1132_vm2, %v3039_v59  ;;  %v3041_v29 = vpack.c.bf16 %v12411_v11, %v3020_v48  ;;  %v2689_v59 = vpack.c.bf16 %v2670_v47, %v9894_v15  ;;  %v3044_v48 = vpack.c.bf16 %v12413_v33, %v3026_v14  ;;  %v8522_v14 = vld [vmem:[%s11952_s6 + $0xd0] sm:$0xff]   ;;  %v12429_v33 = vld [vmem:[#allocation68_spill] sm:$0xff] }
 0x28a   : > { %7991 = vmatprep.mubr.msk.bf16.mxu0 %vm1132_vm2, %v2687_v43  ;;  %8031 = vmatprep.mubr.msk.bf16.mxu1 %vm1132_vm2, %v3040_v4  ;;  %v2674_v43 = vmul.f32 %v10068_v40, %v10022_v26  ;;  %v3043_v4 = vpack.c.bf16 %v9962_v45, %v3024_v41  ;;  %v10361_v40 = vsel %vm2548_vm4, 1.0, %v12200_v19  ;;  %v12414_v45 = vld [vmem:[#allocation39_spill] sm:$0xff]  ;;  %v12417_v26 = vld [vmem:[#allocation40_spill] sm:$0xff]  ;;  %v12419_v47 = vpack.c.bf16 %v10049_v57, %v12418_v20  ;;  %v12438_v20 = vld [vmem:[#allocation102_spill] sm:$0xff] }
 0x28b   : > { %v2676_v5 = vmul.f32 %v10361_v40, %v10098_v37  ;;  %v3673_v13 = vmul.f32 %v12415_v25, %v12414_v45  ;;  %v3351_v34 = vpack.c.bf16 %v12417_v26, %v12416_v10  ;;  %v12420_v37 = vld [vmem:[#allocation48_spill] sm:$0xff]  ;;  %v12434_v26 = vld [vmem:[#allocation75_spill] sm:$0xff] }
 0x28c   : > { %v2691_v12 = vpack.c.bf16 %v2674_v43, %v12412_v0  ;;  %v3675_v6 = vmul.f32 %v12421_v7, %v12420_v37  ;;  %v12427_v41 = vld [vmem:[#allocation60_spill] sm:$0xff] }
 0x28d   : > { %v2692_v58 = vpack.c.bf16 %v2676_v5, %v10123_v50  ;;  %v3704_v18 = vpack.c.bf16 %v3673_v13, %v12338_v63  ;;  %v10387_v16 = vpack.c.bf16 %v12427_v41, %v12426_v3  ;;  %v12430_v5 = vld [vmem:[#allocation72_spill] sm:$0xff]  ;;  %v12431_v13 = vld [vmem:[#allocation82_spill] sm:$0xff] }
 0x28e   : > { %v3707_v45 = vpack.c.bf16 %v12430_v5, %v12375_v52  ;;  %v12432_v52 = vld [vmem:[#allocation86_spill] sm:$0xff]  ;;  %v8529_v10 = vld [vmem:[%s11952_s6 + $0x118] sm:$0xff]   ;;  %v12464_v5 = vld [vmem:[#allocation165_spill] sm:$0xff] }
 0x28f   : > { %v12440_v37 = vld [vmem:[#allocation92_spill] sm:$0xff] }
 0x290   : > { %v12452_v41 = vld [vmem:[#allocation136_spill] sm:$0xff] }
 0x291   : > { %7992 = vmatmul.mubr.msk.bf16.gmra.mxu0 %vm1132_vm2, %v2688_v60  ;;  %8032 = vmatmul.mubr.msk.bf16.gmra.mxu1 %vm1132_vm2, %v3041_v29  ;;  %v12422_v60 = vld [vmem:[#allocation163_spill] sm:$0xff]  ;;  %v12423_v29 = vld [vmem:[#allocation37_spill] sm:$0xff] }
 0x292   : > { %7995 = vmatprep.mubr.msk.bf16.mxu0 %vm1132_vm2, %v2689_v59  ;;  %8035 = vmatprep.mubr.msk.bf16.mxu1 %vm1132_vm2, %v3042_v31  ;;  %v3677_v11 = vmul.f32 %v12422_v60, %v12365_v8  ;;  %v3352_v63 = vpack.c.bf16 %v12424_v56, %v12423_v29  ;;  %v12425_v59 = vld [vmem:[#allocation41_spill] sm:$0xff]  ;;  %v12446_v56 = vld [vmem:[#allocation114_spill] sm:$0xff] }
 0x293   : > { %v3705_v31 = vpack.c.bf16 %v3675_v6, %v12425_v59  ;;  %v12441_v6 = vld [vmem:[#allocation107_spill] sm:$0xff] }
 0x294   : > { %v3706_v43 = vpack.c.bf16 %v3677_v11, %v12373_v39  ;;  %v8525_v39 = vld [vmem:[%s11952_s6 + $0xc8] sm:$0xff]   ;;  %v12442_v60 = vpack.c.bf16 %v12441_v6, %v12394_v55  ;;  %v12450_v55 = vld [vmem:[#allocation140_spill] sm:$0xff] }
 0x295   : > { %v12443_v11 = vld [vmem:[#allocation118_spill] sm:$0xff]  ;;  %v12451_v3 = vpack.c.bf16 %v12450_v55, %v12410_v22  ;;  %v12459_v22 = vld [vmem:[#allocation164_spill] sm:$0xff]  ;;  %v12473_v55 = vld [vmem:[#allocation93_spill] sm:$0xff] }
 0x299   : > { %7996 = vmatmul.mubr.msk.bf16.gmra.mxu0 %vm1132_vm2, %v2690_v44  ;;  %8036 = vmatmul.mubr.msk.bf16.gmra.mxu1 %vm1132_vm2, %v3043_v4  ;;  %v8524_v44 = vld [vmem:[%s11952_s6 + $0xf0] sm:$0xff]   ;;  %v8526_v4 = vld [vmem:[%s11952_s6 + $0xe8] sm:$0xff]  }
 0x29a   : > { %7999 = vmatprep.mubr.msk.bf16.mxu0 %vm1132_vm2, %v2691_v12  ;;  %8039 = vmatprep.mubr.msk.bf16.mxu1 %vm1132_vm2, %v3044_v48  ;;  %v12428_v12 = vld [vmem:[#allocation56_spill] sm:$0xff] }
 0x29b   : > { %v10411_v48 = vpack.c.bf16 %v12429_v33, %v12428_v12  ;;  %v12461_v12 = vld [vmem:[#allocation172_spill] sm:$0xff] }
 0x2a1   : > { %8000 = vmatmul.mubr.msk.bf16.gmra.mxu0 %vm1132_vm2, %v2692_v58  ;;  %8040 = vmatmul.mubr.msk.bf16.gmra.mxu1 %vm1132_vm2, %v12419_v47  ;;  %v12433_v58 = vpack.c.bf16 %v12432_v52, %v12383_v32  ;;  %v12437_v32 = vld [vmem:[#allocation101_spill] sm:$0xff]  ;;  %v12439_v47 = vpack.c.bf16 %v12438_v20, %v12392_v2  ;;  %v12447_v2 = vld [vmem:[#allocation126_spill] sm:$0xff]  ;;  %v10516_v20 = vld [vmem:[#allocation2 + $0x112] sm:$0xff] }
 0x2a2   : > { %8051 = vmatprep.mubr.msk.bf16.mxu0 %vm1132_vm2, %v3351_v34  ;;  %8091 = vmatprep.mubr.msk.bf16.mxu1 %vm1132_vm2, %v3704_v18  ;;  %v12435_v34 = vld [vmem:[#allocation89_spill] sm:$0xff]  ;;  %v12448_v59 = vpack.c.bf16 %v12447_v2, %v12403_v49  ;;  %v12456_v49 = vld [vmem:[#allocation154_spill] sm:$0xff] }
 0x2a3   : > { %v12436_v18 = vpack.c.bf16 %v12435_v34, %v12385_v28  ;;  %v12444_v28 = vld [vmem:[#allocation119_spill] sm:$0xff]  ;;  %v12467_v52 = vld [vmem:[#allocation66_spill] sm:$0xff] }
 0x2a4   : > { %v12445_v29 = vpack.c.bf16 %v12444_v28, %v12401_v17  ;;  %v12453_v17 = vld [vmem:[#allocation147_spill] sm:$0xff] }
 0x2a5   : > { %v10512_v34 = vld [vmem:[#allocation2 + $0x111] sm:$0xff] }
 0x2a9   : > { %8052 = vmatmul.mubr.msk.bf16.vlgmr.msra.gmra.mxu0 %vm1132_vm2, %v3352_v63  ;;  %8092 = vmatmul.mubr.msk.bf16.vlgmr.msra.gmra.mxu1 %vm1132_vm2, %v3705_v31  ;;  %v12449_v31 = vld [vmem:[#allocation133_spill] sm:$0xff] }
 0x2aa   : > { %8055 = vmatprep.mubr.msk.bf16.mxu0 %vm1132_vm2, %v10387_v16  ;;  %8095 = vmatprep.mubr.msk.bf16.mxu1 %vm1132_vm2, %v3706_v43  ;;  %v12454_v43 = vpack.c.bf16 %v12453_v17, %v9894_v15  ;;  %v12462_v15 = vld [vmem:[#allocation38_spill] sm:$0xff] }
 0x2ab   : > { %8124 = vmatpush3.bf16.msra.mxu0 %v10276_v51  ;;  %8164 = vmatpush3.bf16.msra.mxu1 %v10281_v38  ;;  %v8527_v51 = vld [vmem:[%s11952_s6 + $0xc0] sm:$0xff]   ;;  %v12463_v33 = vpack.c.bf16 %v12462_v15, %v10123_v50  ;;  %v10508_v50 = vld [vmem:[#allocation2 + $0x110] sm:$0xff]  ;;  %v12475_v15 = vld [vmem:[#allocation80_spill] sm:$0xff] }
 0x2ac   : > { %8125 = vmatprep.subr.bf16.mxu0 %v8522_v14  ;;  %8165 = vmatprep.subr.bf16.mxu1 %v8524_v44  ;;  %v8528_v38 = vld [vmem:[%s11952_s6 + $0xe0] sm:$0xff]   ;;  %5415 = vst.msk [vmem:[#allocation2 + $0x110] sm:$0xff] %vm1132_vm2, %v12200_v19 }
 0x2af   : > { %8126 = vmatpush3.bf16.msra.mxu0 %v8522_v14  ;;  %8166 = vmatpush3.bf16.msra.mxu1 %v8524_v44  ;;  %v12455_v14 = vld [vmem:[#allocation151_spill] sm:$0xff]  ;;  %v12457_v44 = vpack.c.bf16 %v12456_v49, %v9977_v24  ;;  %v3703_v24 = vmul.f32 %v10361_v40, %v10074_v9  ;;  %v10510_v9 = vld [vmem:[#allocation2 + $0x118] sm:$0xff] }
 0x2b0   : > { %8127 = vmatprep.subr.bf16.mxu0 %v8525_v39  ;;  %8167 = vmatprep.subr.bf16.mxu1 %v8526_v4 }
 0x2b1   : > { %8056 = vmatmul.mubr.msk.bf16.gmra.mxu0 %vm1132_vm2, %v10411_v48  ;;  %8096 = vmatmul.mubr.msk.bf16.gmra.mxu1 %vm1132_vm2, %v3707_v45  ;;  %v12465_v45 = vld [vmem:[#allocation167_spill] sm:$0xff] }
 0x2b2   : > { %8059 = vmatprep.mubr.msk.bf16.mxu0 %vm1132_vm2, %v12431_v13  ;;  %8099 = vmatprep.mubr.msk.bf16.mxu1 %vm1132_vm2, %v12433_v58 }
 0x2b3   : > { %8128 = vmatpush3.bf16.msra.mxu0 %v8525_v39  ;;  %8168 = vmatpush3.bf16.msra.mxu1 %v8526_v4  ;;  %v12458_v39 = vld [vmem:[#allocation153_spill] sm:$0xff]  ;;  %v12460_v4 = vpack.c.bf16 %v12459_v22, %v12412_v0 }
 0x2b4   : > { %8129 = vmatprep.subr.bf16.mxu0 %v8527_v51  ;;  %8169 = vmatprep.subr.bf16.mxu1 %v8528_v38  ;;  %v12466_v0 = vld [vmem:[#allocation49_spill] sm:$0xff] }
 0x2b5   : > { %v12468_v58 = vpack.c.bf16 %v12466_v0, %v12467_v52 }
 0x2b7   : > { %8130 = vmatpush3.bf16.msra.mxu0 %v8527_v51  ;;  %8170 = vmatpush3.bf16.msra.mxu1 %v8528_v38  ;;  %v10497_v51 = vpack.c.bf16 %v12465_v45, %v12464_v5  ;;  %v3719_v38 = vpack.c.bf16 %v3703_v24, %v10072_v54  ;;  %v12478_v45 = vld [vmem:[#allocation87_spill] sm:$0xff] }
 0x2b8   : > { %8203 = vmatprep.subr.bf16.mxu0 %v8529_v10 }
 0x2b9   : > { %8060 = vmatmul.mubr.msk.bf16.gmra.mxu0 %vm1132_vm2, %v12434_v26  ;;  %8100 = vmatmul.mubr.msk.bf16.gmra.mxu1 %vm1132_vm2, %v12436_v18  ;;  %v10514_v18 = vld [vmem:[#allocation2 + $0x119] sm:$0xff] }
 0x2ba   : > { %8063 = vmatprep.mubr.msk.bf16.mxu0 %vm1132_vm2, %v12437_v32  ;;  %8103 = vmatprep.mubr.msk.bf16.mxu1 %vm1132_vm2, %v12439_v47  ;;  %v4698_v47 = vld [vmem:[#allocation2 + $0x11a] sm:$0xff] }
 0x2bb   : > { %v10519_v6 = vmul.f32 %v10361_v40, %v4698_v47  ;;  %5416 = vst.msk [vmem:[#allocation2 + $0x118] sm:$0xff] %vm1132_vm2, %v12200_v19  ;;  %5417 = vst.msk [vmem:[#allocation2 + $0x120] sm:$0xff] %vm1132_vm2, %v12200_v19  ;;  %v12469_v40 = vld [vmem:[#allocation61_spill] sm:$0xff] }
 0x2c1   : > { %8064 = vmatmul.mubr.msk.bf16.gmra.mxu0 %vm1132_vm2, %v12440_v37  ;;  %8104 = vmatmul.mubr.msk.bf16.gmra.mxu1 %vm1132_vm2, %v12442_v60  ;;  %v8530_v60 = vld [vmem:[%s11952_s6 + $0x110] sm:$0xff]  }
 0x2c2   : > { %8067 = vmatprep.mubr.msk.bf16.mxu0 %vm1132_vm2, %v12443_v11  ;;  %8107 = vmatprep.mubr.msk.bf16.mxu1 %vm1132_vm2, %v12445_v29 }
 0x2c4   : > { %v7893_v28 = vpop.f32.mrf.mxu0 }
 0x2c5   : > { %v7933_v29 = vpop.f32.mrf.mxu1 }
 0x2c7   : > { %v2294_v17 = vpop.f32.mrf.mxu1 }
 0x2c9   : > { %8068 = vmatmul.mubr.msk.bf16.gmra.mxu0 %vm1132_vm2, %v12446_v56  ;;  %8108 = vmatmul.mubr.msk.bf16.gmra.mxu1 %vm1132_vm2, %v12448_v59  ;;  %v12470_v56 = vld [vmem:[#allocation46_spill] sm:$0xff]  ;;  %v10538_v59 = vadd.f32 %v7933_v29, %v7893_v28  ;;  %v7934_v49 = vpop.f32.mrf.mxu1 }
 0x2ca   : > { %8071 = vmatprep.mubr.msk.bf16.mxu0 %vm1132_vm2, %v12449_v31  ;;  %8111 = vmatprep.mubr.msk.bf16.mxu1 %vm1132_vm2, %v12451_v3  ;;  %v12471_v2 = vpack.c.bf16 %v12469_v40, %v12470_v56  ;;  %v12472_v31 = vld [vmem:[#allocation69_spill] sm:$0xff] }
 0x2cb   : > { %v12474_v3 = vpack.c.bf16 %v12472_v31, %v12473_v55  ;;  %v2297_v22 = vpop.f32.mrf.mxu1  ;;  %v12481_v55 = vld [vmem:[#allocation99_spill] sm:$0xff] }
 0x2d1   : > { %8072 = vmatmul.mubr.msk.bf16.gmra.mxu0 %vm1132_vm2, %v12452_v41  ;;  %8112 = vmatmul.mubr.msk.bf16.gmra.mxu1 %vm1132_vm2, %v12454_v43  ;;  %v2061_v41 = vpop.f32.mrf.mxu0 }
 0x2d2   : > { %8075 = vmatprep.mubr.msk.bf16.mxu0 %vm1132_vm2, %v12455_v14  ;;  %8115 = vmatprep.mubr.msk.bf16.mxu1 %vm1132_vm2, %v12457_v44  ;;  %v10546_v43 = vadd.f32 %v2294_v17, %v2061_v41  ;;  %v12484_v17 = vld [vmem:[#allocation106_spill] sm:$0xff] }
 0x2d3   : > { %v7894_v14 = vpop.f32.mrf.mxu0 }
 0x2d4   : > { %v10551_v44 = vadd.f32 %v7934_v49, %v7894_v14 }
 0x2d9   : > { %8076 = vmatmul.mubr.msk.bf16.gmra.mxu0 %vm1132_vm2, %v12458_v39  ;;  %8116 = vmatmul.mubr.msk.bf16.gmra.mxu1 %vm1132_vm2, %v12460_v4  ;;  %v2064_v39 = vpop.f32.mrf.mxu0 }
 0x2da   : > { %8079 = vmatprep.mubr.msk.bf16.mxu0 %vm1132_vm2, %v12461_v12  ;;  %8119 = vmatprep.mubr.msk.bf16.mxu1 %vm1132_vm2, %v12463_v33  ;;  %v10553_v4 = vadd.f32 %v2297_v22, %v2064_v39  ;;  %v7937_v12 = vpop.f32.mrf.mxu1  ;;  %v12476_v33 = vld [vmem:[#allocation94_spill] sm:$0xff] }
 0x2db   : > { %v12477_v24 = vpack.c.bf16 %v12475_v15, %v12476_v33 }
 0x2e1   : > { %8080 = vmatmul.mubr.msk.bf16.gmra.mxu0 %vm1132_vm2, %v10497_v51  ;;  %8120 = vmatmul.mubr.msk.bf16.gmra.mxu1 %vm1132_vm2, %v3719_v38  ;;  %v12479_v38 = vld [vmem:[#allocation110_spill] sm:$0xff] }
 0x2e2   : > { %8131 = vmatprep.mubr.msk.bf16.mxu0 %vm1132_vm2, %v12468_v58  ;;  %8171 = vmatprep.mubr.msk.bf16.mxu1 %vm1132_vm2, %v3352_v63  ;;  %v12480_v0 = vpack.c.bf16 %v12478_v45, %v12479_v38  ;;  %v2310_v58 = vpop.f32.mrf.mxu1  ;;  %v12487_v38 = vld [vmem:[#allocation125_spill] sm:$0xff] }
 0x2e4   : > { %v7938_v28 = vpop.f32.mrf.mxu1 }
 0x2e6   : > { %v2313_v40 = vpop.f32.mrf.mxu1 }
 0x2e8   : > { %v7941_v31 = vpop.f32.mrf.mxu1 }
 0x2e9   : > { %8132 = vmatmul.mubr.msk.bf16.vlgmr.msra.gmra.mxu0 %vm1132_vm2, %v12471_v2  ;;  %8172 = vmatmul.mubr.msk.bf16.vlgmr.msra.gmra.mxu1 %vm1132_vm2, %v10387_v16  ;;  %v8531_v16 = vld [vmem:[%s11952_s6 + $0x108] sm:$0xff]  }
 0x2ea   : > { %8135 = vmatprep.mubr.msk.bf16.mxu0 %vm1132_vm2, %v12474_v3  ;;  %8175 = vmatprep.mubr.msk.bf16.mxu1 %vm1132_vm2, %v10411_v48  ;;  %v8532_v48 = vld [vmem:[%s11952_s6 + $0x100] sm:$0xff]   ;;  %v12482_v3 = vld [vmem:[#allocation111_spill] sm:$0xff]  ;;  %v2326_v39 = vpop.f32.mrf.mxu1 }
 0x2eb   : > { %8204 = vmatpush3.bf16.msra.mxu0 %v8529_v10  ;;  %v7897_v10 = vpop.f32.mrf.mxu0 }
 0x2ec   : > { %8205 = vmatprep.subr.bf16.mxu0 %v8530_v60  ;;  %v10564_v5 = vadd.f32 %v7937_v12, %v7897_v10  ;;  %v7942_v10 = vpop.f32.mrf.mxu1 }
 0x2ed   : > { %v2077_v52 = vpop.f32.mrf.mxu0 }
 0x2ee   : > { %v10572_v47 = vadd.f32 %v2310_v58, %v2077_v52  ;;  %v12490_v58 = vld [vmem:[#allocation127_spill] sm:$0xff] }
 0x2ef   : > { %8206 = vmatpush3.bf16.msra.mxu0 %v8530_v60  ;;  %v7898_v60 = vpop.f32.mrf.mxu0 }
 0x2f0   : > { %8207 = vmatprep.subr.bf16.mxu0 %v8531_v16  ;;  %v10574_v29 = vadd.f32 %v7938_v28, %v7898_v60  ;;  %v12491_v60 = vld [vmem:[#allocation132_spill] sm:$0xff] }
 0x2f1   : > { %8136 = vmatmul.mubr.msk.bf16.gmra.mxu0 %vm1132_vm2, %v12477_v24  ;;  %8176 = vmatmul.mubr.msk.bf16.gmra.mxu1 %vm1132_vm2, %v12431_v13  ;;  %v2080_v13 = vpop.f32.mrf.mxu0  ;;  %v12492_v28 = vpack.c.bf16 %v12490_v58, %v12491_v60  ;;  %v12503_v58 = vld [vmem:[#allocation150_spill] sm:$0xff] }
 0x2f2   : > { %8139 = vmatprep.mubr.msk.bf16.mxu0 %vm1132_vm2, %v12480_v0  ;;  %8179 = vmatprep.mubr.msk.bf16.mxu1 %vm1132_vm2, %v12434_v26  ;;  %v10576_v56 = vadd.f32 %v2313_v40, %v2080_v13  ;;  %v12483_v26 = vpack.c.bf16 %v12481_v55, %v12482_v3  ;;  %v12488_v0 = vld [vmem:[#allocation131_spill] sm:$0xff]  ;;  %v12493_v13 = vld [vmem:[#allocation128_spill] sm:$0xff] }
 0x2f3   : > { %8208 = vmatpush3.bf16.msra.mxu0 %v8531_v16  ;;  %v7901_v2 = vpop.f32.mrf.mxu0  ;;  %v12485_v16 = vld [vmem:[#allocation112_spill] sm:$0xff]  ;;  %v12489_v52 = vpack.c.bf16 %v12487_v38, %v12488_v0 }
 0x2f4   : > { %8209 = vmatprep.subr.bf16.mxu0 %v8532_v48  ;;  %v10584_v41 = vadd.f32 %v7941_v31, %v7901_v2  ;;  %v12486_v14 = vpack.c.bf16 %v12484_v17, %v12485_v16  ;;  %v12494_v40 = vld [vmem:[#allocation120_spill] sm:$0xff] }
 0x2f5   : > { %v2093_v49 = vpop.f32.mrf.mxu0  ;;  %v12495_v2 = vpack.c.bf16 %v12493_v13, %v12494_v40  ;;  %v12506_v13 = vld [vmem:[#allocation142_spill] sm:$0xff] }
 0x2f6   : > { %v10592_v22 = vadd.f32 %v2326_v39, %v2093_v49 }
 0x2f7   : > { %8210 = vmatpush3.bf16.msra.mxu0 %v8532_v48  ;;  %v7902_v48 = vpop.f32.mrf.mxu0 }
 0x2f8   : > { %v10594_v12 = vadd.f32 %v7942_v10, %v7902_v48  ;;  %v12496_v10 = vld [vmem:[#allocation139_spill] sm:$0xff] }
 0x2f9   : > { %8140 = vmatmul.mubr.msk.bf16.gmra.mxu0 %vm1132_vm2, %v12483_v26  ;;  %8180 = vmatmul.mubr.msk.bf16.gmra.mxu1 %vm1132_vm2, %v12437_v32  ;;  %v2096_v15 = vpop.f32.mrf.mxu0  ;;  %v2329_v32 = vpop.f32.mrf.mxu1 }
 0x2fa   : > { %8143 = vmatprep.mubr.msk.bf16.mxu0 %vm1132_vm2, %v12486_v14  ;;  %8183 = vmatprep.mubr.msk.bf16.mxu1 %vm1132_vm2, %v12440_v37  ;;  %v10596_v33 = vadd.f32 %v2329_v32, %v2096_v15  ;;  %v12497_v15 = vld [vmem:[#allocation149_spill] sm:$0xff] }
 0x2fb   : > { %v7905_v24 = vpop.f32.mrf.mxu0  ;;  %v7945_v45 = vpop.f32.mrf.mxu1  ;;  %v12498_v32 = vpack.c.bf16 %v12496_v10, %v12497_v15  ;;  %v12510_v10 = vld [vmem:[#allocation158_spill] sm:$0xff]  ;;  %v12511_v15 = vld [vmem:[#allocation159_spill] sm:$0xff] }
 0x2fc   : > { %v10604_v37 = vadd.f32 %v7945_v45, %v7905_v24  ;;  %v12499_v24 = vld [vmem:[#allocation141_spill] sm:$0xff]  ;;  %v12500_v45 = vld [vmem:[#allocation135_spill] sm:$0xff] }
 0x2fd   : > { %v2109_v31 = vpop.f32.mrf.mxu0  ;;  %v2342_v55 = vpop.f32.mrf.mxu1  ;;  %v12501_v38 = vpack.c.bf16 %v12499_v24, %v12500_v45  ;;  %v12513_v24 = vld [vmem:[#allocation155_spill] sm:$0xff]  ;;  %v12514_v45 = vld [vmem:[#allocation152_spill] sm:$0xff] }
 0x2fe   : > { %v10614_v3 = vadd.f32 %v2342_v55, %v2109_v31 }
 0x2ff   : > { %v7906_v26 = vpop.f32.mrf.mxu0  ;;  %v7946_v17 = vpop.f32.mrf.mxu1 }
 0x300   : > { %v10616_v16 = vadd.f32 %v7946_v17, %v7906_v26 }
 0x301   : > { %8144 = vmatmul.mubr.msk.bf16.gmra.mxu0 %vm1132_vm2, %v12489_v52  ;;  %8184 = vmatmul.mubr.msk.bf16.gmra.mxu1 %vm1132_vm2, %v12443_v11  ;;  %v2112_v11 = vpop.f32.mrf.mxu0  ;;  %v2345_v14 = vpop.f32.mrf.mxu1  ;;  %v12502_v52 = vld [vmem:[#allocation148_spill] sm:$0xff] }
 0x302   : > { %8147 = vmatprep.mubr.msk.bf16.mxu0 %vm1132_vm2, %v12492_v28  ;;  %8187 = vmatprep.mubr.msk.bf16.mxu1 %vm1132_vm2, %v12495_v2  ;;  %v10618_v49 = vadd.f32 %v2345_v14, %v2112_v11  ;;  %v12504_v60 = vpack.c.bf16 %v12502_v52, %v12503_v58  ;;  %v12505_v28 = vld [vmem:[#allocation145_spill] sm:$0xff]  ;;  %v12516_v58 = vld [vmem:[#allocation166_spill] sm:$0xff] }
 0x303   : > { %v7909_v39 = vpop.f32.mrf.mxu0  ;;  %v7949_v48 = vpop.f32.mrf.mxu1  ;;  %v12507_v40 = vpack.c.bf16 %v12505_v28, %v12506_v13  ;;  %v12519_v13 = vld [vmem:[#allocation156_spill] sm:$0xff] }
 0x304   : > { %v10628_v0 = vadd.f32 %v7949_v48, %v7909_v39 }
 0x305   : > { %v10638_v2 = vpop.f32.mrf.mxu0  ;;  %v10640_v31 = vpop.f32.mrf.mxu1 }
 0x307   : > { %v7910_v55 = vpop.f32.mrf.mxu0  ;;  %v7950_v26 = vpop.f32.mrf.mxu1 }
 0x308   : > { %v10642_v17 = vadd.f32 %v7950_v26, %v7910_v55 }
 0x309   : > { %8148 = vmatmul.mubr.msk.bf16.gmra.mxu0 %vm1132_vm2, %v12498_v32  ;;  %8188 = vmatmul.mubr.msk.bf16.gmra.mxu1 %vm1132_vm2, %v12501_v38  ;;  %v10644_v11 = vpop.f32.mrf.mxu0  ;;  %v10646_v14 = vpop.f32.mrf.mxu1  ;;  %v12512_v32 = vpack.c.bf16 %v12510_v10, %v12511_v15  ;;  %v12515_v38 = vpack.c.bf16 %v12513_v24, %v12514_v45 }
 0x30a   : > { %8151 = vmatprep.mubr.msk.bf16.mxu0 %vm1132_vm2, %v12504_v60  ;;  %8191 = vmatprep.mubr.msk.bf16.mxu1 %vm1132_vm2, %v12507_v40  ;;  %12508 = vst [vmem:[#allocation103_spill] sm:$0xff] %v10644_v11  ;;  %12509 = vst [vmem:[#allocation100_spill] sm:$0xff] %v10646_v14  ;;  %v12517_v60 = vld [vmem:[#allocation168_spill] sm:$0xff] }
 0x30b   : > { %v7913_v39 = vpop.f32.mrf.mxu0  ;;  %v7953_v48 = vpop.f32.mrf.mxu1  ;;  %v12518_v28 = vpack.c.bf16 %v12516_v58, %v12517_v60  ;;  %v12520_v40 = vld [vmem:[#allocation160_spill] sm:$0xff]  ;;  %v12522_v58 = vld [vmem:[#allocation173_spill] sm:$0xff] }
 0x30c   : > { %v10656_v52 = vadd.f32 %v7953_v48, %v7913_v39  ;;  %v12521_v55 = vpack.c.bf16 %v12519_v13, %v12520_v40  ;;  %v12523_v60 = vld [vmem:[#allocation169_spill] sm:$0xff]  ;;  %v12525_v13 = vld [vmem:[#allocation174_spill] sm:$0xff]  ;;  %v12526_v40 = vld [vmem:[#allocation171_spill] sm:$0xff] }
 0x30d   : > { %v10666_v26 = vpop.f32.mrf.mxu0  ;;  %v10668_v10 = vpop.f32.mrf.mxu1 }
 0x30f   : > { %v7914_v15 = vpop.f32.mrf.mxu0 }
 0x311   : > { %8152 = vmatmul.mubr.msk.bf16.gmra.mxu0 %vm1132_vm2, %v12512_v32  ;;  %8192 = vmatmul.mubr.msk.bf16.gmra.mxu1 %vm1132_vm2, %v12515_v38  ;;  %v7954_v32 = vpop.f32.mrf.mxu1  ;;  %v10672_v39 = vpop.f32.mrf.mxu0 }
 0x312   : > { %8155 = vmatprep.mubr.msk.bf16.mxu0 %vm1132_vm2, %v12518_v28  ;;  %8195 = vmatprep.mubr.msk.bf16.mxu1 %vm1132_vm2, %v12521_v55  ;;  %v10670_v24 = vadd.f32 %v7954_v32, %v7914_v15  ;;  %v12524_v28 = vpack.c.bf16 %v12522_v58, %v12523_v60  ;;  %v12527_v55 = vpack.c.bf16 %v12525_v13, %v12526_v40  ;;  %v12528_v15 = vld [vmem:[#allocation176_spill] sm:$0xff]  ;;  %v12530_v60 = vld [vmem:[#allocation157_spill] sm:$0xff]  ;;  %v12531_v13 = vld [vmem:[#allocation50_spill] sm:$0xff] }
 0x313   : > { %v10674_v48 = vpop.f32.mrf.mxu1  ;;  %v7917_v45 = vpop.f32.mrf.mxu0  ;;  %v12529_v32 = vpack.c.bf16 %v10049_v57, %v12528_v15  ;;  %v4700_v40 = vmul.f32 %v12415_v25, %v12531_v13  ;;  %v4393_v57 = vpack.c.bf16 %v10514_v18, %v10512_v34  ;;  %v8595_v34 = vld [vmem:[%s12166_s1 + $0x8] sm:$0xff] }
 0x315   : > { %v7957_v38 = vpop.f32.mrf.mxu1  ;;  %v10692_v19 = vpop.f32.mrf.mxu0  ;;  %v4731_v14 = vpack.c.bf16 %v4700_v40, %v12534_v36 }
 0x316   : > { %v10684_v63 = vadd.f32 %v7957_v38, %v7917_v45 }
 0x317   : > { %v10694_v58 = vpop.f32.mrf.mxu1  ;;  %v7918_v45 = vpop.f32.mrf.mxu0 }
 0x319   : > { %8156 = vmatmul.mubr.msk.bf16.gmra.mxu0 %vm1132_vm2, %v12524_v28  ;;  %8196 = vmatmul.mubr.msk.bf16.gmra.mxu1 %vm1132_vm2, %v12527_v55  ;;  %v4055_v28 = vmul.f32 %v12530_v60, %v10508_v50  ;;  %v7958_v38 = vpop.f32.mrf.mxu1  ;;  %v10704_v15 = vpop.f32.mrf.mxu0 }
 0x31a   : > { %8159 = vmatprep.mubr.msk.bf16.mxu0 %vm1132_vm2, %v12529_v32  ;;  %8199 = vmatprep.mubr.msk.bf16.mxu1 %vm1132_vm2, %v10497_v51  ;;  %v10702_v55 = vadd.f32 %v7958_v38, %v7918_v45  ;;  %12532 = vst [vmem:[#allocation121_spill] sm:$0xff] %v10704_v15  ;;  %v12538_v38 = vld [vmem:[#allocation57_spill] sm:$0xff] }
 0x31b   : > { %v10706_v51 = vpop.f32.mrf.mxu1  ;;  %v4072_v32 = vpack.c.bf16 %v10510_v9, %v4055_v28  ;;  %v4702_v9 = vmul.f32 %v12421_v7, %v12365_v8 }
 0x31c   : > { %12533 = vst [vmem:[#allocation124_spill] sm:$0xff] %v10706_v51 }
 0x31e   : > { %v7921_v11 = vpop.f32.mrf.mxu0 }
 0x31f   : > { %v7961_v50 = vpop.f32.mrf.mxu1 }
 0x320   : > { %v10712_v25 = vadd.f32 %v7961_v50, %v7921_v11  ;;  %v10720_v18 = vpop.f32.mrf.mxu0 }
 0x321   : > { %8160 = vmatmul.mubr.msk.bf16.gmra.mxu0 %vm1132_vm2, %v4072_v32  ;;  %8200 = vmatmul.mubr.msk.bf16.gmra.mxu1 %vm1132_vm2, %v4393_v57  ;;  %v10722_v36 = vpop.f32.mrf.mxu1  ;;  %v12539_v57 = vld [vmem:[#allocation70_spill] sm:$0xff] }
 0x322   : > { %8211 = vmatprep.mubr.msk.bf16.mxu0 %vm1132_vm2, %v4731_v14  ;;  %5091 = vmatprep.mubr.f32.mxu1 %v8595_v34  ;;  %v7922_v60 = vpop.f32.mrf.mxu0  ;;  %v12537_v14 = vld [vmem:[#allocation62_spill] sm:$0xff]  ;;  %v4733_v32 = vpack.c.bf16 %v12539_v57, %v12538_v38 }
 0x323   : > { %v7962_v28 = vpop.f32.mrf.mxu1  ;;  %v4732_v45 = vpack.c.bf16 %v4702_v9, %v12537_v14 }
 0x324   : > { %v10724_v13 = vadd.f32 %v7962_v28, %v7922_v60  ;;  %v10726_v11 = vpop.f32.mrf.mxu0 }
 0x325   : > { %12535 = vst [vmem:[#allocation51_spill] sm:$0xff] %v10726_v11  ;;  %v10728_v40 = vpop.f32.mrf.mxu1 }
 0x326   : > { %12536 = vst [vmem:[#allocation58_spill] sm:$0xff] %v10728_v40  ;;  %v7973_v50 = vpop.f32.mrf.mxu0 }
 0x327   : > { %v8013_v34 = vpop.f32.mrf.mxu1  ;;  %v2936_v8 = vadd.f32 %v7973_v50, %v10538_v59 }
 0x328   : > { %v2807_v7 = vpop.f32.mrf.mxu0 }
 0x329   : > { %8212 = vmatmul.mubr.msk.bf16.vlgmr.msra.gmra.mxu0 %vm1132_vm2, %v4732_v45  ;;  %v3160_v60 = vpop.f32.mrf.mxu1  ;;  %v10736_v28 = vadd.f32 %v8013_v34, %v2936_v8  ;;  %v2934_v11 = vadd.f32 %v2807_v7, %v10546_v43  ;;  %v12540_v34 = vld [vmem:[#allocation43_spill] sm:$0xff] }
 0x32a   : > { %8215 = vmatprep.mubr.msk.bf16.mxu0 %vm1132_vm2, %v4733_v32  ;;  %v7974_v40 = vpop.f32.mrf.mxu0  ;;  %v12541_v8 = vld [vmem:[#allocation83_spill] sm:$0xff] }
 0x32b   : > { %v8014_v51 = vpop.f32.mrf.mxu1  ;;  %v10739_v9 = vadd.f32 %v3160_v60, %v2934_v11  ;;  %v2937_v14 = vadd.f32 %v7974_v40, %v10551_v44  ;;  %v12542_v15 = vpack.c.bf16 %v12540_v34, %v12541_v8  ;;  %v12543_v11 = vld [vmem:[#allocation81_spill] sm:$0xff] }
 0x32c   : > { %v2810_v38 = vpop.f32.mrf.mxu0  ;;  %v12544_v44 = vpack.c.bf16 %v10163_v42, %v12543_v11 }
 0x32d   : > { %v10742_v57 = vpop.f32.mrf.mxu1  ;;  %v10744_v45 = vadd.f32 %v8014_v51, %v2937_v14  ;;  %v10747_v59 = vadd.f32 %v2810_v38, %v10553_v4 }
 0x331   : > { %v7977_v32 = vpop.f32.mrf.mxu0  ;;  %v8017_v50 = vpop.f32.mrf.mxu1  ;;  %8216 = vmatmul.mubr.msk.bf16.gmra.mxu0 %vm1132_vm2, %v12542_v15 }
 0x332   : > { %v2940_v43 = vadd.f32 %v7977_v32, %v10564_v5  ;;  %8219 = vmatprep.mubr.msk.bf16.mxu0 %vm1132_vm2, %v12544_v44 }
 0x333   : > { %v2823_v40 = vpop.f32.mrf.mxu0  ;;  %v3176_v51 = vpop.f32.mrf.mxu1 }
 0x334   : > { %v10758_v7 = vadd.f32 %v8017_v50, %v2940_v43  ;;  %v2938_v4 = vadd.f32 %v2823_v40, %v10572_v47  ;;  %v12545_v50 = vpack.c.bf16 %v10167_v46, %v12356_v23 }
 0x335   : > { %v7978_v60 = vpop.f32.mrf.mxu0  ;;  %v8018_v14 = vpop.f32.mrf.mxu1 }
 0x336   : > { %v10761_v38 = vadd.f32 %v3176_v51, %v2938_v4  ;;  %v2941_v34 = vadd.f32 %v7978_v60, %v10574_v29  ;;  %v12546_v29 = vpack.c.bf16 %v10171_v27, %v12357_v30 }
 0x337   : > { %v2826_v15 = vpop.f32.mrf.mxu0  ;;  %v10764_v8 = vpop.f32.mrf.mxu1 }
 0x338   : > { %v10766_v5 = vadd.f32 %v8018_v14, %v2941_v34  ;;  %v10769_v42 = vadd.f32 %v2826_v15, %v10576_v56  ;;  %v12547_v15 = vpack.c.bf16 %v10175_v35, %v12358_v61 }
 0x339   : > { %v7981_v32 = vpop.f32.mrf.mxu0  ;;  %v8021_v11 = vpop.f32.mrf.mxu1  ;;  %8220 = vmatmul.mubr.msk.bf16.gmra.mxu0 %vm1132_vm2, %v12545_v50 }
 0x33a   : > { %v2944_v47 = vadd.f32 %v7981_v32, %v10584_v41  ;;  %8223 = vmatprep.mubr.msk.bf16.mxu0 %vm1132_vm2, %v12546_v29 }
 0x33b   : > { %v2839_v43 = vpop.f32.mrf.mxu0  ;;  %v3192_v44 = vpop.f32.mrf.mxu1 }
 0x33c   : > { %v10780_v40 = vadd.f32 %v8021_v11, %v2944_v47  ;;  %v2942_v56 = vadd.f32 %v2839_v43, %v10592_v22 }
 0x33d   : > { %v7982_v51 = vpop.f32.mrf.mxu0  ;;  %v8022_v4 = vpop.f32.mrf.mxu1 }
 0x33e   : > { %v10783_v60 = vadd.f32 %v3192_v44, %v2942_v56  ;;  %v2945_v46 = vadd.f32 %v7982_v51, %v10594_v12  ;;  %v12548_v12 = vpack.c.bf16 %v10181_v1, %v12359_v53  ;;  %v12549_v51 = vpack.c.bf16 %v10185_v21, %v9880_v62 }
 0x33f   : > { %v2842_v23 = vpop.f32.mrf.mxu0  ;;  %v10786_v14 = vpop.f32.mrf.mxu1 }
 0x340   : > { %v10788_v41 = vadd.f32 %v8022_v4, %v2945_v46  ;;  %v10791_v30 = vadd.f32 %v2842_v23, %v10596_v33  ;;  %v12550_v4 = vld [vmem:[#allocation44_spill] sm:$0xff]  ;;  %v12551_v46 = vld [vmem:[#allocation146_spill] sm:$0xff] }
 0x341   : > { %v7985_v27 = vpop.f32.mrf.mxu0  ;;  %v8025_v34 = vpop.f32.mrf.mxu1  ;;  %8224 = vmatmul.mubr.msk.bf16.gmra.mxu0 %vm1132_vm2, %v12547_v15  ;;  %v12552_v23 = vpack.c.bf16 %v12550_v4, %v12551_v46 }
 0x342   : > { %v2948_v22 = vadd.f32 %v7985_v27, %v10604_v37  ;;  %8227 = vmatprep.mubr.msk.bf16.mxu0 %vm1132_vm2, %v12548_v12 }
 0x343   : > { %v2855_v32 = vpop.f32.mrf.mxu0  ;;  %v3208_v11 = vpop.f32.mrf.mxu1 }
 0x344   : > { %v10802_v50 = vadd.f32 %v8025_v34, %v2948_v22  ;;  %v2946_v33 = vadd.f32 %v2855_v32, %v10614_v3  ;;  %v2359_v3 = vadd.f32 %v10640_v31, %v10638_v2 }
 0x345   : > { %v7986_v47 = vpop.f32.mrf.mxu0  ;;  %v8026_v29 = vpop.f32.mrf.mxu1 }
 0x346   : > { %v10805_v43 = vadd.f32 %v3208_v11, %v2946_v33  ;;  %v2949_v61 = vadd.f32 %v7986_v47, %v10616_v16  ;;  %v12553_v33 = vld [vmem:[#allocation30_spill] sm:$0xff]  ;;  %v12554_v47 = vld [vmem:[#allocation161_spill] sm:$0xff] }
 0x347   : > { %v2858_v35 = vpop.f32.mrf.mxu0  ;;  %v10808_v44 = vpop.f32.mrf.mxu1 }
 0x348   : > { %v10810_v37 = vadd.f32 %v8026_v29, %v2949_v61  ;;  %v10813_v1 = vadd.f32 %v2858_v35, %v10618_v49  ;;  %v12555_v29 = vpack.c.bf16 %v12553_v33, %v12554_v47  ;;  %v2375_v61 = vadd.f32 %v10668_v10, %v10666_v26  ;;  %v12562_v47 = vld [vmem:[#allocation34_spill] sm:$0xff] }
 0x349   : > { %v7989_v53 = vpop.f32.mrf.mxu0  ;;  %v8029_v56 = vpop.f32.mrf.mxu1  ;;  %8228 = vmatmul.mubr.msk.bf16.gmra.mxu0 %vm1132_vm2, %v12549_v51 }
 0x34a   : > { %v2952_v16 = vadd.f32 %v7989_v53, %v10628_v0  ;;  %8231 = vmatprep.mubr.msk.bf16.mxu0 %vm1132_vm2, %v12552_v23  ;;  %v12556_v53 = vld [vmem:[#allocation88_spill] sm:$0xff] }
 0x34b   : > { %v2871_v27 = vpop.f32.mrf.mxu0  ;;  %v3224_v49 = vpop.f32.mrf.mxu1 }
 0x34c   : > { %v10826_v34 = vadd.f32 %v8029_v56, %v2952_v16  ;;  %v2950_v15 = vadd.f32 %v2871_v27, %v2359_v3 }
 0x34d   : > { %v7990_v22 = vpop.f32.mrf.mxu0  ;;  %v8030_v12 = vpop.f32.mrf.mxu1 }
 0x34e   : > { %v10828_v62 = vadd.f32 %v3224_v49, %v2950_v15  ;;  %v2953_v21 = vadd.f32 %v7990_v22, %v10642_v17  ;;  %v12557_v17 = vld [vmem:[#allocation175_spill] sm:$0xff] }
 0x34f   : > { %v10831_v32 = vpop.f32.mrf.mxu0  ;;  %v10833_v2 = vpop.f32.mrf.mxu1  ;;  %v12558_v56 = vpack.c.bf16 %v12556_v53, %v12557_v17 }
 0x350   : > { %v10835_v0 = vadd.f32 %v8030_v12, %v2953_v21  ;;  %v12559_v12 = vld [vmem:[#allocation32_spill] sm:$0xff]  ;;  %v12560_v21 = vld [vmem:[#allocation177_spill] sm:$0xff] }
 0x351   : > { %v7993_v31 = vpop.f32.mrf.mxu0  ;;  %v8033_v11 = vpop.f32.mrf.mxu1  ;;  %8232 = vmatmul.mubr.msk.bf16.gmra.mxu0 %vm1132_vm2, %v12555_v29 }
 0x352   : > { %v2956_v35 = vadd.f32 %v7993_v31, %v10656_v52  ;;  %8235 = vmatprep.mubr.msk.bf16.mxu0 %vm1132_vm2, %v12558_v56  ;;  %v12561_v31 = vpack.c.bf16 %v12559_v12, %v12560_v21 }
 0x353   : > { %v2887_v51 = vpop.f32.mrf.mxu0  ;;  %v3240_v3 = vpop.f32.mrf.mxu1 }
 0x354   : > { %v10848_v16 = vadd.f32 %v8033_v11, %v2956_v35  ;;  %v2954_v4 = vadd.f32 %v2887_v51, %v2375_v61  ;;  %v2391_v11 = vadd.f32 %v10694_v58, %v10692_v19 }
 0x355   : > { %v7994_v46 = vpop.f32.mrf.mxu0  ;;  %v8034_v23 = vpop.f32.mrf.mxu1 }
 0x356   : > { %v10850_v27 = vadd.f32 %v3240_v3, %v2954_v4  ;;  %v2957_v49 = vadd.f32 %v7994_v46, %v10670_v24  ;;  %v12563_v24 = vpack.c.bf16 %v12562_v47, %v10072_v54  ;;  %v12564_v46 = vpack.c.bf16 %v10519_v6, %v10516_v20 }
 0x357   : > { %v10853_v15 = vpop.f32.mrf.mxu0  ;;  %v10855_v26 = vpop.f32.mrf.mxu1 }
 0x358   : > { %v10857_v52 = vadd.f32 %v8034_v23, %v2957_v49  ;;  %v2407_v23 = vadd.f32 %v10722_v36, %v10720_v18 }
 0x359   : > { %v7997_v10 = vpop.f32.mrf.mxu0  ;;  %v8037_v22 = vpop.f32.mrf.mxu1  ;;  %8236 = vmatmul.mubr.msk.bf16.gmra.mxu0 %vm1132_vm2, %v12561_v31 }
 0x35a   : > { %v2960_v33 = vadd.f32 %v7997_v10, %v10684_v63  ;;  %8239 = vmatprep.mubr.msk.bf16.mxu0 %vm1132_vm2, %v12563_v24 }
 0x35b   : > { %v2903_v29 = vpop.f32.mrf.mxu0  ;;  %v3256_v61 = vpop.f32.mrf.mxu1 }
 0x35c   : > { %v10870_v35 = vadd.f32 %v8037_v22, %v2960_v33  ;;  %v2958_v53 = vadd.f32 %v2903_v29, %v2391_v11 }
 0x35d   : > { %v7998_v17 = vpop.f32.mrf.mxu0  ;;  %v8038_v56 = vpop.f32.mrf.mxu1 }
 0x35e   : > { %v10872_v51 = vadd.f32 %v3256_v61, %v2958_v53  ;;  %v2961_v3 = vadd.f32 %v7998_v17, %v10702_v55 }
 0x35f   : > { %v10875_v4 = vpop.f32.mrf.mxu0  ;;  %v10877_v19 = vpop.f32.mrf.mxu1 }
 0x360   : > { %v10879_v63 = vadd.f32 %v8038_v56, %v2961_v3 }
 0x361   : > { %v8001_v54 = vpop.f32.mrf.mxu0  ;;  %v8041_v58 = vpop.f32.mrf.mxu1  ;;  %8240 = vmatmul.mubr.msk.bf16.gmra.mxu0 %vm1132_vm2, %v12564_v46 }
 0x362   : > { %v2964_v49 = vadd.f32 %v8001_v54, %v10712_v25 }
 0x363   : > { %v2919_v10 = vpop.f32.mrf.mxu0  ;;  %v3272_v55 = vpop.f32.mrf.mxu1 }
 0x364   : > { %v10888_v22 = vadd.f32 %v8041_v58, %v2964_v49  ;;  %v2962_v12 = vadd.f32 %v2919_v10, %v2407_v23 }
 0x365   : > { %v8002_v21 = vpop.f32.mrf.mxu0  ;;  %v8042_v31 = vpop.f32.mrf.mxu1 }
 0x366   : > { %v10890_v11 = vadd.f32 %v3272_v55, %v2962_v12  ;;  %v2965_v33 = vadd.f32 %v8002_v21, %v10724_v13 }
 0x367   : > { %v10893_v47 = vpop.f32.mrf.mxu0  ;;  %v10895_v20 = vpop.f32.mrf.mxu1 }
 0x368   : > { %v10897_v6 = vadd.f32 %v8042_v31, %v2965_v33 }
 0x369   : > { %v8053_v18 = vpop.f32.mrf.mxu0  ;;  %v8093_v36 = vpop.f32.mrf.mxu1 }
 0x36a   : > { %v3610_v25 = vadd.f32 %v8053_v18, %v10736_v28 }
 0x36b   : > { %v3481_v24 = vpop.f32.mrf.mxu0  ;;  %v3834_v29 = vpop.f32.mrf.mxu1 }
 0x36c   : > { %v10900_v61 = vadd.f32 %v8093_v36, %v3610_v25  ;;  %v3608_v53 = vadd.f32 %v3481_v24, %v10739_v9 }
 0x36d   : > { %v8054_v17 = vpop.f32.mrf.mxu0  ;;  %v8094_v56 = vpop.f32.mrf.mxu1 }
 0x36e   : > { %v10903_v3 = vadd.f32 %v3834_v29, %v3608_v53  ;;  %v3611_v13 = vadd.f32 %v8054_v17, %v10744_v45 }
 0x36f   : > { %v10906_v54 = vpop.f32.mrf.mxu0  ;;  %v10908_v58 = vpop.f32.mrf.mxu1 }
 0x370   : > { %v10910_v46 = vadd.f32 %v8094_v56, %v3611_v13 }
 0x371   : > { %v8057_v23 = vpop.f32.mrf.mxu0  ;;  %v8097_v28 = vpop.f32.mrf.mxu1 }
 0x372   : > { %v3614_v49 = vadd.f32 %v8057_v23, %v10758_v7 }
 0x373   : > { %v3497_v10 = vpop.f32.mrf.mxu0  ;;  %v3850_v55 = vpop.f32.mrf.mxu1 }
 0x374   : > { %v10913_v12 = vadd.f32 %v8097_v28, %v3614_v49  ;;  %v3612_v9 = vadd.f32 %v3497_v10, %v10761_v38 }
 0x375   : > { %v8058_v21 = vpop.f32.mrf.mxu0  ;;  %v8098_v31 = vpop.f32.mrf.mxu1 }
 0x376   : > { %v10916_v33 = vadd.f32 %v3850_v55, %v3612_v9  ;;  %v3615_v45 = vadd.f32 %v8058_v21, %v10766_v5 }
 0x377   : > { %v10919_v18 = vpop.f32.mrf.mxu0  ;;  %v10921_v36 = vpop.f32.mrf.mxu1 }
 0x378   : > { %v10923_v25 = vadd.f32 %v8098_v31, %v3615_v45 }
 0x379   : > { %v8061_v24 = vpop.f32.mrf.mxu0  ;;  %v8101_v7 = vpop.f32.mrf.mxu1 }
 0x37a   : > { %v3618_v29 = vadd.f32 %v8061_v24, %v10780_v40 }
 0x37b   : > { %v3513_v53 = vpop.f32.mrf.mxu0  ;;  %v3866_v17 = vpop.f32.mrf.mxu1 }
 0x37c   : > { %v10926_v56 = vadd.f32 %v8101_v7, %v3618_v29  ;;  %v3616_v38 = vadd.f32 %v3513_v53, %v10783_v60 }
 0x37d   : > { %v8062_v13 = vpop.f32.mrf.mxu0  ;;  %v8102_v23 = vpop.f32.mrf.mxu1 }
 0x37e   : > { %v10929_v28 = vadd.f32 %v3866_v17, %v3616_v38  ;;  %v3619_v5 = vadd.f32 %v8062_v13, %v10788_v41 }
 0x37f   : > { %v10932_v49 = vpop.f32.mrf.mxu0  ;;  %v10934_v10 = vpop.f32.mrf.mxu1 }
 0x380   : > { %v10936_v55 = vadd.f32 %v8102_v23, %v3619_v5 }
 0x381   : > { %v8065_v9 = vpop.f32.mrf.mxu0  ;;  %v8105_v40 = vpop.f32.mrf.mxu1 }
 0x382   : > { %v3622_v21 = vadd.f32 %v8065_v9, %v10802_v50 }
 0x383   : > { %v3529_v31 = vpop.f32.mrf.mxu0  ;;  %v3882_v45 = vpop.f32.mrf.mxu1 }
 0x384   : > { %v10939_v24 = vadd.f32 %v8105_v40, %v3622_v21  ;;  %v3620_v60 = vadd.f32 %v3529_v31, %v10805_v43 }
 0x385   : > { %v8066_v7 = vpop.f32.mrf.mxu0  ;;  %v8106_v29 = vpop.f32.mrf.mxu1 }
 0x386   : > { %v10942_v53 = vadd.f32 %v3882_v45, %v3620_v60  ;;  %v3623_v41 = vadd.f32 %v8066_v7, %v10810_v37 }
 0x387   : > { %v10945_v17 = vpop.f32.mrf.mxu0  ;;  %v10947_v38 = vpop.f32.mrf.mxu1 }
 0x388   : > { %v10949_v13 = vadd.f32 %v8106_v29, %v3623_v41  ;;  %v2378_v41 = vadd.f32 %v10674_v48, %v10672_v39 }
 0x389   : > { %v8069_v23 = vpop.f32.mrf.mxu0  ;;  %v8109_v50 = vpop.f32.mrf.mxu1 }
 0x38a   : > { %v3626_v5 = vadd.f32 %v8069_v23, %v10826_v34 }
 0x38b   : > { %v3545_v9 = vpop.f32.mrf.mxu0  ;;  %v3898_v40 = vpop.f32.mrf.mxu1 }
 0x38c   : > { %v10952_v21 = vadd.f32 %v8109_v50, %v3626_v5  ;;  %v3624_v43 = vadd.f32 %v3545_v9, %v10828_v62  ;;  %v2955_v5 = vadd.f32 %v10853_v15, %v2378_v41  ;;  %v12570_v15 = vld [vmem:[#allocation124_spill] sm:$0xff] }
 0x38d   : > { %v8070_v31 = vpop.f32.mrf.mxu0  ;;  %v8110_v45 = vpop.f32.mrf.mxu1 }
 0x38e   : > { %12565 = vst [vmem:[#allocation52_spill] sm:$0xff] %v10952_v21  ;;  %v10955_v60 = vadd.f32 %v3898_v40, %v3624_v43  ;;  %v3627_v37 = vadd.f32 %v8070_v31, %v10835_v0 }
 0x38f   : > { %v10958_v7 = vpop.f32.mrf.mxu0  ;;  %v10960_v29 = vpop.f32.mrf.mxu1 }
 0x390   : > { %12566 = vst [vmem:[#allocation28_spill] sm:$0xff] %v10955_v60  ;;  %12567 = vst [vmem:[#allocation65_spill] sm:$0xff] %v10960_v29  ;;  %v10964_v34 = vadd.f32 %v8110_v45, %v3627_v37  ;;  %v3308_v29 = vadd.f32 %v10855_v26, %v2955_v5  ;;  %v12569_v37 = vld [vmem:[#allocation121_spill] sm:$0xff] }
 0x391   : > { %v8073_v23 = vpop.f32.mrf.mxu0  ;;  %v8113_v50 = vpop.f32.mrf.mxu1  ;;  %v2394_v41 = vadd.f32 %v12570_v15, %v12569_v37  ;;  %v12572_v37 = vld [vmem:[#allocation58_spill] sm:$0xff] }
 0x392   : > { %v3630_v62 = vadd.f32 %v8073_v23, %v10848_v16 }
 0x393   : > { %v3561_v9 = vpop.f32.mrf.mxu0  ;;  %v3914_v40 = vpop.f32.mrf.mxu1 }
 0x394   : > { %v10968_v43 = vadd.f32 %v8113_v50, %v3630_v62  ;;  %v3628_v0 = vadd.f32 %v3561_v9, %v10850_v27  ;;  %v2959_v27 = vadd.f32 %v10875_v4, %v2394_v41 }
 0x395   : > { %v8074_v31 = vpop.f32.mrf.mxu0  ;;  %v8114_v60 = vpop.f32.mrf.mxu1 }
 0x396   : > { %v10972_v21 = vadd.f32 %v3914_v40, %v3628_v0  ;;  %v3631_v39 = vadd.f32 %v8074_v31, %v10857_v52 }
 0x397   : > { %v3564_v48 = vpop.f32.mrf.mxu0  ;;  %v3917_v45 = vpop.f32.mrf.mxu1 }
 0x398   : > { %12568 = vst [vmem:[#allocation71_spill] sm:$0xff] %v10972_v21  ;;  %v10977_v16 = vadd.f32 %v8114_v60, %v3631_v39  ;;  %v3629_v23 = vadd.f32 %v3564_v48, %v3308_v29  ;;  %v3312_v60 = vadd.f32 %v10877_v19, %v2959_v27 }
 0x399   : > { %v8077_v50 = vpop.f32.mrf.mxu0  ;;  %v8117_v62 = vpop.f32.mrf.mxu1 }
 0x39a   : > { %v10980_v9 = vadd.f32 %v3917_v45, %v3629_v23  ;;  %v3634_v26 = vadd.f32 %v8077_v50, %v10870_v35  ;;  %v12571_v45 = vld [vmem:[#allocation51_spill] sm:$0xff] }
 0x39b   : > { %v3577_v5 = vpop.f32.mrf.mxu0  ;;  %v3930_v40 = vpop.f32.mrf.mxu1  ;;  %v2410_v15 = vadd.f32 %v12572_v37, %v12571_v45 }
 0x39c   : > { %v10983_v0 = vadd.f32 %v8117_v62, %v3634_v26  ;;  %v3632_v52 = vadd.f32 %v3577_v5, %v10872_v51 }
 0x39d   : > { %v8078_v31 = vpop.f32.mrf.mxu0  ;;  %v8118_v21 = vpop.f32.mrf.mxu1  ;;  %v2963_v51 = vadd.f32 %v10893_v47, %v2410_v15 }
 0x39e   : > { %v10987_v39 = vadd.f32 %v3930_v40, %v3632_v52  ;;  %v3635_v29 = vadd.f32 %v8078_v31, %v10879_v63 }
 0x39f   : > { %v3580_v48 = vpop.f32.mrf.mxu0  ;;  %v3933_v4 = vpop.f32.mrf.mxu1 }
 0x3a0   : > { %v10992_v35 = vadd.f32 %v8118_v21, %v3635_v29  ;;  %v3633_v41 = vadd.f32 %v3580_v48, %v3312_v60  ;;  %v3316_v21 = vadd.f32 %v10895_v20, %v2963_v51 }
 0x3a1   : > { %v8081_v23 = vpop.f32.mrf.mxu0  ;;  %v8121_v50 = vpop.f32.mrf.mxu1 }
 0x3a2   : > { %v10995_v62 = vadd.f32 %v3933_v4, %v3633_v41  ;;  %v3638_v19 = vadd.f32 %v8081_v23, %v10888_v22  ;;  %v3288_v22 = vadd.f32 %v10742_v57, %v10747_v59 }
 0x3a3   : > { %v3593_v27 = vpop.f32.mrf.mxu0  ;;  %v3946_v26 = vpop.f32.mrf.mxu1 }
 0x3a4   : > { %v10998_v5 = vadd.f32 %v8121_v50, %v3638_v19  ;;  %v3636_v63 = vadd.f32 %v3593_v27, %v10890_v11  ;;  %v3609_v45 = vadd.f32 %v10906_v54, %v3288_v22  ;;  %v3292_v54 = vadd.f32 %v10764_v8, %v10769_v42 }
 0x3a5   : > { %v8082_v40 = vpop.f32.mrf.mxu0  ;;  %v11001_v52 = vpop.f32.mrf.mxu1 }
 0x3a6   : > { %v11004_v31 = vadd.f32 %v3946_v26, %v3636_v63  ;;  %v11007_v60 = vadd.f32 %v8082_v40, %v10897_v6  ;;  %v3962_v51 = vadd.f32 %v10908_v58, %v3609_v45 }
 0x3a7   : > { %v3596_v47 = vpop.f32.mrf.mxu0  ;;  %v11009_v29 = vpop.f32.mrf.mxu1 }
 0x3a8   : > { %v11013_v48 = vadd.f32 %v3596_v47, %v3316_v21 }
 0x3a9   : > { %v8133_v4 = vpop.f32.mrf.mxu0  ;;  %v8173_v11 = vpop.f32.mrf.mxu1 }
 0x3aa   : > { %v4316_v37 = vadd.f32 %v8133_v4, %v10900_v61 }
 0x3ab   : > { %v4187_v20 = vpop.f32.mrf.mxu0  ;;  %v4508_v15 = vpop.f32.mrf.mxu1 }
 0x3ac   : > { %v11017_v41 = vadd.f32 %v8173_v11, %v4316_v37  ;;  %v4314_v6 = vadd.f32 %v4187_v20, %v10903_v3  ;;  %v3613_v3 = vadd.f32 %v10919_v18, %v3292_v54  ;;  %v3296_v18 = vadd.f32 %v10786_v14, %v10791_v30 }
 0x3ad   : > { %v8134_v23 = vpop.f32.mrf.mxu0  ;;  %v8174_v50 = vpop.f32.mrf.mxu1 }
 0x3ae   : > { %v11021_v19 = vadd.f32 %v4508_v15, %v4314_v6  ;;  %v4317_v57 = vadd.f32 %v8134_v23, %v10910_v46  ;;  %v3966_v8 = vadd.f32 %v10921_v36, %v3613_v3 }
 0x3af   : > { %v4190_v59 = vpop.f32.mrf.mxu0  ;;  %v4511_v27 = vpop.f32.mrf.mxu1 }
 0x3b0   : > { %v11026_v61 = vadd.f32 %v8174_v50, %v4317_v57  ;;  %v4315_v26 = vadd.f32 %v4190_v59, %v3962_v51  ;;  %v3617_v50 = vadd.f32 %v10932_v49, %v3296_v18 }
 0x3b1   : > { %v8137_v63 = vpop.f32.mrf.mxu0  ;;  %v8177_v40 = vpop.f32.mrf.mxu1 }
 0x3b2   : > { %v11029_v21 = vadd.f32 %v4511_v27, %v4315_v26  ;;  %v4320_v58 = vadd.f32 %v8137_v63, %v10913_v12  ;;  %v3970_v59 = vadd.f32 %v10934_v10, %v3617_v50  ;;  %v3300_v27 = vadd.f32 %v10808_v44, %v10813_v1  ;;  %v12573_v26 = vld [vmem:[#allocation103_spill] sm:$0xff] }
 0x3b3   : > { %v4203_v47 = vpop.f32.mrf.mxu0  ;;  %v4524_v22 = vpop.f32.mrf.mxu1 }
 0x3b4   : > { %v11032_v4 = vadd.f32 %v8177_v40, %v4320_v58  ;;  %v4318_v46 = vadd.f32 %v4203_v47, %v10916_v33  ;;  %v3621_v40 = vadd.f32 %v10945_v17, %v3300_v27 }
 0x3b5   : > { %v8138_v11 = vpop.f32.mrf.mxu0  ;;  %v8178_v45 = vpop.f32.mrf.mxu1 }
 0x3b6   : > { %v11036_v42 = vadd.f32 %v4524_v22, %v4318_v46  ;;  %v4321_v37 = vadd.f32 %v8138_v11, %v10923_v25  ;;  %v3974_v44 = vadd.f32 %v10947_v38, %v3621_v40  ;;  %v12575_v11 = vld [vmem:[#allocation52_spill] sm:$0xff] }
 0x3b7   : > { %v4206_v20 = vpop.f32.mrf.mxu0  ;;  %v4527_v6 = vpop.f32.mrf.mxu1 }
 0x3b8   : > { %v11041_v15 = vadd.f32 %v8178_v45, %v4321_v37  ;;  %v4319_v12 = vadd.f32 %v4206_v20, %v3966_v8  ;;  %v12577_v8 = vld [vmem:[#allocation28_spill] sm:$0xff] }
 0x3b9   : > { %v8141_v23 = vpop.f32.mrf.mxu0 }
 0x3ba   : > { %v11044_v33 = vadd.f32 %v4527_v6, %v4319_v12  ;;  %v11047_v51 = vadd.f32 %v8141_v23, %v10926_v56  ;;  %v12574_v56 = vld [vmem:[#allocation100_spill] sm:$0xff] }
 0x3bb   : > { %v4219_v36 = vpop.f32.mrf.mxu0  ;;  %v2362_v63 = vadd.f32 %v12574_v56, %v12573_v26 }
 0x3bc   : > { %v11050_v57 = vadd.f32 %v4219_v36, %v10929_v28 }
 0x3bd   : > { %v8142_v25 = vpop.f32.mrf.mxu0  ;;  %v2951_v10 = vadd.f32 %v10831_v32, %v2362_v63  ;;  %v11081_v32 = vpop.f32.mrf.mxu1 }
 0x3be   : > { %v11054_v14 = vadd.f32 %v8142_v25, %v10936_v55  ;;  %v12582_v25 = vld [vmem:[#allocation71_spill] sm:$0xff] }
 0x3bf   : > { %v4222_v30 = vpop.f32.mrf.mxu0  ;;  %v3304_v22 = vadd.f32 %v10833_v2, %v2951_v10  ;;  %v11090_v2 = vpop.f32.mrf.mxu1 }
 0x3c0   : > { %v11058_v49 = vadd.f32 %v4222_v30, %v3970_v59 }
 0x3c1   : > { %v8145_v54 = vpop.f32.mrf.mxu0  ;;  %v11097_v50 = vpop.f32.mrf.mxu1 }
 0x3c2   : > { %v11064_v28 = vadd.f32 %v8145_v54, %v10939_v24  ;;  %v3625_v24 = vadd.f32 %v10958_v7, %v3304_v22 }
 0x3c3   : > { %v4235_v3 = vpop.f32.mrf.mxu0 }
 0x3c4   : > { %v11068_v55 = vadd.f32 %v4235_v3, %v10942_v53 }
 0x3c5   : > { %v8146_v58 = vpop.f32.mrf.mxu0 }
 0x3c6   : > { %v11072_v1 = vadd.f32 %v8146_v58, %v10949_v13  ;;  %v12579_v13 = vld [vmem:[#allocation65_spill] sm:$0xff] }
 0x3c7   : > { %v4238_v47 = vpop.f32.mrf.mxu0  ;;  %v3978_v20 = vadd.f32 %v12579_v13, %v3625_v24 }
 0x3c8   : > { %v11075_v46 = vadd.f32 %v4238_v47, %v3974_v44 }
 0x3c9   : > { %v8149_v17 = vpop.f32.mrf.mxu0 }
 0x3ca   : > { %v11079_v45 = vadd.f32 %v8149_v17, %v12575_v11 }
 0x3cb   : > { %v4251_v53 = vpop.f32.mrf.mxu0 }
 0x3cc   : > { %12576 = vst [vmem:[#allocation64_spill] sm:$0xff] %v11079_v45  ;;  %v11084_v37 = vadd.f32 %v4251_v53, %v12577_v8 }
 0x3cd   : > { %v8150_v38 = vpop.f32.mrf.mxu0 }
 0x3ce   : > { %12578 = vst [vmem:[#allocation63_spill] sm:$0xff] %v11084_v37  ;;  %v11088_v18 = vadd.f32 %v8150_v38, %v10964_v34  ;;  %v11105_v34 = vpop.f32.mrf.mxu1 }
 0x3cf   : > { %v4254_v12 = vpop.f32.mrf.mxu0 }
 0x3d0   : > { %12580 = vst [vmem:[#allocation29_spill] sm:$0xff] %v11088_v18  ;;  %v11092_v6 = vadd.f32 %v4254_v12, %v3978_v20  ;;  %v11113_v63 = vpop.f32.mrf.mxu1 }
 0x3d1   : > { %v8153_v7 = vpop.f32.mrf.mxu0 }
 0x3d2   : > { %12581 = vst [vmem:[#allocation59_spill] sm:$0xff] %v11092_v6  ;;  %v11095_v23 = vadd.f32 %v8153_v7, %v10968_v43  ;;  %v11121_v58 = vpop.f32.mrf.mxu1 }
 0x3d3   : > { %v4267_v36 = vpop.f32.mrf.mxu0 }
 0x3d4   : > { %v11100_v59 = vadd.f32 %v4267_v36, %v12582_v25  ;;  %v11129_v22 = vpop.f32.mrf.mxu1 }
 0x3d5   : > { %v8154_v30 = vpop.f32.mrf.mxu0 }
 0x3d6   : > { %12583 = vst [vmem:[#allocation53_spill] sm:$0xff] %v11100_v59  ;;  %v11103_v27 = vadd.f32 %v8154_v30, %v10977_v16  ;;  %v11134_v11 = vpop.f32.mrf.mxu1 }
 0x3d7   : > { %v4270_v54 = vpop.f32.mrf.mxu0 }
 0x3d8   : > { %v11108_v26 = vadd.f32 %v4270_v54, %v10980_v9 }
 0x3d9   : > { %v8157_v56 = vpop.f32.mrf.mxu0 }
 0x3da   : > { %12584 = vst [vmem:[#allocation54_spill] sm:$0xff] %v11108_v26  ;;  %v11111_v43 = vadd.f32 %v8157_v56, %v10983_v0 }
 0x3db   : > { %v4283_v40 = vpop.f32.mrf.mxu0 }
 0x3dc   : > { %v11116_v3 = vadd.f32 %v4283_v40, %v10987_v39 }
 0x3dd   : > { %v8158_v10 = vpop.f32.mrf.mxu0 }
 0x3de   : > { %v11119_v16 = vadd.f32 %v8158_v10, %v10992_v35 }
 0x3df   : > { %v4286_v44 = vpop.f32.mrf.mxu0 }
 0x3e0   : > { %v11124_v9 = vadd.f32 %v4286_v44, %v10995_v62  ;;  %v11139_v62 = vpop.f32.mrf.mxu1 }
 0x3e1   : > { %v8161_v47 = vpop.f32.mrf.mxu0  ;;  %12586 = vst [vmem:[#allocation77_spill] sm:$0xff] %v11139_v62 }
 0x3e2   : > { %v11127_v0 = vadd.f32 %v8161_v47, %v10998_v5 }
 0x3e3   : > { %v4299_v17 = vpop.f32.mrf.mxu0 }
 0x3e4   : > { %v11132_v39 = vadd.f32 %v4299_v17, %v11004_v31  ;;  %v11147_v31 = vpop.f32.mrf.mxu1 }
 0x3e5   : > { %v8162_v24 = vpop.f32.mrf.mxu0  ;;  %12589 = vst [vmem:[#allocation85_spill] sm:$0xff] %v11147_v31 }
 0x3e6   : > { %v11155_v25 = vpop.f32.mrf.mxu1 }
 0x3e7   : > { %v4302_v35 = vpop.f32.mrf.mxu0  ;;  %12592 = vst [vmem:[#allocation79_spill] sm:$0xff] %v11155_v25 }
 0x3e8   : > { %v11163_v56 = vpop.f32.mrf.mxu1 }
 0x3e9   : > { %v8213_v53 = vpop.f32.mrf.mxu0  ;;  %12595 = vst [vmem:[#allocation90_spill] sm:$0xff] %v11163_v56 }
 0x3ea   : > { %v11137_v8 = vadd.f32 %v8213_v53, %v11017_v41 }
 0x3eb   : > { %v4861_v38 = vpop.f32.mrf.mxu0 }
 0x3ec   : > { %12585 = vst [vmem:[#allocation73_spill] sm:$0xff] %v11137_v8  ;;  %v11142_v5 = vadd.f32 %v4861_v38, %v11021_v19 }
 0x3ed   : > { %v8214_v13 = vpop.f32.mrf.mxu0 }
 0x3ee   : > { %12587 = vst [vmem:[#allocation74_spill] sm:$0xff] %v11142_v5  ;;  %v11145_v20 = vadd.f32 %v8214_v13, %v11026_v61 }
 0x3ef   : > { %v4864_v12 = vpop.f32.mrf.mxu0 }
 0x3f0   : > { %12588 = vst [vmem:[#allocation31_spill] sm:$0xff] %v11145_v20  ;;  %v11150_v7 = vadd.f32 %v4864_v12, %v11029_v21 }
 0x3f1   : > { %v8217_v36 = vpop.f32.mrf.mxu0 }
 0x3f2   : > { %12590 = vst [vmem:[#allocation84_spill] sm:$0xff] %v11150_v7  ;;  %v11153_v41 = vadd.f32 %v8217_v36, %v11032_v4  ;;  %v11170_v4 = vpop.f32.mrf.mxu1 }
 0x3f3   : > { %v4877_v30 = vpop.f32.mrf.mxu0 }
 0x3f4   : > { %12591 = vst [vmem:[#allocation33_spill] sm:$0xff] %v11153_v41  ;;  %v11158_v19 = vadd.f32 %v4877_v30, %v11036_v42  ;;  %v11176_v42 = vpop.f32.mrf.mxu1 }
 0x3f5   : > { %v8218_v54 = vpop.f32.mrf.mxu0  ;;  %12597 = vst [vmem:[#allocation91_spill] sm:$0xff] %v11176_v42 }
 0x3f6   : > { %12593 = vst [vmem:[#allocation76_spill] sm:$0xff] %v11158_v19  ;;  %v11161_v61 = vadd.f32 %v8218_v54, %v11041_v15  ;;  %v11180_v53 = vpop.f32.mrf.mxu1 }
 0x3f7   : > { %v4880_v40 = vpop.f32.mrf.mxu0 }
 0x3f8   : > { %12594 = vst [vmem:[#allocation78_spill] sm:$0xff] %v11161_v61  ;;  %v11166_v21 = vadd.f32 %v4880_v40, %v11044_v33  ;;  %v11182_v12 = vpop.f32.mrf.mxu1 }
 0x3f9   : > { %v11168_v10 = vpop.f32.mrf.mxu0  ;;  %12598 = vst [vmem:[#allocation105_spill] sm:$0xff] %v11182_v12 }
 0x3fa   : > { %12596 = vst [vmem:[#allocation96_spill] sm:$0xff] %v11166_v21  ;;  %v8197_v30 = vpop.f32.mrf.mxu1 }
 0x3fb   : > { %v11172_v44 = vpop.f32.mrf.mxu0 }
 0x3fc   : > { %v4604_v5 = vpop.f32.mrf.mxu1 }
 0x3fd   : > { %v11174_v47 = vpop.f32.mrf.mxu0 }
 0x3fe   : > { %v8198_v31 = vpop.f32.mrf.mxu1 }
 0x3ff   : > { %v11178_v17 = vpop.f32.mrf.mxu0 }
 0x400   : > { %v4607_v56 = vpop.f32.mrf.mxu1 }
 0x401   : > { %v8225_v15 = vpop.f32.mrf.mxu0 }
 0x402   : > { %v8201_v19 = vpop.f32.mrf.mxu1 }
 0x403   : > { %v4909_v38 = vpop.f32.mrf.mxu0  ;;  %v4665_v12 = vadd.f32 %v8201_v19, %v11127_v0  ;;  %v12617_v19 = vld [vmem:[#allocation79_spill] sm:$0xff] }
 0x404   : > { %v4620_v45 = vpop.f32.mrf.mxu1 }
 0x405   : > { %v8226_v13 = vpop.f32.mrf.mxu0 }
 0x406   : > { %v8202_v25 = vpop.f32.mrf.mxu1 }
 0x407   : > { %v4912_v33 = vpop.f32.mrf.mxu0 }
 0x408   : > { %v4623_v61 = vpop.f32.mrf.mxu1 }
 0x409   : > { %v11184_v36 = vpop.f32.mrf.mxu0 }
 0x40a   : > { %12599 = vst [vmem:[#allocation104_spill] sm:$0xff] %v11184_v36 }
 0x40b   : > { %v11186_v54 = vpop.f32.mrf.mxu0 }
 0x40c   : > { %12600 = vst [vmem:[#allocation47_spill] sm:$0xff] %v11186_v54 }
 0x40d   : > { %v11188_v40 = vpop.f32.mrf.mxu0 }
 0x40e   : > { %12601 = vst [vmem:[#allocation98_spill] sm:$0xff] %v11188_v40  ;;  %v3992_v40 = vadd.f32 %v11001_v52, %v11007_v60  ;;  %v4649_v52 = vadd.f32 %v11113_v63, %v11064_v28  ;;  %v4662_v28 = vadd.f32 %v8198_v31, %v11119_v16 }
 0x40f   : > { %v11190_v7 = vpop.f32.mrf.mxu0 }
 0x410   : > { %12602 = vst [vmem:[#allocation95_spill] sm:$0xff] %v11190_v7  ;;  %v4345_v7 = vadd.f32 %v8162_v24, %v3992_v40 }
 0x411   : > { %v11192_v8 = vpop.f32.mrf.mxu0 }
 0x412   : > { %12603 = vst [vmem:[#allocation97_spill] sm:$0xff] %v11192_v8  ;;  %v4666_v59 = vadd.f32 %v8202_v25, %v4345_v7  ;;  %v12615_v25 = vld [vmem:[#allocation33_spill] sm:$0xff] }
 0x413   : > { %v11194_v37 = vpop.f32.mrf.mxu0 }
 0x414   : > { %12604 = vst [vmem:[#allocation108_spill] sm:$0xff] %v11194_v37  ;;  %v3990_v37 = vadd.f32 %v11009_v29, %v11013_v48  ;;  %v4648_v29 = vadd.f32 %v11134_v11, %v11075_v46  ;;  %v5002_v48 = vadd.f32 %v8225_v15, %v4649_v52  ;;  %v4661_v46 = vadd.f32 %v8197_v30, %v11111_v43  ;;  %v12623_v15 = vld [vmem:[#allocation76_spill] sm:$0xff]  ;;  %v12628_v30 = vld [vmem:[#allocation63_spill] sm:$0xff] }
 0x415   : > { %v11196_v20 = vpop.f32.mrf.mxu0 }
 0x416   : > { %12605 = vst [vmem:[#allocation113_spill] sm:$0xff] %v11196_v20  ;;  %v4343_v42 = vadd.f32 %v4302_v35, %v3990_v37  ;;  %v5001_v0 = vadd.f32 %v4912_v33, %v4648_v29  ;;  %v12608_v35 = vld [vmem:[#allocation54_spill] sm:$0xff]  ;;  %v12632_v29 = vld [vmem:[#allocation47_spill] sm:$0xff] }
 0x417   : > { %v11198_v6 = vpop.f32.mrf.mxu0 }
 0x418   : > { %12606 = vst [vmem:[#allocation109_spill] sm:$0xff] %v11198_v6  ;;  %v4650_v6 = vadd.f32 %v11129_v22, %v11072_v1  ;;  %v4664_v40 = vadd.f32 %v4623_v61, %v4343_v42  ;;  %v4663_v1 = vadd.f32 %v4620_v45, %v11132_v39  ;;  %v4645_v45 = vadd.f32 %v11081_v32, %v11047_v51  ;;  %v12622_v42 = vld [vmem:[#allocation98_spill] sm:$0xff] }
 0x419   : > { %v8237_v36 = vpop.f32.mrf.mxu0  ;;  %v4644_v22 = vadd.f32 %v11105_v34, %v11058_v49  ;;  %v4643_v51 = vadd.f32 %v11090_v2, %v11050_v57  ;;  %v4657_v34 = vadd.f32 %v11170_v4, %v11095_v23  ;;  %v12609_v57 = vld [vmem:[#allocation105_spill] sm:$0xff]  ;;  %v12620_v4 = vld [vmem:[#allocation64_spill] sm:$0xff] }
 0x41a   : > { %v5003_v60 = vadd.f32 %v8226_v13, %v4650_v6  ;;  %v5014_v16 = vadd.f32 %v8237_v36, %v4661_v46  ;;  %v4656_v2 = vadd.f32 %v12609_v57, %v12608_v35  ;;  %v12616_v23 = vld [vmem:[#allocation29_spill] sm:$0xff]  ;;  %v12627_v36 = vld [vmem:[#allocation31_spill] sm:$0xff] }
 0x41b   : > { %v4957_v62 = vpop.f32.mrf.mxu0  ;;  %v4997_v32 = vadd.f32 %v11178_v17, %v4644_v22  ;;  %v4996_v49 = vadd.f32 %v11172_v44, %v4643_v51  ;;  %v4654_v61 = vadd.f32 %v12617_v19, %v12616_v23  ;;  %v12621_v44 = vld [vmem:[#allocation77_spill] sm:$0xff]  ;;  %v8602_v46 = vld [vmem:[%s12166_s1 + $0x30] sm:$0xff] }
 0x41c   : > { %v8608_v22 = vld [vmem:[%s12166_s1 + $0x60] sm:$0xff]  ;;  %v8534_v51 = vld [vmem:[%s11954_s8 + $0x10] sm:$0xff]  }
 0x41d   : > { %v8238_v54 = vpop.f32.mrf.mxu0  ;;  %v5007_v17 = vadd.f32 %v12622_v42, %v4654_v61 }
 0x41e   : > { %v5015_v63 = vadd.f32 %v8238_v54, %v4662_v28  ;;  %v12629_v54 = vld [vmem:[#allocation85_spill] sm:$0xff]  ;;  %v8598_v28 = vld [vmem:[%s12166_s1 + $0x10] sm:$0xff] }
 0x41f   : > { %v4960_v21 = vpop.f32.mrf.mxu0  ;;  %v12614_v7 = vld [vmem:[#allocation109_spill] sm:$0xff]  ;;  %v4651_v52 = vadd.f32 %v12629_v54, %v12628_v30 }
 0x421   : > { %v8241_v18 = vpop.f32.mrf.mxu0 }
 0x422   : > { %v5018_v20 = vadd.f32 %v8241_v18, %v4665_v12  ;;  %v4646_v18 = vadd.f32 %v11097_v50, %v11054_v14  ;;  %v4998_v14 = vadd.f32 %v11168_v10, %v4645_v45  ;;  %v4659_v50 = vadd.f32 %v4604_v5, %v11116_v3  ;;  %v12607_v3 = vld [vmem:[#allocation113_spill] sm:$0xff]  ;;  %v12619_v10 = vld [vmem:[#allocation96_spill] sm:$0xff] }
 0x423   : > { %v4973_v41 = vpop.f32.mrf.mxu0  ;;  %v12626_v12 = vld [vmem:[#allocation104_spill] sm:$0xff]  ;;  %v8604_v45 = vld [vmem:[%s12166_s1 + $0x40] sm:$0xff] }
 0x424   : > { %v5016_v6 = vadd.f32 %v4973_v41, %v4663_v1  ;;  %v5012_v39 = vadd.f32 %v4957_v62, %v4659_v50  ;;  %v12613_v62 = vld [vmem:[#allocation91_spill] sm:$0xff]  ;;  %v5009_v41 = vadd.f32 %v12614_v7, %v4656_v2  ;;  %v12633_v1 = vld [vmem:[#allocation84_spill] sm:$0xff] }
 0x425   : > { %v8242_v8 = vpop.f32.mrf.mxu0  ;;  %v8610_v50 = vld [vmem:[%s12166_s1 + $0x70] sm:$0xff] }
 0x426   : > { %v5019_v26 = vadd.f32 %v8242_v8, %v4666_v59  ;;  %v4647_v59 = vadd.f32 %v11121_v58, %v11068_v55  ;;  %v4999_v55 = vadd.f32 %v11174_v47, %v4646_v18  ;;  %v4660_v58 = vadd.f32 %v4607_v56, %v11124_v9  ;;  %v12610_v8 = vld [vmem:[#allocation97_spill] sm:$0xff]  ;;  %v12618_v56 = vld [vmem:[#allocation108_spill] sm:$0xff] }
 0x427   : > { %v4976_v24 = vpop.f32.mrf.mxu0  ;;  %v4658_v9 = vadd.f32 %v11180_v53, %v11103_v27  ;;  %v5010_v5 = vadd.f32 %v12610_v8, %v4657_v34  ;;  %v12612_v27 = vld [vmem:[#allocation53_spill] sm:$0xff]  ;;  %v4653_v47 = vadd.f32 %v12621_v44, %v12620_v4  ;;  %v12624_v53 = vld [vmem:[#allocation59_spill] sm:$0xff] }
 0x428   : > { %7690 = vmatprep.subr.mxu1 %v5019_v26  ;;  %v5017_v37 = vadd.f32 %v4976_v24, %v4664_v40  ;;  %v5000_v26 = vadd.f32 %v4909_v38, %v4647_v59  ;;  %v5013_v43 = vadd.f32 %v4960_v21, %v4660_v58  ;;  %v4655_v31 = vadd.f32 %v12613_v62, %v12612_v27  ;;  %v12625_v38 = vld [vmem:[#allocation90_spill] sm:$0xff]  ;;  %v12631_v40 = vld [vmem:[#allocation73_spill] sm:$0xff]  ;;  %v8606_v58 = vld [vmem:[%s12166_s1 + $0x50] sm:$0xff] }
 0x429   : > { %7691 = vmatpush3.msra.mxu1 %v5003_v60  ;;  %v5011_v11 = vadd.f32 %v12607_v3, %v4658_v9  ;;  %v4652_v13 = vadd.f32 %v12625_v38, %v12624_v53  ;;  %v5006_v33 = vadd.f32 %v12626_v12, %v4653_v47  ;;  %v12630_v60 = vld [vmem:[#allocation95_spill] sm:$0xff]  ;;  %v8596_v59 = vld [vmem:[%s12166_s1] sm:$0xff] }
 0x42a   : > { %7692 = vmatprep.subr.mxu1 %v5018_v20  ;;  %v12611_v20 = vld [vmem:[#allocation78_spill] sm:$0xff]  ;;  %v5008_v21 = vadd.f32 %v12618_v56, %v4655_v31  ;;  %v8600_v18 = vld [vmem:[%s12166_s1 + $0x20] sm:$0xff] }
 0x42b   : > { %7693 = vmatpush3.msra.mxu1 %v5002_v48  ;;  %v5005_v24 = vadd.f32 %v12630_v60, %v4652_v13  ;;  %v5004_v48 = vadd.f32 %v12632_v29, %v4651_v52  ;;  %v8536_v9 = vld [vmem:[%s11954_s8] sm:$0xff]  }
 0x42c   : > { %7694 = vmatprep.subr.mxu1 %v5017_v37  ;;  %v12634_v37 = vld [vmem:[#allocation74_spill] sm:$0xff] }
 0x42d   : > { %7695 = vmatpush3.msra.mxu1 %v5001_v0  ;;  %v8597_v0 = vld [vmem:[%s12166_s1 + $0x18] sm:$0xff] }
 0x42e   : > { %7696 = vmatprep.subr.mxu1 %v5016_v6  ;;  %v8599_v6 = vld [vmem:[%s12166_s1 + $0x28] sm:$0xff] }
 0x42f   : > { %7697 = vmatpush3.msra.mxu1 %v5000_v26  ;;  %v8601_v26 = vld [vmem:[%s12166_s1 + $0x38] sm:$0xff] }
 0x430   : > { %7698 = vmatprep.subr.mxu1 %v5015_v63  ;;  %v8603_v63 = vld [vmem:[%s12166_s1 + $0x48] sm:$0xff] }
 0x431   : > { %7699 = vmatpush3.msra.mxu1 %v4999_v55  ;;  %v8605_v55 = vld [vmem:[%s12166_s1 + $0x58] sm:$0xff] }
 0x432   : > { %7700 = vmatprep.subr.mxu1 %v5014_v16  ;;  %v8607_v16 = vld [vmem:[%s12166_s1 + $0x68] sm:$0xff] }
 0x433   : > { %7701 = vmatpush3.msra.mxu1 %v4998_v14  ;;  %v8609_v14 = vld [vmem:[%s12166_s1 + $0x78] sm:$0xff] }
 0x434   : > { %7702 = vmatprep.subr.mxu1 %v5013_v43  ;;  %v8533_v43 = vld [vmem:[%s11954_s8 + $0x18] sm:$0xff]  }
 0x435   : > { %7703 = vmatpush3.msra.mxu1 %v4997_v32  ;;  %v8535_v32 = vld [vmem:[%s11954_s8 + $0x8] sm:$0xff]  }
 0x436   : > { %7704 = vmatprep.subr.mxu1 %v5012_v39  ;;  %v8537_v39 = vld [vmem:[%s11956_s10] sm:$0xff]  }
 0x437   : > { %7705 = vmatpush3.msra.mxu1 %v4996_v49  ;;  %8259 = vmatprep.subr.bf16.mxu0 %v8537_v39 }
 0x438   : > { %7706 = vmatprep.subr.mxu1 %v5011_v11  ;;  %8260 = vmatpush3.bf16.msra.mxu0 %v8537_v39  ;;  %v7311_v11 = vld [vmem:[%s11953_s7] ss:$0 sm:$0xff] }
 0x439   : > { %7707 = vmatpush3.msra.mxu1 %v12611_v20 }
 0x43a   : > { %7708 = vmatprep.subr.mxu1 %v5010_v5 }
 0x43b   : > { %7709 = vmatpush3.msra.mxu1 %v12615_v25 }
 0x43c   : > { %7710 = vmatprep.subr.mxu1 %v5009_v41 }
 0x43d   : > { %7711 = vmatpush3.msra.mxu1 %v12619_v10 }
 0x43e   : > { %7712 = vmatprep.subr.mxu1 %v5008_v21 }
 0x43f   : > { %7713 = vmatpush3.msra.mxu1 %v12623_v15 }
 0x440   : > { %7714 = vmatprep.subr.mxu1 %v5007_v17 }
 0x441   : > { %7715 = vmatpush3.msra.mxu1 %v12627_v36 }
 0x442   : > { %7716 = vmatprep.subr.mxu1 %v5006_v33 }
 0x443   : > { %7717 = vmatpush3.msra.mxu1 %v12631_v40 }
 0x444   : > { %7718 = vmatprep.subr.mxu1 %v5005_v24 }
 0x445   : > { %7719 = vmatpush3.msra.mxu1 %v12633_v1 }
 0x446   : > { %7720 = vmatprep.subr.mxu1 %v5004_v48 }
 0x447   : > { %7721 = vmatpush3.msra.mxu1 %v12634_v37 }
 0x448   : > { %5092 = vmatmul.mubr.f32.vlgmr.msra.gmra.mxu1 %v8596_v59  ;;  %8243 = vmatprep.subr.bf16.mxu1 %v8533_v43 }
 0x449   : > { %5096 = vmatprep.mubr.f32.mxu1 %v8597_v0  ;;  %8244 = vmatpush3.bf16.msra.mxu1 %v8533_v43 }
 0x44a   : > { %8245 = vmatprep.subr.bf16.mxu1 %v8534_v51 }
 0x44c   : > { %5097 = vmatmul.mubr.f32.gmra.mxu1 %v8598_v28  ;;  %v7312_v28 = vld [vmem:[%s11955_s9] ss:$0 sm:$0xff] }
 0x44d   : > { %5101 = vmatprep.mubr.f32.mxu1 %v8599_v6  ;;  %8246 = vmatpush3.bf16.msra.mxu1 %v8534_v51  ;;  %v12638_v51 = vld [vmem:[#allocation18_spill] sm:$0xff] }
 0x44e   : > { %8247 = vmatprep.subr.bf16.mxu1 %v8535_v32 }
 0x450   : > { %5102 = vmatmul.mubr.f32.gmra.mxu1 %v8600_v18  ;;  %v7061_v18 = vld [vmem:[%s11949_s3] ss:$0 sm:$0xff] }
 0x451   : > { %5106 = vmatprep.mubr.f32.mxu1 %v8601_v26  ;;  %8248 = vmatpush3.bf16.msra.mxu1 %v8535_v32  ;;  %v773_v32 = vadd.f32 %v7061_v18, %v12638_v51  ;;  %v12653_v51 = vld [vmem:[#allocation13_spill] sm:$0xff] }
 0x452   : > { %8249 = vmatprep.subr.bf16.mxu1 %v8536_v9 }
 0x454   : > { %5107 = vmatmul.mubr.f32.gmra.mxu1 %v8602_v46 }
 0x455   : > { %5111 = vmatprep.mubr.f32.mxu1 %v8603_v63  ;;  %8250 = vmatpush3.bf16.msra.mxu1 %v8536_v9 }
 0x458   : > { %5112 = vmatmul.mubr.f32.gmra.mxu1 %v8604_v45  ;;  %v12635_v45 = vld [vmem:[#allocation12_spill] sm:$0xff] }
 0x459   : > { %5116 = vmatprep.mubr.f32.mxu1 %v8605_v55  ;;  %v770_v55 = vadd.f32 %v7061_v18, %v12635_v45 }
 0x45c   : > { %5117 = vmatmul.mubr.f32.gmra.mxu1 %v8606_v58  ;;  %v12636_v58 = vld [vmem:[#allocation15_spill] sm:$0xff] }
 0x45d   : > { %5121 = vmatprep.mubr.f32.mxu1 %v8607_v16  ;;  %v781_v16 = vadd.f32 %v12636_v58, %v7061_v18 }
 0x460   : > { %5122 = vmatmul.mubr.f32.gmra.mxu1 %v8608_v22 }
 0x461   : > { %5126 = vmatprep.mubr.f32.mxu1 %v8609_v14  ;;  %v12637_v14 = vld [vmem:[#allocation11_spill] sm:$0xff] }
 0x464   : > { %5127 = vmatmul.mubr.f32.gmra.mxu1 %v8610_v50  ;;  %v778_v50 = vadd.f32 %v12637_v14, %v7061_v18 }
 0x508   : > { %v7722_v49 = vpop.f32.mrf.mxu1 }
 0x50a   : > { %v7723_v34 = vpop.f32.mrf.mxu1 }
 0x50b   : > { %v7724_v3 = vadd.f32 %v7723_v34, %v7722_v49 }
 0x50c   : > { %v7725_v35 = vpop.f32.mrf.mxu1 }
 0x50d   : > { %v5094_v2 = vadd.f32 %v7724_v3, %v7311_v11 }
 0x50e   : > { %v7726_v57 = vpop.f32.mrf.mxu1 }
 0x50f   : > { %v7727_v8 = vadd.f32 %v7726_v57, %v7725_v35  ;;  %v5132_v62 = vmax.f32 %v5094_v2, 0.0 }
 0x510   : > { %v7728_v5 = vpop.f32.mrf.mxu1 }
 0x511   : > { %v5099_v20 = vadd.f32 %v7727_v8, %v7311_v11 }
 0x512   : > { %v7729_v27 = vpop.f32.mrf.mxu1 }
 0x513   : > { %v5133_v31 = vmax.f32 %v5099_v20, 0.0  ;;  %v7730_v7 = vadd.f32 %v7729_v27, %v7728_v5 }
 0x514   : > { %v7731_v41 = vpop.f32.mrf.mxu1 }
 0x515   : > { %v5140_v25 = vpack.c.bf16 %v5133_v31, %v5132_v62  ;;  %v5104_v19 = vadd.f32 %v7730_v7, %v7311_v11 }
 0x516   : > { %v7732_v23 = vpop.f32.mrf.mxu1 }
 0x517   : > { %v7733_v61 = vadd.f32 %v7732_v23, %v7731_v41  ;;  %8251 = vmatprep.mubr.msk.bf16.mxu1 %vm1132_vm2, %v5140_v25  ;;  %v5134_v4 = vmax.f32 %v5104_v19, 0.0  ;;  %v12643_v41 = vld [vmem:[#allocation21_spill] sm:$0xff]  ;;  %v12644_v23 = vld [vmem:[#allocation22_spill] sm:$0xff] }
 0x518   : > { %v7734_v56 = vpop.f32.mrf.mxu1  ;;  %v786_v25 = vadd.f32 %v7061_v18, %v12643_v41  ;;  %v797_v19 = vadd.f32 %v12644_v23, %v7061_v18 }
 0x519   : > { %v5109_v21 = vadd.f32 %v7733_v61, %v7311_v11 }
 0x51a   : > { %v7735_v10 = vpop.f32.mrf.mxu1 }
 0x51b   : > { %v5135_v44 = vmax.f32 %v5109_v21, 0.0  ;;  %v7736_v47 = vadd.f32 %v7735_v10, %v7734_v56  ;;  %v12645_v56 = vld [vmem:[#allocation19_spill] sm:$0xff] }
 0x51c   : > { %v7737_v42 = vpop.f32.mrf.mxu1  ;;  %v794_v21 = vadd.f32 %v12645_v56, %v7061_v18 }
 0x51d   : > { %v5141_v17 = vpack.c.bf16 %v5135_v44, %v5134_v4  ;;  %v5114_v53 = vadd.f32 %v7736_v47, %v7311_v11  ;;  %v12646_v4 = vld [vmem:[#allocation24_spill] sm:$0xff] }
 0x51e   : > { %v7738_v15 = vpop.f32.mrf.mxu1  ;;  %v789_v44 = vadd.f32 %v7061_v18, %v12646_v4 }
 0x51f   : > { %v7739_v38 = vadd.f32 %v7738_v15, %v7737_v42  ;;  %8252 = vmatmul.mubr.msk.bf16.vlgmr.msra.gmra.mxu1 %vm1132_vm2, %v5141_v17  ;;  %v5136_v36 = vmax.f32 %v5114_v53, 0.0 }
 0x520   : > { %v7740_v13 = vpop.f32.mrf.mxu1 }
 0x521   : > { %v5119_v12 = vadd.f32 %v7739_v38, %v7311_v11 }
 0x522   : > { %v7741_v33 = vpop.f32.mrf.mxu1 }
 0x523   : > { %v5137_v30 = vmax.f32 %v5119_v12, 0.0  ;;  %v7742_v54 = vadd.f32 %v7741_v33, %v7740_v13 }
 0x524   : > { %v7743_v52 = vpop.f32.mrf.mxu1 }
 0x525   : > { %v5142_v60 = vpack.c.bf16 %v5137_v30, %v5136_v36  ;;  %v5124_v40 = vadd.f32 %v7742_v54, %v7311_v11  ;;  %v8538_v54 = vld [vmem:[%s11958_s12 + $0x38] sm:$0xff]  }
 0x526   : > { %v7744_v24 = vpop.f32.mrf.mxu1  ;;  %8269 = vmatprep.subr.bf16.mxu1 %v8538_v54 }
 0x527   : > { %v7745_v29 = vadd.f32 %v7744_v24, %v7743_v52  ;;  %8255 = vmatprep.mubr.msk.bf16.mxu1 %vm1132_vm2, %v5142_v60  ;;  %v5138_v1 = vmax.f32 %v5124_v40, 0.0  ;;  %v8539_v52 = vld [vmem:[%s11958_s12 + $0x18] sm:$0xff]   ;;  %v8540_v60 = vld [vmem:[%s11958_s12 + $0x30] sm:$0xff]   ;;  %8270 = vmatpush3.bf16.msra.mxu1 %v8538_v54  ;;  %v8542_v40 = vld [vmem:[%s11958_s12 + $0x28] sm:$0xff]  }
 0x528   : > { %v8541_v24 = vld [vmem:[%s11958_s12 + $0x10] sm:$0xff]   ;;  %8285 = vmatprep.subr.bf16.mxu0 %v8539_v52  ;;  %8271 = vmatprep.subr.bf16.mxu1 %v8540_v60 }
 0x529   : > { %v5129_v48 = vadd.f32 %v7745_v29, %v7311_v11  ;;  %v8543_v29 = vld [vmem:[%s11958_s12 + $0x8] sm:$0xff]  }
 0x52b   : > { %v5139_v37 = vmax.f32 %v5129_v48, 0.0  ;;  %8272 = vmatpush3.bf16.msra.mxu1 %v8540_v60  ;;  %v8544_v48 = vld [vmem:[%s11958_s12 + $0x20] sm:$0xff]  }
 0x52c   : > { %8273 = vmatprep.subr.bf16.mxu1 %v8542_v40 }
 0x52d   : > { %v5143_v59 = vpack.c.bf16 %v5139_v37, %v5138_v1  ;;  %v8545_v1 = vld [vmem:[%s11958_s12] sm:$0xff]   ;;  %v11414_v37 = vld [vmem:[%s11958_s12 + $0x58] sm:$0xff]  }
 0x52f   : > { %8256 = vmatmul.mubr.msk.bf16.gmra.mxu1 %vm1132_vm2, %v5143_v59  ;;  %v11419_v59 = vld [vmem:[%s11958_s12 + $0x78] sm:$0xff]  }
 0x530   : > { %8274 = vmatpush3.bf16.msra.mxu1 %v8542_v40 }
 0x531   : > { %8275 = vmatprep.subr.bf16.mxu1 %v8544_v48 }
 0x534   : > { %8276 = vmatpush3.bf16.msra.mxu1 %v8544_v48 }
 0x535   : > { %8301 = vmatprep.subr.bf16.mxu1 %v11414_v37 }
 0x5df   : > { %v8253_v0 = vpop.f32.mrf.mxu1 }
 0x5e0   : > { %v5238_v46 = vadd.f32 %v8253_v0, %v7312_v28  ;;  %v11426_v0 = vld [vmem:[%s11957_s11] ss:$0 sm:$0xff] }
 0x5e1   : > { %v5229_v6 = vpop.f32.mrf.mxu1 }
 0x5e2   : > { %v5230_v26 = vadd.f32 %v7312_v28, %v5229_v6  ;;  %v11343_v34 = vadd.f32 %v5238_v46, %v778_v50  ;;  %v12652_v46 = vld [vmem:[#allocation14_spill] sm:$0xff] }
 0x5e3   : > { %v8254_v63 = vpop.f32.mrf.mxu1 }
 0x5e4   : > { %v5241_v22 = vadd.f32 %v8254_v63, %v7312_v28  ;;  %v11339_v9 = vadd.f32 %v5230_v26, %v770_v55  ;;  %12641 = vst [vmem:[#allocation122_spill] sm:$0xff] %v11343_v34  ;;  %v12149_v2 = vmax.f32 %v11343_v34, 0.0  ;;  %v5437_v63 = vand.u32 7, %v12652_v46 }
 0x5e5   : > { %v5232_v43 = vpop.f32.mrf.mxu1 }
 0x5e6   : > { %12639 = vst [vmem:[#allocation67_spill] sm:$0xff] %v11339_v9  ;;  %v11341_v39 = vadd.f32 %v5241_v22, %v781_v16  ;;  %v5233_v49 = vadd.f32 %v7312_v28, %v5232_v43  ;;  %v12148_v35 = vmax.f32 %v11339_v9, 0.0  ;;  %v5531_v43 = vadd.s32 4294967295, %v5437_v63 }
 0x5e8   : > { %12640 = vst [vmem:[#allocation123_spill] sm:$0xff] %v11341_v39  ;;  %v11345_v3 = vadd.f32 %v5233_v49, %v773_v32  ;;  %v12147_v11 = vmax.f32 %v11341_v39, 0.0  ;;  %v5444_v32 = vand.u32 7, %v12653_v51  ;;  %vm5539_vm7 = vcmp.ge.s32.totalorder %v5531_v43, 0  ;;  %v11570_v51 = vld [vmem:[%s11958_s12 + $0x98] sm:$0xff]  }
 0x5ea   : > { %12642 = vst [vmem:[#allocation116_spill] sm:$0xff] %v11345_v3  ;;  %v12146_v57 = vmax.f32 %v11345_v3, 0.0  ;;  %v5277_v5 = vpack.c.bf16 %v12147_v11, %v12149_v2 }
 0x5ec   : > { %v5276_v8 = vpack.c.bf16 %v12146_v57, %v12148_v35 }
 0x5ee   : > { %8261 = vmatprep.mubr.msk.bf16.mxu0 %vm5295_vm5, %v5276_v8  ;;  %v12654_v8 = vld [vmem:[#allocation17_spill] sm:$0xff] }
 0x5ef   : > { %v8257_v20 = vpop.f32.mrf.mxu1  ;;  %8262 = vmatmul.mubr.msk.bf16.vlgmr.msra.gmra.mxu0 %vm5295_vm5, %v5277_v5  ;;  %v5451_v5 = vand.u32 7, %v12654_v8 }
 0x5f0   : > { %v5254_v31 = vadd.f32 %v8257_v20, %v7312_v28  ;;  %8286 = vmatpush3.bf16.msra.mxu0 %v8539_v52  ;;  %v12656_v52 = vld [vmem:[#allocation16_spill] sm:$0xff] }
 0x5f1   : > { %v5245_v27 = vpop.f32.mrf.mxu1  ;;  %8287 = vmatprep.subr.bf16.mxu0 %v8541_v24  ;;  %v5533_v23 = vadd.s32 4294967295, %v5451_v5  ;;  %v5458_v60 = vand.u32 7, %v12656_v52 }
 0x5f2   : > { %v5246_v62 = vadd.f32 %v7312_v28, %v5245_v27  ;;  %v11369_v15 = vadd.f32 %v5254_v31, %v794_v21  ;;  %v5522_v31 = vld [vmem:[#allocation2] sm:$0xff] }
 0x5f3   : > { %v8258_v7 = vpop.f32.mrf.mxu1  ;;  %vm5541_vm9 = vcmp.ge.s32.totalorder %v5533_v23, 0  ;;  %v12659_v23 = vld [vmem:[#allocation23_spill] sm:$0xff] }
 0x5f4   : > { %v5257_v61 = vadd.f32 %v8258_v7, %v7312_v28  ;;  %v11365_v47 = vadd.f32 %v5246_v62, %v786_v25  ;;  %12649 = vst [vmem:[#allocation129_spill] sm:$0xff] %v11369_v15  ;;  %v12145_v33 = vmax.f32 %v11369_v15, 0.0  ;;  %8288 = vmatpush3.bf16.msra.mxu0 %v8541_v24  ;;  %v12655_v7 = vmov 0.0   ;;  %v12657_v24 = vld [vmem:[#allocation25_spill] sm:$0xff] }
 0x5f5   : > { %v5248_v10 = vpop.f32.mrf.mxu1  ;;  %8289 = vmatprep.subr.bf16.mxu0 %v8543_v29  ;;  %v5532_v25 = vadd.s32 4294967295, %v5444_v32  ;;  %v5465_v40 = vand.u32 7, %v12657_v24 }
 0x5f6   : > { %12647 = vst [vmem:[#allocation115_spill] sm:$0xff] %v11365_v47  ;;  %v11367_v42 = vadd.f32 %v5257_v61, %v797_v19  ;;  %v5249_v17 = vadd.f32 %v7312_v28, %v5248_v10  ;;  %v12144_v13 = vmax.f32 %v11365_v47, 0.0  ;;  %v12651_v28 = vld [vmem:[#allocation10_spill] sm:$0xff]  ;;  %v11452_v61 = vsel %vm5539_vm7, 1.0, %v12655_v7 }
 0x5f7   : > { %v5430_v6 = vand.u32 7, %v12651_v28  ;;  %v5598_v19 = vld [vmem:[#allocation2 + $0x1] sm:$0xff]  ;;  %vm5540_vm8 = vcmp.ge.s32.totalorder %v5532_v25, 0  ;;  %v5535_v25 = vadd.s32 4294967295, %v5465_v40 }
 0x5f8   : > { %12648 = vst [vmem:[#allocation117_spill] sm:$0xff] %v11367_v42  ;;  %v11371_v53 = vadd.f32 %v5249_v17, %v789_v44  ;;  %v12143_v38 = vmax.f32 %v11367_v42, 0.0  ;;  %8290 = vmatpush3.bf16.msra.mxu0 %v8543_v29 }
 0x5f9   : > { %8291 = vmatprep.subr.bf16.mxu0 %v8545_v1  ;;  %v5530_v16 = vadd.s32 4294967295, %v5430_v6  ;;  %vm5543_vm11 = vcmp.ge.s32.totalorder %v5535_v25, 0  ;;  %v5830_v25 = vadd.s32 1, %v5444_v32  ;;  %v5832_v32 = vadd.s32 1, %v5458_v60 }
 0x5fa   : > { %12650 = vst [vmem:[#allocation134_spill] sm:$0xff] %v11371_v53  ;;  %v12142_v12 = vmax.f32 %v11371_v53, 0.0  ;;  %v5279_v30 = vpack.c.bf16 %v12143_v38, %v12145_v33 }
 0x5fb   : > { %vm5538_vm6 = vcmp.ge.s32.totalorder %v5530_v16, 0  ;;  %vm5846_vm0 = vcmp.lt.s32.totalorder %v5830_v25, 8  ;;  %vm5848_vm3 = vcmp.lt.s32.totalorder %v5832_v32, 8 }
 0x5fc   : > { %v5278_v36 = vpack.c.bf16 %v12142_v12, %v12144_v13  ;;  %8292 = vmatpush3.bf16.msra.mxu0 %v8545_v1  ;;  %v11444_v41 = vsel %vm5538_vm6, 1.0, %v12655_v7  ;;  %v11627_v32 = vsel %vm5846_vm0, 1.0, %v12655_v7 }
 0x5fd   : > { %8317 = vmatprep.subr.bf16.mxu0 %v11419_v59  ;;  %v5578_v56 = vmul.f32 %v11444_v41, %v5522_v31  ;;  %v5534_v31 = vadd.s32 4294967295, %v5458_v60  ;;  %v11593_v60 = vld [vmem:[%s11958_s12 + $0xb8] sm:$0xff]  }
 0x5fe   : > { %8265 = vmatprep.mubr.msk.bf16.mxu0 %vm5295_vm5, %v5278_v36 }
 0x5ff   : > { %8266 = vmatmul.mubr.msk.bf16.gmra.mxu0 %vm5295_vm5, %v5279_v30  ;;  %vm5542_vm10 = vcmp.ge.s32.totalorder %v5534_v31, 0 }
 0x6af   : > { %v8263_v18 = vpop.f32.mrf.mxu0 }
 0x6b0   : > { %v5351_v26 = vadd.f32 %v8263_v18, %v11426_v0 }
 0x6b1   : > { %v5342_v45 = vpop.f32.mrf.mxu0 }
 0x6b2   : > { %v5375_v55 = vmax.f32 %v5351_v26, 0.0  ;;  %v5343_v58 = vadd.f32 %v11426_v0, %v5342_v45  ;;  %v11475_v26 = vsel %vm5540_vm8, 1.0, %v12655_v7  ;;  %v11478_v45 = vsel %vm5541_vm9, 1.0, %v12655_v7 }
 0x6b3   : > { %v8264_v22 = vpop.f32.mrf.mxu0 }
 0x6b4   : > { %5420 = vst.msk [vmem:[#allocation2 + $0x19] sm:$0xff] %vm1132_vm2, %v5375_v55  ;;  %v5373_v14 = vmax.f32 %v5343_v58, 0.0  ;;  %v5354_v50 = vadd.f32 %v8264_v22, %v11426_v0 }
 0x6b5   : > { %v5345_v49 = vpop.f32.mrf.mxu0 }
 0x6b6   : > { %5418 = vst.msk [vmem:[#allocation2 + $0x9] sm:$0xff] %vm1132_vm2, %v5373_v14  ;;  %v5376_v20 = vmax.f32 %v5354_v50, 0.0  ;;  %v5346_v27 = vadd.f32 %v11426_v0, %v5345_v49  ;;  %v8548_v14 = vld [vmem:[%s11958_s12 + $0x50] sm:$0xff]   ;;  %v12658_v50 = vld [vmem:[#allocation20_spill] sm:$0xff] }
 0x6b7   : > { %v5472_v43 = vand.u32 7, %v12658_v50 }
 0x6b8   : > { %5421 = vst.msk [vmem:[#allocation2 + $0x21] sm:$0xff] %vm1132_vm2, %v5376_v20  ;;  %v5374_v62 = vmax.f32 %v5346_v27, 0.0 }
 0x6b9   : > { %v5536_v28 = vadd.s32 4294967295, %v5472_v43 }
 0x6ba   : > { %5419 = vst.msk [vmem:[#allocation2 + $0x11] sm:$0xff] %vm1132_vm2, %v5374_v62 }
 0x6bb   : > { %v11464_v54 = vld [vmem:[#allocation2 + $0x19] sm:$0xff]  ;;  %vm5544_vm14 = vcmp.ge.s32.totalorder %v5536_v28, 0 }
 0x6bd   : > { %v11455_v21 = vld [vmem:[#allocation2 + $0x9] sm:$0xff] }
 0x6be   : > { %v11457_v10 = vld [vmem:[#allocation2 + $0x8] sm:$0xff]  ;;  %v5606_v4 = vpack.c.bf16 %v11455_v21, %v5598_v19  ;;  %v5479_v19 = vand.u32 7, %v12659_v23 }
 0x6bf   : > { %v5579_v44 = vmul.f32 %v11452_v61, %v11457_v10  ;;  %v8267_v17 = vpop.f32.mrf.mxu0  ;;  %v11530_v46 = vld [vmem:[#allocation2 + $0x20] sm:$0xff] }
 0x6c0   : > { %v5367_v36 = vadd.f32 %v8267_v17, %v11426_v0  ;;  %8277 = vmatprep.mubr.msk.bf16.mxu1 %vm1132_vm2, %v5606_v4  ;;  %v5828_v17 = vadd.s32 1, %v5430_v6  ;;  %v8551_v6 = vld [vmem:[%s11958_s12 + $0x68] sm:$0xff]   ;;  %v11623_v33 = vld [vmem:[#allocation2 + $0x1a] sm:$0xff]  ;;  %v6016_v23 = vmul.f32 %v11478_v45, %v11530_v46 }
 0x6c1   : > { %v5586_v30 = vpack.c.bf16 %v5579_v44, %v5578_v56  ;;  %v5358_v29 = vpop.f32.mrf.mxu0  ;;  %v11468_v48 = vld [vmem:[#allocation2 + $0x11] sm:$0xff] }
 0x6c2   : > { %v11470_v1 = vld [vmem:[#allocation2 + $0x10] sm:$0xff]  ;;  %v11472_v18 = vld [vmem:[#allocation2 + $0x18] sm:$0xff]  ;;  %v5379_v55 = vmax.f32 %v5367_v36, 0.0  ;;  %v5359_v58 = vadd.f32 %v11426_v0, %v5358_v29  ;;  %v11484_v16 = vpack.c.bf16 %v11464_v54, %v11468_v48  ;;  %v5829_v36 = vadd.s32 1, %v5437_v63 }
 0x6c3   : > { %8293 = vmatprep.mubr.msk.bf16.mxu0 %vm1132_vm2, %v5586_v30  ;;  %v5580_v22 = vmul.f32 %v11475_v26, %v11470_v1  ;;  %v8268_v49 = vpop.f32.mrf.mxu0  ;;  %v5581_v20 = vmul.f32 %v11478_v45, %v11472_v18  ;;  %v8549_v44 = vld [vmem:[%s11958_s12 + $0x70] sm:$0xff]   ;;  %vm5844_vm12 = vcmp.lt.s32.totalorder %v5828_v17, 8  ;;  %v11533_v63 = vsel %vm5542_vm10, 1.0, %v12655_v7 }
 0x6c4   : > { %5424 = vst.msk [vmem:[#allocation2 + $0x39] sm:$0xff] %vm1132_vm2, %v5379_v55  ;;  %v5377_v27 = vmax.f32 %v5359_v58, 0.0  ;;  %v5370_v62 = vadd.f32 %v8268_v49, %v11426_v0  ;;  %8278 = vmatmul.mubr.msk.bf16.vlgmr.msra.gmra.mxu1 %vm1132_vm2, %v11484_v16  ;;  %vm5845_vm13 = vcmp.lt.s32.totalorder %v5829_v36, 8  ;;  %v11536_v58 = vsel %vm5543_vm11, 1.0, %v12655_v7  ;;  %v5820_v36 = vld [vmem:[#allocation2 + $0x2] sm:$0xff]  ;;  %v11616_v12 = vld [vmem:[#allocation2 + $0x12] sm:$0xff] }
 0x6c5   : > { %v5361_v56 = vpop.f32.mrf.mxu0  ;;  %v5587_v4 = vpack.c.bf16 %v5581_v20, %v5580_v22  ;;  %8302 = vmatpush3.bf16.msra.mxu1 %v11414_v37  ;;  %v8550_v37 = vld [vmem:[%s11958_s12 + $0x48] sm:$0xff]   ;;  %v11544_v49 = vsel %vm5845_vm13, 1.0, %v12655_v7  ;;  %v8553_v20 = vld [vmem:[%s11958_s12 + $0x60] sm:$0xff]   ;;  %v6014_v28 = vmul.f32 %v11452_v61, %v11470_v1 }
 0x6c6   : > { %5422 = vst.msk [vmem:[#allocation2 + $0x29] sm:$0xff] %vm1132_vm2, %v5377_v27  ;;  %v5380_v30 = vmax.f32 %v5370_v62, 0.0  ;;  %v5362_v29 = vadd.f32 %v11426_v0, %v5361_v56  ;;  %8303 = vmatprep.subr.bf16.mxu1 %v8548_v14  ;;  %v5537_v0 = vadd.s32 4294967295, %v5479_v19  ;;  %v11538_v22 = vld [vmem:[#allocation2 + $0xa] sm:$0xff]  ;;  %v11549_v27 = vld [vmem:[#allocation2 + $0x21] sm:$0xff]  ;;  %v5831_v56 = vadd.s32 1, %v5451_v5 }
 0x6c7   : > { %8294 = vmatmul.mubr.msk.bf16.vlgmr.msra.gmra.mxu0 %vm1132_vm2, %v5587_v4  ;;  %v5877_v8 = vmul.f32 %v11544_v49, %v11538_v22  ;;  %v5833_v5 = vadd.s32 1, %v5465_v40 }
 0x6c8   : > { %5425 = vst.msk [vmem:[#allocation2 + $0x41] sm:$0xff] %vm1132_vm2, %v5380_v30  ;;  %v5378_v55 = vmax.f32 %v5362_v29, 0.0  ;;  %8318 = vmatpush3.bf16.msra.mxu0 %v11419_v59  ;;  %v8552_v59 = vld [vmem:[%s11958_s12 + $0x40] sm:$0xff]   ;;  %vm5545_vm15 = vcmp.ge.s32.totalorder %v5537_v0, 0  ;;  %vm5847_vm1 = vcmp.lt.s32.totalorder %v5831_v56, 8  ;;  %v5834_v56 = vadd.s32 1, %v5472_v43 }
 0x6c9   : > { %8304 = vmatpush3.bf16.msra.mxu1 %v8548_v14  ;;  %8319 = vmatprep.subr.bf16.mxu0 %v8549_v44  ;;  %v11541_v14 = vsel %vm5844_vm12, 1.0, %v12655_v7  ;;  %v11588_v52 = vsel %vm5545_vm15, 1.0, %v12655_v7  ;;  %vm5849_vm4 = vcmp.lt.s32.totalorder %v5833_v5, 8 }
 0x6ca   : > { %5423 = vst.msk [vmem:[#allocation2 + $0x31] sm:$0xff] %vm1132_vm2, %v5378_v55  ;;  %8305 = vmatprep.subr.bf16.mxu1 %v8550_v37  ;;  %v5876_v40 = vmul.f32 %v11541_v14, %v5820_v36  ;;  %v11643_v25 = vsel %vm5849_vm4, 1.0, %v12655_v7  ;;  %vm5850_vm6 = vcmp.lt.s32.totalorder %v5834_v56, 8 }
 0x6cb   : > { %v11580_v29 = vld [vmem:[#allocation2 + $0x39] sm:$0xff] }
 0x6cc   : > { %8320 = vmatpush3.bf16.msra.mxu0 %v8549_v44  ;;  %v5582_v44 = vmul.f32 %v11533_v63, %v11530_v46  ;;  %v5884_v36 = vpack.c.bf16 %v5877_v8, %v5876_v40  ;;  %v11634_v8 = vsel %vm5848_vm3, 1.0, %v12655_v7  ;;  %v5835_v40 = vadd.s32 1, %v5479_v19 }
 0x6cd   : > { %v11551_v62 = vld [vmem:[#allocation2 + $0x29] sm:$0xff]  ;;  %8306 = vmatpush3.bf16.msra.mxu1 %v8550_v37  ;;  %8321 = vmatprep.subr.bf16.mxu0 %v8551_v6  ;;  %v11584_v37 = vsel %vm5544_vm14, 1.0, %v12655_v7 }
 0x6ce   : > { %v11553_v31 = vld [vmem:[#allocation2 + $0x28] sm:$0xff]  ;;  %v11561_v4 = vpack.c.bf16 %v11551_v62, %v11549_v27  ;;  %8307 = vmatprep.subr.bf16.mxu1 %v8552_v59  ;;  %vm5851_vm7 = vcmp.lt.s32.totalorder %v5835_v40, 8  ;;  %v11678_v40 = vsel %vm5850_vm6, 1.0, %v12655_v7 }
 0x6cf   : > { %v5583_v17 = vmul.f32 %v11536_v58, %v11553_v31  ;;  %v11640_v5 = vld [vmem:[#allocation2 + $0x22] sm:$0xff]  ;;  %v11675_v56 = vld [vmem:[#allocation2 + $0x3a] sm:$0xff] }
 0x6d0   : > { %8281 = vmatprep.mubr.msk.bf16.mxu1 %vm1132_vm2, %v11561_v4  ;;  %8322 = vmatpush3.bf16.msra.mxu0 %v8551_v6 }
 0x6d1   : > { %v5588_v30 = vpack.c.bf16 %v5583_v17, %v5582_v44  ;;  %v11595_v24 = vld [vmem:[#allocation2 + $0x31] sm:$0xff]  ;;  %8308 = vmatpush3.bf16.msra.mxu1 %v8552_v59  ;;  %8323 = vmatprep.subr.bf16.mxu0 %v8553_v20  ;;  %v6013_v59 = vmul.f32 %v11444_v41, %v11457_v10  ;;  %v11631_v10 = vsel %vm5847_vm1, 1.0, %v12655_v7 }
 0x6d2   : > { %v11598_v55 = vld [vmem:[#allocation2 + $0x30] sm:$0xff]  ;;  %v11600_v44 = vld [vmem:[#allocation2 + $0x38] sm:$0xff]  ;;  %v11607_v0 = vpack.c.bf16 %v11580_v29, %v11595_v24  ;;  %8333 = vmatprep.subr.bf16.mxu1 %v11570_v51 }
 0x6d3   : > { %8297 = vmatprep.mubr.msk.bf16.mxu0 %vm1132_vm2, %v5588_v30  ;;  %v5584_v6 = vmul.f32 %v11584_v37, %v11598_v55  ;;  %v5585_v17 = vmul.f32 %v11588_v52, %v11600_v44  ;;  %v11620_v38 = vld [vmem:[#allocation2 + $0x2a] sm:$0xff]  ;;  %v6021_v13 = vpack.c.bf16 %v6014_v28, %v6013_v59  ;;  %v6018_v50 = vmul.f32 %v11536_v58, %v11598_v55 }
 0x6d4   : > { %8282 = vmatmul.mubr.msk.bf16.gmra.mxu1 %vm1132_vm2, %v11607_v0  ;;  %8324 = vmatpush3.bf16.msra.mxu0 %v8553_v20  ;;  %v5878_v20 = vmul.f32 %v11627_v32, %v11616_v12  ;;  %v5881_v28 = vmul.f32 %v11643_v25, %v11620_v38  ;;  %v6017_v59 = vmul.f32 %v11533_v63, %v11553_v31 }
 0x6d5   : > { %v5589_v30 = vpack.c.bf16 %v5585_v17, %v5584_v6  ;;  %8309 = vmatprep.mubr.msk.bf16.mxu1 %vm1132_vm2, %v5884_v36  ;;  %8349 = vmatprep.subr.bf16.mxu0 %v11593_v60  ;;  %v5879_v6 = vmul.f32 %v11631_v10, %v11623_v33  ;;  %v6015_v17 = vmul.f32 %v11475_v26, %v11472_v18 }
 0x6d6   : > { %v5880_v36 = vmul.f32 %v11634_v8, %v11640_v5 }
 0x6d7   : > { %8298 = vmatmul.mubr.msk.bf16.gmra.mxu0 %vm1132_vm2, %v5589_v30  ;;  %v5885_v43 = vpack.c.bf16 %v5879_v6, %v5878_v20  ;;  %v11667_v30 = vld [vmem:[#allocation2 + $0x32] sm:$0xff]  ;;  %v6022_v57 = vpack.c.bf16 %v6016_v23, %v6015_v17  ;;  %v6023_v6 = vpack.c.bf16 %v6018_v50, %v6017_v59  ;;  %v8559_v50 = vld [vmem:[%s11958_s12 + $0xa8] sm:$0xff]   ;;  %v8560_v59 = vld [vmem:[%s11958_s12 + $0x80] sm:$0xff]  }
 0x6d8   : > { %8325 = vmatprep.mubr.msk.bf16.mxu0 %vm1132_vm2, %v6021_v13  ;;  %v8556_v13 = vld [vmem:[%s11958_s12 + $0x90] sm:$0xff]   ;;  %v5886_v19 = vpack.c.bf16 %v5881_v28, %v5880_v36  ;;  %v11681_v28 = vsel %vm5851_vm7, 1.0, %v12655_v7  ;;  %v5882_v17 = vmul.f32 %v11678_v40, %v11667_v30  ;;  %v8558_v36 = vld [vmem:[%s11958_s12 + $0x88] sm:$0xff]  }
 0x6d9   : > { %v8557_v20 = vld [vmem:[%s11958_s12 + $0xb0] sm:$0xff]   ;;  %v5883_v7 = vmul.f32 %v11681_v28, %v11675_v56 }
 0x6db   : > { %v5887_v23 = vpack.c.bf16 %v5883_v7, %v5882_v17  ;;  %v6284_v7 = vmul.f32 %v11643_v25, %v11667_v30 }
 0x6dc   : > { %8310 = vmatmul.mubr.msk.bf16.vlgmr.msra.gmra.mxu1 %vm1132_vm2, %v5885_v43  ;;  %v6279_v43 = vmul.f32 %v11541_v14, %v11538_v22  ;;  %v8561_v22 = vld [vmem:[%s11958_s12 + $0xa0] sm:$0xff]  }
 0x6dd   : > { %8313 = vmatprep.mubr.msk.bf16.mxu1 %vm1132_vm2, %v5886_v19  ;;  %8334 = vmatpush3.bf16.msra.mxu1 %v11570_v51  ;;  %v11691_v51 = vld [vmem:[#allocation2 + $0x40] sm:$0xff] }
 0x6de   : > { %8335 = vmatprep.subr.bf16.mxu1 %v8556_v13  ;;  %v6020_v19 = vmul.f32 %v11588_v52, %v11691_v51 }
 0x6df   : > { %8326 = vmatmul.mubr.msk.bf16.vlgmr.msra.gmra.mxu0 %vm1132_vm2, %v6022_v57  ;;  %v6019_v57 = vmul.f32 %v11584_v37, %v11600_v44 }
 0x6e0   : > { %8329 = vmatprep.mubr.msk.bf16.mxu0 %vm1132_vm2, %v6023_v6  ;;  %8350 = vmatpush3.bf16.msra.mxu0 %v11593_v60  ;;  %v6280_v60 = vmul.f32 %v11544_v49, %v11616_v12  ;;  %v6150_v6 = vpack.c.bf16 %v11468_v48, %v11455_v21  ;;  %v6282_v21 = vmul.f32 %v11631_v10, %v11640_v5  ;;  %v8563_v48 = vld [vmem:[%s11958_s12 + $0xf8] sm:$0xff]  }
 0x6e1   : > { %8351 = vmatprep.subr.bf16.mxu0 %v8557_v20  ;;  %8336 = vmatpush3.bf16.msra.mxu1 %v8556_v13  ;;  %v6024_v13 = vpack.c.bf16 %v6020_v19, %v6019_v57  ;;  %v6151_v57 = vpack.c.bf16 %v11549_v27, %v11464_v54  ;;  %v8565_v54 = vld [vmem:[%s11958_s12 + $0xf0] sm:$0xff]   ;;  %v11744_v19 = vld [vmem:[#allocation2 + $0x42] sm:$0xff] }
 0x6e2   : > { %8337 = vmatprep.subr.bf16.mxu1 %v8558_v36  ;;  %v6287_v17 = vpack.c.bf16 %v6280_v60, %v6279_v43  ;;  %v8564_v43 = vld [vmem:[%s11958_s12 + $0xd0] sm:$0xff]   ;;  %v6152_v60 = vpack.c.bf16 %v11595_v24, %v11551_v62  ;;  %v8566_v62 = vld [vmem:[%s11958_s12 + $0xc8] sm:$0xff]  }
 0x6e3   : > { %v6149_v24 = vld [vmem:[#allocation2 + $0x41] sm:$0xff] }
 0x6e4   : > { %8352 = vmatpush3.bf16.msra.mxu0 %v8557_v20  ;;  %8314 = vmatmul.mubr.msk.bf16.gmra.mxu1 %vm1132_vm2, %v5887_v23  ;;  %v8562_v20 = vld [vmem:[%s11958_s12 + $0xd8] sm:$0xff]  }
 0x6e5   : > { %8353 = vmatprep.subr.bf16.mxu0 %v8559_v50  ;;  %8338 = vmatpush3.bf16.msra.mxu1 %v8558_v36  ;;  %v6283_v36 = vmul.f32 %v11634_v8, %v11620_v38 }
 0x6e6   : > { %8341 = vmatprep.mubr.msk.bf16.mxu1 %vm1132_vm2, %v6150_v6  ;;  %8339 = vmatprep.subr.bf16.mxu1 %v8560_v59  ;;  %v6417_v6 = vmul.f32 %v11452_v61, %v11472_v18  ;;  %v8569_v18 = vld [vmem:[%s11958_s12 + $0xe0] sm:$0xff]  }
 0x6e7   : > { %8330 = vmatmul.mubr.msk.bf16.gmra.mxu0 %vm1132_vm2, %v6024_v13  ;;  %v6289_v27 = vpack.c.bf16 %v6284_v7, %v6283_v36  ;;  %v6285_v13 = vmul.f32 %v11678_v40, %v11675_v56  ;;  %v6421_v36 = vmul.f32 %v11536_v58, %v11600_v44  ;;  %v6418_v7 = vmul.f32 %v11475_v26, %v11530_v46 }
 0x6e8   : > { %8354 = vmatpush3.bf16.msra.mxu0 %v8559_v50  ;;  %8357 = vmatprep.mubr.msk.bf16.mxu0 %vm1132_vm2, %v6287_v17  ;;  %v6281_v50 = vmul.f32 %v11627_v32, %v11623_v33  ;;  %v8567_v17 = vld [vmem:[%s11958_s12 + $0xe8] sm:$0xff]   ;;  %v6422_v26 = vmul.f32 %v11584_v37, %v11691_v51  ;;  %v6682_v58 = vmul.f32 %v11541_v14, %v11616_v12  ;;  %v8573_v37 = vld [vmem:[%s11958_s12 + $0x100] sm:$0xff]  }
 0x6e9   : > { %8355 = vmatprep.subr.bf16.mxu0 %v8561_v22  ;;  %8340 = vmatpush3.bf16.msra.mxu1 %v8560_v59  ;;  %v6416_v59 = vmul.f32 %v11444_v41, %v11470_v1  ;;  %v8568_v41 = vld [vmem:[%s11958_s12 + $0xc0] sm:$0xff]   ;;  %v6685_v12 = vmul.f32 %v11631_v10, %v11620_v38  ;;  %v6684_v14 = vmul.f32 %v11627_v32, %v11640_v5  ;;  %v8574_v32 = vld [vmem:[%s11960_s14 + $0x18] sm:$0xff]   ;;  %v8575_v5 = vld [vmem:[%s11960_s14 + $0x10] sm:$0xff]  }
 0x6ea   : > { %8365 = vmatprep.subr.bf16.mxu1 %v8562_v20  ;;  %v6288_v23 = vpack.c.bf16 %v6282_v21, %v6281_v50  ;;  %v8570_v21 = vld [vmem:[%s11958_s12 + $0x118] sm:$0xff]   ;;  %v6688_v38 = vmul.f32 %v11678_v40, %v11744_v19 }
 0x6eb   : > { %v6424_v61 = vpack.c.bf16 %v6417_v6, %v6416_v59 }
 0x6ec   : > { %8356 = vmatpush3.bf16.msra.mxu0 %v8561_v22  ;;  %8342 = vmatmul.mubr.msk.bf16.vlgmr.msra.gmra.mxu1 %vm1132_vm2, %v6151_v57  ;;  %v6286_v22 = vmul.f32 %v11681_v28, %v11744_v19 }
 0x6ed   : > { %8381 = vmatprep.subr.bf16.mxu0 %v8563_v48  ;;  %8345 = vmatprep.mubr.msk.bf16.mxu1 %vm1132_vm2, %v6152_v60 }
 0x6ee   : > { %8366 = vmatpush3.bf16.msra.mxu1 %v8562_v20  ;;  %v6153_v20 = vpack.c.bf16 %v6149_v24, %v11580_v29  ;;  %v6290_v1 = vpack.c.bf16 %v6286_v22, %v6285_v13  ;;  %v6419_v29 = vmul.f32 %v11478_v45, %v11553_v31  ;;  %v8571_v31 = vld [vmem:[%s11958_s12 + $0x110] sm:$0xff]  }
 0x6ef   : > { %8358 = vmatmul.mubr.msk.bf16.vlgmr.msra.gmra.mxu0 %vm1132_vm2, %v6288_v23  ;;  %8367 = vmatprep.subr.bf16.mxu1 %v8564_v43 }
 0x6f0   : > { %8361 = vmatprep.mubr.msk.bf16.mxu0 %vm1132_vm2, %v6289_v27  ;;  %8382 = vmatpush3.bf16.msra.mxu0 %v8563_v48  ;;  %v6420_v48 = vmul.f32 %v11533_v63, %v11598_v55  ;;  %v6425_v45 = vpack.c.bf16 %v6419_v29, %v6418_v7  ;;  %v8572_v63 = vld [vmem:[%s11958_s12 + $0x108] sm:$0xff]  }
 0x6f1   : > { %8383 = vmatprep.subr.bf16.mxu0 %v8565_v54  ;;  %v6552_v55 = vld [vmem:[#allocation2 + $0x49] sm:$0xff] }
 0x6f2   : > { %8368 = vmatpush3.bf16.msra.mxu1 %v8564_v43  ;;  %v6426_v57 = vpack.c.bf16 %v6421_v36, %v6420_v48  ;;  %v6556_v51 = vpack.c.bf16 %v6552_v55, %v6149_v24  ;;  %v6681_v43 = vld [vmem:[#allocation2 + $0x4a] sm:$0xff] }
 0x6f3   : > { %8369 = vmatprep.subr.bf16.mxu1 %v8566_v62  ;;  %v6689_v10 = vmul.f32 %v11681_v28, %v6681_v43 }
 0x6f4   : > { %8384 = vmatpush3.bf16.msra.mxu0 %v8565_v54  ;;  %8346 = vmatmul.mubr.msk.bf16.gmra.mxu1 %vm1132_vm2, %v6153_v20 }
 0x6f5   : > { %8385 = vmatprep.subr.bf16.mxu0 %v8567_v17  ;;  %8373 = vmatprep.mubr.msk.bf16.mxu1 %vm1132_vm2, %v6424_v61 }
 0x6f6   : > { %8370 = vmatpush3.bf16.msra.mxu1 %v8566_v62 }
 0x6f7   : > { %8362 = vmatmul.mubr.msk.bf16.gmra.mxu0 %vm1132_vm2, %v6290_v1  ;;  %8371 = vmatprep.subr.bf16.mxu1 %v8568_v41 }
 0x6f8   : > { %8386 = vmatpush3.bf16.msra.mxu0 %v8567_v17  ;;  %8389 = vmatprep.mubr.msk.bf16.mxu0 %vm1132_vm2, %v11484_v16  ;;  %v6415_v16 = vld [vmem:[#allocation2 + $0x48] sm:$0xff] }
 0x6f9   : > { %8387 = vmatprep.subr.bf16.mxu0 %v8569_v18  ;;  %v6423_v46 = vmul.f32 %v11588_v52, %v6415_v16 }
 0x6fa   : > { %8372 = vmatpush3.bf16.msra.mxu1 %v8568_v41 }
 0x6fb   : > { %8397 = vmatprep.subr.bf16.mxu1 %v8570_v21  ;;  %v6427_v44 = vpack.c.bf16 %v6423_v46, %v6422_v26 }
 0x6fc   : > { %8388 = vmatpush3.bf16.msra.mxu0 %v8569_v18 }
 0x6fd   : > { %8374 = vmatmul.mubr.msk.bf16.vlgmr.msra.gmra.mxu1 %vm1132_vm2, %v6425_v45  ;;  %8413 = vmatprep.subr.bf16.mxu0 %v8574_v32 }
 0x6fe   : > { %8377 = vmatprep.mubr.msk.bf16.mxu1 %vm1132_vm2, %v6426_v57  ;;  %8398 = vmatpush3.bf16.msra.mxu1 %v8570_v21 }
 0x6ff   : > { %8390 = vmatmul.mubr.msk.bf16.vlgmr.msra.gmra.mxu0 %vm1132_vm2, %v11561_v4  ;;  %8399 = vmatprep.subr.bf16.mxu1 %v8571_v31  ;;  %v6683_v4 = vmul.f32 %v11544_v49, %v11623_v33  ;;  %v6686_v33 = vmul.f32 %v11634_v8, %v11667_v30  ;;  %v6687_v49 = vmul.f32 %v11643_v25, %v11675_v56  ;;  %v8576_v25 = vld [vmem:[%s11960_s14 + $0x8] sm:$0xff]   ;;  %v8577_v30 = vld [vmem:[%s11960_s14] sm:$0xff]  }
 0x700   : > { %8393 = vmatprep.mubr.msk.bf16.mxu0 %vm1132_vm2, %v11607_v0  ;;  %v6691_v0 = vpack.c.bf16 %v6685_v12, %v6684_v14  ;;  %v6693_v8 = vpack.c.bf16 %v6689_v10, %v6688_v38  ;;  %8414 = vmatpush3.bf16.msra.mxu0 %v8574_v32 }
 0x701   : > { %v6690_v52 = vpack.c.bf16 %v6683_v4, %v6682_v58  ;;  %v6692_v50 = vpack.c.bf16 %v6687_v49, %v6686_v33  ;;  %8415 = vmatprep.subr.bf16.mxu0 %v8575_v5 }
 0x702   : > { %8400 = vmatpush3.bf16.msra.mxu1 %v8571_v31 }
 0x703   : > { %8401 = vmatprep.subr.bf16.mxu1 %v8572_v63 }
 0x704   : > { %8416 = vmatpush3.bf16.msra.mxu0 %v8575_v5 }
 0x705   : > { %8378 = vmatmul.mubr.msk.bf16.gmra.mxu1 %vm1132_vm2, %v6427_v44  ;;  %8417 = vmatprep.subr.bf16.mxu0 %v8576_v25 }
 0x706   : > { %8402 = vmatpush3.bf16.msra.mxu1 %v8572_v63  ;;  %8405 = vmatprep.mubr.msk.bf16.mxu1 %vm1132_vm2, %v6690_v52 }
 0x707   : > { %8394 = vmatmul.mubr.msk.bf16.gmra.mxu0 %vm1132_vm2, %v6556_v51  ;;  %8403 = vmatprep.subr.bf16.mxu1 %v8573_v37 }
 0x708   : > { %8418 = vmatpush3.bf16.msra.mxu0 %v8576_v25 }
 0x709   : > { %8419 = vmatprep.subr.bf16.mxu0 %v8577_v30 }
 0x70a   : > { %8404 = vmatpush3.bf16.msra.mxu1 %v8573_v37 }
 0x70b   : > { %8429 = vmatprep.subr.bf16.mxu1 %v8574_v32 }
 0x70c   : > { %8420 = vmatpush3.bf16.msra.mxu0 %v8577_v30 }
 0x70d   : > { %8406 = vmatmul.mubr.msk.bf16.vlgmr.msra.gmra.mxu1 %vm1132_vm2, %v6691_v0 }
 0x70e   : > { %8409 = vmatprep.mubr.msk.bf16.mxu1 %vm1132_vm2, %v6692_v50  ;;  %8433 = vmatpush3.bf16.msra.mxu1 %v8574_v32 }
 0x70f   : > { %8430 = vmatprep.subr.bf16.mxu1 %v8575_v5 }
 0x712   : > { %8434 = vmatpush3.bf16.msra.mxu1 %v8575_v5 }
 0x713   : > { %8431 = vmatprep.subr.bf16.mxu1 %v8576_v25 }
 0x715   : > { %8410 = vmatmul.mubr.msk.bf16.gmra.mxu1 %vm1132_vm2, %v6693_v8 }
 0x716   : > { %8435 = vmatpush3.bf16.msra.mxu1 %v8576_v25 }
 0x717   : > { %8432 = vmatprep.subr.bf16.mxu1 %v8577_v30 }
 0x71a   : > { %8436 = vmatpush3.bf16.msra.mxu1 %v8577_v30 }
 0x784   : > { %v8279_v56 = vpop.f32.mrf.mxu1 }
 0x786   : > { %v5688_v28 = vpop.f32.mrf.mxu1 }
 0x787   : > { %v8295_v40 = vpop.f32.mrf.mxu0 }
 0x788   : > { %v8280_v23 = vpop.f32.mrf.mxu1  ;;  %v5798_v8 = vadd.f32 %v8295_v40, %v8279_v56 }
 0x789   : > { %v5789_v60 = vpop.f32.mrf.mxu0 }
 0x78a   : > { %v5691_v27 = vpop.f32.mrf.mxu1  ;;  %v5790_v10 = vadd.f32 %v5789_v60, %v5688_v28 }
 0x78b   : > { %v8296_v54 = vpop.f32.mrf.mxu0 }
 0x78c   : > { %v5801_v25 = vadd.f32 %v8296_v54, %v8280_v23 }
 0x78d   : > { %v5792_v19 = vpop.f32.mrf.mxu0 }
 0x78e   : > { %v5793_v53 = vadd.f32 %v5792_v19, %v5691_v27 }
 0x794   : > { %v8283_v62 = vpop.f32.mrf.mxu1 }
 0x796   : > { %v5704_v24 = vpop.f32.mrf.mxu1 }
 0x797   : > { %v8299_v59 = vpop.f32.mrf.mxu0 }
 0x798   : > { %v8284_v6 = vpop.f32.mrf.mxu1  ;;  %v5814_v40 = vadd.f32 %v8299_v59, %v8283_v62 }
 0x799   : > { %v5805_v13 = vpop.f32.mrf.mxu0 }
 0x79a   : > { %v5707_v22 = vpop.f32.mrf.mxu1 }
 0x79b   : > { %v8300_v17 = vpop.f32.mrf.mxu0 }
 0x79c   : > { %v8311_v41 = vpop.f32.mrf.mxu1  ;;  %v5817_v23 = vadd.f32 %v8300_v17, %v8284_v6 }
 0x79d   : > { %v5808_v20 = vpop.f32.mrf.mxu0  ;;  %v5999_v11 = vadd.f32 %v8311_v41, %v5798_v8 }
 0x79e   : > { %v5966_v61 = vpop.f32.mrf.mxu1 }
 0x79f   : > { %v8327_v1 = vpop.f32.mrf.mxu0  ;;  %v5997_v30 = vadd.f32 %v5966_v61, %v5790_v10  ;;  %v5809_v10 = vadd.f32 %v5808_v20, %v5707_v22 }
 0x7a0   : > { %v8312_v18 = vpop.f32.mrf.mxu1  ;;  %v6136_v9 = vadd.f32 %v8327_v1, %v5999_v11 }
 0x7a1   : > { %v6103_v29 = vpop.f32.mrf.mxu0  ;;  %v6000_v42 = vadd.f32 %v8312_v18, %v5801_v25 }
 0x7a2   : > { %v5969_v21 = vpop.f32.mrf.mxu1  ;;  %v6134_v3 = vadd.f32 %v6103_v29, %v5997_v30 }
 0x7a3   : > { %v8328_v48 = vpop.f32.mrf.mxu0  ;;  %v5998_v39 = vadd.f32 %v5969_v21, %v5793_v53 }
 0x7a4   : > { %v8315_v36 = vpop.f32.mrf.mxu1  ;;  %v6137_v28 = vadd.f32 %v8328_v48, %v6000_v42 }
 0x7a5   : > { %v6106_v7 = vpop.f32.mrf.mxu0  ;;  %v6003_v27 = vadd.f32 %v8315_v36, %v5814_v40 }
 0x7a6   : > { %v5982_v45 = vpop.f32.mrf.mxu1  ;;  %v6135_v54 = vadd.f32 %v6106_v7, %v5998_v39 }
 0x7a7   : > { %v8331_v31 = vpop.f32.mrf.mxu0 }
 0x7a8   : > { %v8316_v57 = vpop.f32.mrf.mxu1  ;;  %v6140_v62 = vadd.f32 %v8331_v31, %v6003_v27 }
 0x7a9   : > { %v6119_v16 = vpop.f32.mrf.mxu0  ;;  %v6004_v8 = vadd.f32 %v8316_v57, %v5817_v23 }
 0x7aa   : > { %v5985_v26 = vpop.f32.mrf.mxu1 }
 0x7ab   : > { %v8332_v46 = vpop.f32.mrf.mxu0  ;;  %v6002_v11 = vadd.f32 %v5985_v26, %v5809_v10 }
 0x7ac   : > { %v8343_v58 = vpop.f32.mrf.mxu1  ;;  %v6141_v39 = vadd.f32 %v8332_v46, %v6004_v8 }
 0x7ad   : > { %v11836_v63 = vpop.f32.mrf.mxu0  ;;  %v6265_v60 = vadd.f32 %v8343_v58, %v6136_v9 }
 0x7ae   : > { %v6232_v4 = vpop.f32.mrf.mxu1  ;;  %v6139_v20 = vadd.f32 %v11836_v63, %v6002_v11 }
 0x7af   : > { %v8359_v55 = vpop.f32.mrf.mxu0  ;;  %v6263_v56 = vadd.f32 %v6232_v4, %v6134_v3 }
 0x7b0   : > { %v8344_v44 = vpop.f32.mrf.mxu1  ;;  %v6402_v1 = vadd.f32 %v8359_v55, %v6265_v60 }
 0x7b1   : > { %v6369_v37 = vpop.f32.mrf.mxu0  ;;  %v6266_v61 = vadd.f32 %v8344_v44, %v6137_v28 }
 0x7b2   : > { %v6235_v52 = vpop.f32.mrf.mxu1  ;;  %v6400_v29 = vadd.f32 %v6369_v37, %v6263_v56 }
 0x7b3   : > { %v8360_v51 = vpop.f32.mrf.mxu0  ;;  %v6264_v53 = vadd.f32 %v6235_v52, %v6135_v54 }
 0x7b4   : > { %v8347_v12 = vpop.f32.mrf.mxu1  ;;  %v6403_v42 = vadd.f32 %v8360_v51, %v6266_v61 }
 0x7b5   : > { %v6372_v33 = vpop.f32.mrf.mxu0  ;;  %v6269_v48 = vadd.f32 %v8347_v12, %v6140_v62 }
 0x7b6   : > { %v6248_v14 = vpop.f32.mrf.mxu1 }
 0x7b7   : > { %v11838_v49 = vpop.f32.mrf.mxu0 }
 0x7b8   : > { %12660 = vst [vmem:[#allocation130_spill] sm:$0xff] %v11838_v49  ;;  %v8348_v0 = vpop.f32.mrf.mxu1 }
 0x7b9   : > { %v6385_v50 = vpop.f32.mrf.mxu0  ;;  %v6270_v7 = vadd.f32 %v8348_v0, %v6141_v39 }
 0x7ba   : > { %v6251_v43 = vpop.f32.mrf.mxu1 }
 0x7bb   : > { %v11840_v38 = vpop.f32.mrf.mxu0  ;;  %v6268_v26 = vadd.f32 %v6251_v43, %v6139_v20  ;;  %v7416_v20 = vld [vmem:[%s11961_s15] ss:$0 sm:$0xff] }
 0x7bc   : > { %12661 = vst [vmem:[#allocation144_spill] sm:$0xff] %v11840_v38  ;;  %v5806_v38 = vadd.f32 %v5805_v13, %v5704_v24  ;;  %v6401_v13 = vadd.f32 %v6372_v33, %v6264_v53 }
 0x7bd   : > { %v11842_v32 = vpop.f32.mrf.mxu0  ;;  %v8375_v5 = vpop.f32.mrf.mxu1 }
 0x7be   : > { %12662 = vst [vmem:[#allocation143_spill] sm:$0xff] %v11842_v32  ;;  %v6001_v41 = vadd.f32 %v5982_v45, %v5806_v38  ;;  %v6539_v9 = vadd.f32 %v8375_v5, %v6402_v1 }
 0x7bf   : > { %v6506_v35 = vpop.f32.mrf.mxu1  ;;  %v8391_v2 = vpop.f32.mrf.mxu0  ;;  %v12663_v44 = vld [vmem:[#allocation130_spill] sm:$0xff] }
 0x7c0   : > { %v6138_v24 = vadd.f32 %v6119_v16, %v6001_v41  ;;  %v6537_v3 = vadd.f32 %v6506_v35, %v6400_v29  ;;  %v6668_v58 = vadd.f32 %v8391_v2, %v6539_v9  ;;  %v6406_v37 = vadd.f32 %v12663_v44, %v6269_v48 }
 0x7c1   : > { %v8376_v47 = vpop.f32.mrf.mxu1  ;;  %v6635_v15 = vpop.f32.mrf.mxu0 }
 0x7c2   : > { %v6267_v17 = vadd.f32 %v6248_v14, %v6138_v24  ;;  %v6540_v22 = vadd.f32 %v8376_v47, %v6403_v42  ;;  %v6666_v45 = vadd.f32 %v6635_v15, %v6537_v3  ;;  %v7415_v15 = vld [vmem:[%s11959_s13] ss:$0 sm:$0xff] }
 0x7c3   : > { %v6509_v34 = vpop.f32.mrf.mxu1  ;;  %v8392_v49 = vpop.f32.mrf.mxu0  ;;  %v12664_v51 = vld [vmem:[#allocation144_spill] sm:$0xff] }
 0x7c4   : > { %v6538_v57 = vadd.f32 %v6509_v34, %v6401_v13  ;;  %v6404_v35 = vadd.f32 %v6385_v50, %v6267_v17  ;;  %v6669_v31 = vadd.f32 %v8392_v49, %v6540_v22  ;;  %v6407_v47 = vadd.f32 %v12664_v51, %v6270_v7 }
 0x7c5   : > { %v8379_v32 = vpop.f32.mrf.mxu1  ;;  %v6638_v19 = vpop.f32.mrf.mxu0  ;;  %v12665_v12 = vld [vmem:[#allocation143_spill] sm:$0xff] }
 0x7c6   : > { %v6667_v33 = vadd.f32 %v6638_v19, %v6538_v57  ;;  %v6405_v2 = vadd.f32 %v12665_v12, %v6268_v26  ;;  %v6543_v14 = vadd.f32 %v8379_v32, %v6406_v37 }
 0x7c7   : > { %v6522_v18 = vpop.f32.mrf.mxu1  ;;  %v8395_v59 = vpop.f32.mrf.mxu0 }
 0x7c8   : > { %v6541_v63 = vadd.f32 %v6522_v18, %v6404_v35  ;;  %v6672_v60 = vadd.f32 %v8395_v59, %v6543_v14  ;;  %v12668_v35 = vld [vmem:[#allocation67_spill] sm:$0xff] }
 0x7c9   : > { %v8380_v21 = vpop.f32.mrf.mxu1  ;;  %v6651_v16 = vpop.f32.mrf.mxu0 }
 0x7ca   : > { %v6544_v49 = vadd.f32 %v8380_v21, %v6407_v47  ;;  %v6670_v28 = vadd.f32 %v6651_v16, %v6541_v63 }
 0x7cb   : > { %v6525_v6 = vpop.f32.mrf.mxu1  ;;  %v8396_v0 = vpop.f32.mrf.mxu0 }
 0x7cc   : > { %v6542_v56 = vadd.f32 %v6525_v6, %v6405_v2  ;;  %v6673_v61 = vadd.f32 %v8396_v0, %v6544_v49  ;;  %v12674_v49 = vld [vmem:[#allocation129_spill] sm:$0xff] }
 0x7cd   : > { %v8407_v36 = vpop.f32.mrf.mxu1  ;;  %v6654_v23 = vpop.f32.mrf.mxu0 }
 0x7ce   : > { %v6805_v46 = vadd.f32 %v8407_v36, %v6668_v58  ;;  %v6671_v29 = vadd.f32 %v6654_v23, %v6542_v56 }
 0x7cf   : > { %v6772_v4 = vpop.f32.mrf.mxu1 }
 0x7d0   : > { %v6803_v55 = vadd.f32 %v6772_v4, %v6666_v45  ;;  %v6820_v25 = vadd.f32 %v7415_v15, %v6805_v46  ;;  %v12666_v45 = vld [vmem:[#allocation122_spill] sm:$0xff] }
 0x7d1   : > { %v8408_v52 = vpop.f32.mrf.mxu1  ;;  %v12667_v57 = vmax.f32 %v12666_v45, 0.0 }
 0x7d2   : > { %v6806_v34 = vadd.f32 %v8408_v52, %v6669_v31  ;;  %v6818_v43 = vadd.f32 %v7415_v15, %v6803_v55  ;;  %v6828_v32 = vmax.f32 %v6820_v25, 0.0  ;;  %v12669_v31 = vmax.f32 %v12668_v35, 0.0  ;;  %v12670_v52 = vld [vmem:[#allocation123_spill] sm:$0xff] }
 0x7d3   : > { %v6775_v50 = vpop.f32.mrf.mxu1  ;;  %v12671_v51 = vmax.f32 %v12670_v52, 0.0 }
 0x7d4   : > { %v6821_v38 = vadd.f32 %v7415_v15, %v6806_v34  ;;  %v6804_v5 = vadd.f32 %v6775_v50, %v6667_v33  ;;  %v6826_v10 = vmax.f32 %v6818_v43, 0.0  ;;  %v12672_v34 = vld [vmem:[#allocation116_spill] sm:$0xff]  ;;  %v12675_v43 = vmax.f32 %v12674_v49, 0.0 }
 0x7d5   : > { %v8411_v30 = vpop.f32.mrf.mxu1  ;;  %v12673_v12 = vmax.f32 %v12672_v34, 0.0 }
 0x7d6   : > { %v6819_v40 = vadd.f32 %v7415_v15, %v6804_v5  ;;  %v6829_v54 = vmax.f32 %v6821_v38, 0.0  ;;  %v6809_v18 = vadd.f32 %v8411_v30, %v6672_v60 }
 0x7d7   : > { %v6788_v41 = vpop.f32.mrf.mxu1 }
 0x7d8   : > { %v6827_v27 = vmax.f32 %v6819_v40, 0.0  ;;  %v6807_v19 = vadd.f32 %v6788_v41, %v6670_v28  ;;  %v6835_v1 = vpack.c.bf16 %v6829_v54, %v6828_v32  ;;  %v6824_v62 = vadd.f32 %v7415_v15, %v6809_v18  ;;  %v12676_v28 = vld [vmem:[#allocation115_spill] sm:$0xff]  ;;  %v12678_v41 = vld [vmem:[#allocation117_spill] sm:$0xff]  ;;  %v12680_v32 = vld [vmem:[#allocation134_spill] sm:$0xff] }
 0x7d9   : > { %v8412_v8 = vpop.f32.mrf.mxu1  ;;  %v12677_v56 = vmax.f32 %v12676_v28, 0.0  ;;  %v12681_v18 = vmax.f32 %v12680_v32, 0.0 }
 0x7da   : > { %v6834_v53 = vpack.c.bf16 %v6827_v27, %v6826_v10  ;;  %v6810_v11 = vadd.f32 %v8412_v8, %v6673_v61  ;;  %v6822_v24 = vadd.f32 %v7415_v15, %v6807_v19  ;;  %v6832_v13 = vmax.f32 %v6824_v62, 0.0 }
 0x7db   : > { %v6791_v21 = vpop.f32.mrf.mxu1  ;;  %v12679_v61 = vmax.f32 %v12678_v41, 0.0 }
 0x7dc   : > { %v6825_v42 = vadd.f32 %v7415_v15, %v6810_v11  ;;  %v6808_v3 = vadd.f32 %v6791_v21, %v6671_v29  ;;  %8421 = vmatprep.mubr.msk.bf16.mxu0 %vm1132_vm2, %v6834_v53  ;;  %v6830_v6 = vmax.f32 %v6822_v24, 0.0 }
 0x7dd   : > { %8422 = vmatmul.mubr.msk.bf16.vlgmr.msra.gmra.mxu0 %vm1132_vm2, %v6835_v1 }
 0x7de   : > { %v6823_v9 = vadd.f32 %v7415_v15, %v6808_v3  ;;  %v6833_v59 = vmax.f32 %v6825_v42, 0.0 }
 0x7e0   : > { %v6831_v39 = vmax.f32 %v6823_v9, 0.0  ;;  %v6837_v22 = vpack.c.bf16 %v6833_v59, %v6832_v13 }
 0x7e2   : > { %v6836_v17 = vpack.c.bf16 %v6831_v39, %v6830_v6 }
 0x7e4   : > { %8425 = vmatprep.mubr.msk.bf16.mxu1 %vm1132_vm2, %v6836_v17 }
 0x7e5   : > { %8426 = vmatmul.mubr.msk.bf16.vlgmr.msra.gmra.mxu1 %vm1132_vm2, %v6837_v22 }
 0x89d   : > { %v8423_v48 = vpop.f32.mrf.mxu0 }
 0x89e   : > { %v6932_v36 = vadd.f32 %v8423_v48, %v7416_v20 }
 0x89f   : > { %v6923_v7 = vpop.f32.mrf.mxu0 }
 0x8a0   : > { %v6956_v26 = vadd.f32 %v6932_v36, %v12667_v57  ;;  %v6924_v58 = vadd.f32 %v7416_v20, %v6923_v7 }
 0x8a1   : > { %v8424_v16 = vpop.f32.mrf.mxu0 }
 0x8a2   : > { %v6964_v4 = vmax.f32 %v6956_v26, 0.0  ;;  %v6954_v55 = vadd.f32 %v6924_v58, %v12669_v31  ;;  %v6935_v44 = vadd.f32 %v8424_v16, %v7416_v20 }
 0x8a3   : > { %v6926_v37 = vpop.f32.mrf.mxu0 }
 0x8a4   : > { %6972 = vst.msk [vmem:[%s11865_s28 + $0x10] sm:$0xff] %vm5295_vm5, %v6964_v4  ;;  %v6962_v46 = vmax.f32 %v6954_v55, 0.0  ;;  %v6957_v47 = vadd.f32 %v6935_v44, %v12671_v51  ;;  %v6927_v33 = vadd.f32 %v7416_v20, %v6926_v37 }
 0x8a5   : > { %v8427_v63 = vpop.f32.mrf.mxu1 }
 0x8a6   : > { %6970 = vst.msk [vmem:[%s11865_s28] sm:$0xff] %vm5295_vm5, %v6962_v46  ;;  %v6965_v15 = vmax.f32 %v6957_v47, 0.0  ;;  %v6955_v2 = vadd.f32 %v6927_v33, %v12673_v12  ;;  %v6948_v14 = vadd.f32 %v8427_v63, %v7416_v20 }
 0x8a7   : > { %v6939_v0 = vpop.f32.mrf.mxu1 }
 0x8a8   : > { %6973 = vst.msk [vmem:[%s11865_s28 + $0x18] sm:$0xff] %vm5295_vm5, %v6965_v15  ;;  %v6963_v50 = vmax.f32 %v6955_v2, 0.0  ;;  %v6960_v38 = vadd.f32 %v6948_v14, %v12675_v43  ;;  %v6940_v5 = vadd.f32 %v7416_v20, %v6939_v0 }
 0x8a9   : > { %v8428_v25 = vpop.f32.mrf.mxu1 }
 0x8aa   : > { %6971 = vst.msk [vmem:[%s11865_s28 + $0x8] sm:$0xff] %vm5295_vm5, %v6963_v50  ;;  %v6968_v30 = vmax.f32 %v6960_v38, 0.0  ;;  %v6958_v40 = vadd.f32 %v6940_v5, %v12677_v56  ;;  %v6951_v60 = vadd.f32 %v8428_v25, %v7416_v20 }
 0x8ab   : > { %v6942_v23 = vpop.f32.mrf.mxu1 }
 0x8ac   : > { %6976 = vst.msk [vmem:[%s11865_s28 + $0x30] sm:$0xff] %vm5295_vm5, %v6968_v30  ;;  %v6966_v54 = vmax.f32 %v6958_v40, 0.0  ;;  %v6961_v10 = vadd.f32 %v6951_v60, %v12679_v61  ;;  %v6943_v27 = vadd.f32 %v7416_v20, %v6942_v23 }
 0x8ae   : > { %6974 = vst.msk [vmem:[%s11865_s28 + $0x20] sm:$0xff] %vm5295_vm5, %v6966_v54  ;;  %v6969_v19 = vmax.f32 %v6961_v10, 0.0  ;;  %v6959_v8 = vadd.f32 %v6943_v27, %v12681_v18 }
 0x8b0   : > { %6977 = vst.msk [vmem:[%s11865_s28 + $0x38] sm:$0xff] %vm5295_vm5, %v6969_v19  ;;  %v6967_v29 = vmax.f32 %v6959_v8, 0.0 }
 0x8b2   : > { %6975 = vst.msk [vmem:[%s11865_s28 + $0x28] sm:$0xff] %vm5295_vm5, %v6967_v29 }
 0x8b3   : > { %8624 = shalt.err (!%p8621_p3)
}
 0x8b4   : > { %s8625_s27 = scalar_lea.hbm %s11896_s19, 1024  ;;  %s8629_s18 = scalar_lea.hbm %s11962_s16, 2048 }
 0x8b5   : > { %p8626_p4 = scmp.ne.s32.totalorder %s11896_s19, %s8625_s27  ;;  %p8630_p9 = scmp.lt.s32.totalorder %s11896_s19, %s11962_s16 }
 0x8b6   : > { %p8631_p10 = scmp.lt.s32.totalorder %s8629_s18, %s8625_s27 }
 0x8b7   : > { %p8627_p7 = pnand %p8626_p4, %p8800_p5 }
 0x8b8   : > { %p8632_p11 = por %p8631_p10, %p8630_p9 }
 0x8b9   : > { %p8628_p8 = pneg %p8627_p7 }
 0x8bb   : > { %p8633_p12 = pnand %p8632_p11, %p8628_p8 }
 0x8bd   : > { %8636 = shalt.err (!%p8633_p12)
}
 0x8be   : > { %s8675_s17 = smov 128   ;;  %s8676_s26 = smov 8  }
 0x8bf   : > { %8439 = dma.vmem_to_hbm [thread:$0]  (%p8800_p5), %s11898_s23, 1024, %s11896_s19, %s11906_s25, %s8675_s17, %s8675_s17, %s8676_s26  }
 0x8c0 PF: > { %p8445_p13 = scmp.ge.s32.totalorder %s8671_s24, 2  ;;  %s7007_s28 = sand.u32 1, %s8659_s21  }
 0x8c1   : > { %s7008_s1 = scalar_lea.sflag [#allocation4], %s7007_s28 }
 0x8c2   : > { %p8442_p0 = pnand %p8445_p13, %p8804_p6 }
 0x8c4   : > { %p8443_p1 = pneg %p8442_p0 }
 0x8c6   : > { %8654 = dma.done.wait (%p8443_p1), %s7008_s1, 1024  }
 0x8c7   : > { %8656 = vsyncadd (%p8443_p1), %s7008_s1, 4294966272  ;;  %s12683_s24 = sld [smem:[#allocation7_spill]]  ;;  %s12686_s21 = smov %s8663_s22 }
 0x8c8   : > { %s12684_s27 = sld [smem:[#allocation6_spill]] }
 0x8c9   : > { %s12685_s23 = sld [smem:[#allocation8_spill]] }
 0x8cd   : > { %p26_p2 = scmp.ge.s32.totalorder %s12683_s24, 4  }
 0x8ce   : > { %s12687_s22 = smov %s12684_s27 }
 0x8cf   :  { %28 = sbr.rel (!%p26_p2) target bundleno = 6 (0x6), region = 119 }
 0x8d4   :  { %7013 = vsyncpa [#allocation4], 1 }
 0x8d5   :  { %7015 = vsyncpa [#allocation4 + $0x1], 1 }

</bundles_post_ra>
